<compile_context>
chip_gen: v5e
topology: v5e:2x2
jax: 0.10.0
libtpu: 0.0.40
codegen_flags: <defaults>
</compile_context>

<pallas_src>
import functools

import jax
import jax.numpy as jnp
import numpy as np
from jax.experimental import pallas as pl
from jax.experimental.pallas import tpu as pltpu

H = 20          # EEG electrodes (== spatial conv kernel height)
W = 64          # time samples (divisible by 16)
K = 51          # temporal conv kernel width
PAD = 25        # temporal conv padding (0, 25)
C = 16          # channels produced by the temporal conv
E = 40          # emb_size
W1 = W // 4     # after first AvgPool2d((1, 4))
W2 = W1 // 4    # after second AvgPool2d((1, 4))


def _elu(v):
    return jnp.where(v > 0, v, jnp.exp(jnp.minimum(v, 0.0)) - 1.0)


def fe_kernel(x_ref, y_ref, mconv_ref, b1_ref, p1_ref, ws_ref, s_ref, b2_ref,
              mproj_ref, pb_ref, ox_ref, oy_ref, *, bf16_elu=False):
    bblk = x_ref.shape[0] // H
    # Fuse the two streams in VMEM so every matmul sees 2*bblk*H rows.
    xx = jnp.concatenate([x_ref[...], y_ref[...]], axis=0)          # (Rb*H, W) f32
    # ---- temporal conv as one Toeplitz matmul (BN1 scale folded), f32 on the MXU ----
    t = jnp.dot(xx, mconv_ref[...],
                preferred_element_type=jnp.float32)                 # (Rb*H, C*W)
    t = t + b1_ref[...]                                             # BN1 shift (f32)
    if bf16_elu:            # v6e/v7x: bf16 VPU/EUP, result feeds a bf16 matmul anyway
        t = _elu(t.astype(jnp.bfloat16))
    else:                   # v5e/older: no bf16 VPU/EUP, keep ELU in f32
        t = _elu(t).astype(jnp.bfloat16)
    # ---- AvgPool2d((1, 4)) #1 as a block-diagonal matmul ----
    yp = jnp.dot(t, p1_ref[...],
                 preferred_element_type=jnp.float32)                # (Rb*H, C*W1)
    # ---- depthwise (20,1) spatial conv (BN2 scale folded): per-(c,h) scale,
    #      then per-sample sum over the H rows via a tiny 0/1 summing matmul ----
    yw = yp * ws_ref[...]                                           # (Rb*H, C*W1)
    z = jnp.dot(s_ref[...], yw.astype(jnp.bfloat16),
                preferred_element_type=jnp.float32)                 # (Rb, C*W1)
    z = _elu(z + b2_ref[...])                                       # BN2 shift + ELU
    # ---- AvgPool2d((1, 4)) #2 fused with the 1x1 projection conv + rearrange ----
    out = jnp.dot(z.astype(jnp.bfloat16), mproj_ref[...],
                  preferred_element_type=jnp.float32)               # (Rb, W2*E)
    out = out + pb_ref[...]
    ox_ref[...] = out[:bblk]
    oy_ref[...] = out[bblk:]


def make_params(key):
    """Returns (raw torch-layout params, fused/precomputed kernel operands)."""
    ks = jax.random.split(key, 12)
    eps = 1e-5
    raw = dict(
        wt=0.1 * jax.random.normal(ks[0], (C, K), jnp.float32),   # Conv2d(1,16,(1,51)) weight
        g1=0.5 + jax.random.uniform(ks[1], (C,), jnp.float32),    # BatchNorm2d(16) #1
        be1=0.1 * jax.random.normal(ks[2], (C,), jnp.float32),
        m1=0.1 * jax.random.normal(ks[3], (C,), jnp.float32),
        v1=0.5 + jax.random.uniform(ks[4], (C,), jnp.float32),
        ws=0.1 * jax.random.normal(ks[5], (C, H), jnp.float32),   # Conv2d(16,16,(20,1),groups=16)
        g2=0.5 + jax.random.uniform(ks[6], (C,), jnp.float32),    # BatchNorm2d(16) #2
        be2=0.1 * jax.random.normal(ks[7], (C,), jnp.float32),
        m2=0.1 * jax.random.normal(ks[8], (C,), jnp.float32),
        v2=0.5 + jax.random.uniform(ks[9], (C,), jnp.float32),
        # TODO(synk): reference declares Conv2d(32, emb_size, (1,1)) but spatial_conv only
        # emits 16 channels (the PyTorch forward would raise); we use in_channels=16.
        pw=0.1 * jax.random.normal(ks[10], (E, C), jnp.float32),
        pb=0.1 * jax.random.normal(ks[11], (E,), jnp.float32),
    )
    # Fold inference-mode BatchNorm scales into the bias-free convs.
    s1 = raw["g1"] / jnp.sqrt(raw["v1"] + eps)
    b1 = raw["be1"] - raw["m1"] * s1
    s2 = raw["g2"] / jnp.sqrt(raw["v2"] + eps)
    b2 = raw["be2"] - raw["m2"] * s2
    wt_s = raw["wt"] * s1[:, None]                                 # (C, K)
    ws_s = raw["ws"] * s2[:, None]                                 # (C, H)

    # Toeplitz matrix: Mconv[tau, c*W + w] = wt_s[c, tau - w + PAD] (0 outside the window).
    tau = jnp.arange(W)[:, None]                                   # (W, 1)
    col = jnp.arange(C * W)[None, :]                               # (1, C*W)
    c_idx, w_idx = col // W, col % W
    k_idx = tau - w_idx + PAD
    valid = (k_idx >= 0) & (k_idx < K)
    mconv = jnp.where(valid, wt_s[c_idx, jnp.clip(k_idx, 0, K - 1)], 0.0)   # (W, C*W)

    # AvgPool2d((1,4)) #1 as a block-diagonal matrix over the (c, w) columns.
    r = jnp.arange(C * W)
    cp = jnp.arange(C * W1)
    p1 = jnp.where((r[:, None] // W == cp[None, :] // W1)
                   & ((r[:, None] % W) // 4 == cp[None, :] % W1), 0.25, 0.0)  # (C*W, C*W1)

    # AvgPool2d((1,4)) #2 fused with 1x1 projection: Mproj[c*W1+w1, w2*E+e] = .25*[w1//4==w2]*pw[e,c]
    rr = jnp.arange(C * W1)
    cc = jnp.arange(W2 * E)
    rc, rw1 = rr // W1, rr % W1
    cw2, ce = cc // E, cc % E
    mproj = (jnp.where((rw1[:, None] // 4) == cw2[None, :], 0.25, 0.0)
             * raw["pw"][ce[None, :], rc[:, None]])                 # (C*W1, W2*E)

    fused = dict(
        mconv=mconv,                                                # (W, C*W)   f32 (51-tap conv kept f32)
        b1_row=jnp.repeat(b1, W)[None, :],                          # (1, C*W)   f32
        p1=p1.astype(jnp.bfloat16),                                 # (C*W, C*W1)
        ws_rep=jnp.repeat(ws_s.T, W1, axis=1),                      # (H, C*W1)  f32
        b2_row=jnp.repeat(b2, W1)[None, :],                         # (1, C*W1)  f32
        mproj=mproj.astype(jnp.bfloat16),                           # (C*W1, W2*E)
        pb_row=jnp.tile(raw["pb"], W2)[None, :],                    # (1, W2*E)  f32
    )
    return raw, fused


def make_block_consts(fused, bblk):
    """Per-block-size constants, hoisted out of the jitted per-call path."""
    rb = 2 * bblk   # x and y stream blocks are concatenated inside the kernel
    return dict(
        ws_tiled=jnp.tile(fused["ws_rep"], (rb, 1)),                      # (rb*H, C*W1) f32
        s_sum=jnp.repeat(jnp.eye(rb, dtype=jnp.bfloat16), H, axis=1),     # (rb, rb*H)
    )


def _pick_block_batch(b):
    """Per-stream batch block.  Small batches -> single full-extent grid step (fills
    the MXU M dim, no per-step pipeline overhead).  Large batches -> the largest
    multiple-of-8 divisor <= 32 (8-aligned output sublanes, >= 320 M rows/step,
    ~15 MB peak VMEM).  Fallback keeps full-extent blocks so (8,128) rules hold."""
    if b <= 32:
        return b
    for cand in range(32, 7, -8):
        if b % cand == 0:
            return cand
    return b


def _bf16_elu_supported():
    """bf16 VPU/EUP exists on v6e/v7x; keep f32 elementwise on v5e and older."""
    try:
        kind = jax.devices()[0].device_kind.lower()
    except Exception:
        return False
    return ("v6" in kind) or ("v7" in kind)


def _forward(x2d, y2d, fused, bc, bf16_elu):
    """x2d, y2d: (B*H, W) f32 -> two (B, W2*E) f32 outputs from one pallas_call."""
    b = x2d.shape[0] // H
    bblk = bc["s_sum"].shape[0] // 2
    assert b % bblk == 0, (b, bblk)
    num_blocks = b // bblk
    rb = 2 * bblk

    def const_spec(shape):
        zeros = (0,) * len(shape)
        if num_blocks > 1:
            # Constant index_map -> resident anyway; single-buffer to halve VMEM +
            # skip per-step revisit bookkeeping.  (No-op / not emitted for 1 step.)
            return pl.BlockSpec(shape, lambda g: zeros, pipeline_mode=pl.Buffered(1))
        return pl.BlockSpec(shape, lambda g: zeros)

    grid_spec = pltpu.PrefetchScalarGridSpec(
        num_scalar_prefetch=0,
        grid=(num_blocks,),
        in_specs=[
            pl.BlockSpec((bblk * H, W), lambda g: (g, 0)),          # x stream block
            pl.BlockSpec((bblk * H, W), lambda g: (g, 0)),          # y stream block
            const_spec((W, C * W)),                                 # Mconv (f32)
            const_spec((1, C * W)),                                 # BN1 shift row
            const_spec((C * W, C * W1)),                            # P1 (bf16)
            const_spec((rb * H, C * W1)),                           # depthwise scales
            const_spec((rb, rb * H)),                               # S (bf16)
            const_spec((1, C * W1)),                                # BN2 shift row
            const_spec((C * W1, W2 * E)),                           # Mproj (bf16)
            const_spec((1, W2 * E)),                                # proj bias row
        ],
        out_specs=[
            pl.BlockSpec((bblk, W2 * E), lambda g: (g, 0)),         # x output slab
            pl.BlockSpec((bblk, W2 * E), lambda g: (g, 0)),         # y output slab
        ],
    )
    ox, oy = pl.pallas_call(
        functools.partial(fe_kernel, bf16_elu=bf16_elu),
        out_shape=(jax.ShapeDtypeStruct((b, W2 * E), jnp.float32),
                   jax.ShapeDtypeStruct((b, W2 * E), jnp.float32)),
        grid_spec=grid_spec,
        compiler_params=pltpu.CompilerParams(
            dimension_semantics=("parallel",)),
    )(x2d, y2d, fused["mconv"], fused["b1_row"], fused["p1"], bc["ws_tiled"],
      bc["s_sum"], fused["b2_row"], fused["mproj"], fused["pb_row"])
    return ox, oy


@functools.partial(jax.jit, static_argnames=("bf16_elu",))
def feature_extractor_enc(x, y, fused, block_consts, bf16_elu=False):
    """forward(X) with X = (x, y); the two streams share weights and are fused
    into a single pallas_call (concatenated inside the kernel, not in HBM)."""
    bx = x.shape[0]
    x2d = x.reshape(bx * H, W)          # (B,1,H,W) is contiguous -> free reshape
    y2d = y.reshape(bx * H, W)
    ox, oy = _forward(x2d, y2d, fused, block_consts, bf16_elu)
    return ox.reshape(bx, W2, E), oy.reshape(bx, W2, E)


def reference_forward(x_nchw, raw):
    """Pure-JAX f32 reference mirroring the PyTorch module (inference-mode BN)."""
    eps = 1e-5
    x = x_nchw[:, 0]                                                # (B, H, W)
    xp = jnp.pad(x, ((0, 0), (0, 0), (PAD, PAD)))
    taps = jnp.stack([xp[:, :, k:k + W] for k in range(K)], axis=0)  # (K, B, H, W)
    t = jnp.einsum('ck,kbhw->bchw', raw["wt"], taps)
    s1 = raw["g1"] / jnp.sqrt(raw["v1"] + eps)
    t = s1[None, :, None, None] * t + (raw["be1"] - s1 * raw["m1"])[None, :, None, None]
    t = jnp.where(t > 0, t, jnp.exp(jnp.minimum(t, 0.0)) - 1.0)
    t = t.reshape(t.shape[0], C, H, W1, 4).mean(-1)                  # AvgPool2d((1,4))
    u = jnp.einsum('ch,bchw->bcw', raw["ws"], t)                     # depthwise (20,1)
    s2 = raw["g2"] / jnp.sqrt(raw["v2"] + eps)
    u = s2[None, :, None] * u + (raw["be2"] - s2 * raw["m2"])[None, :, None]
    u = jnp.where(u > 0, u, jnp.exp(jnp.minimum(u, 0.0)) - 1.0)
    u = u.reshape(u.shape[0], C, W2, 4).mean(-1)                     # AvgPool2d((1,4))
    return jnp.einsum('ec,bcw->bwe', raw["pw"], u) + raw["pb"][None, None, :]


if __name__ == "__main__":
    key = jax.random.PRNGKey(0)
    kx, ky, kp = jax.random.split(key, 3)
    B = 2
    x = jax.random.normal(kx, (B, 1, H, W), jnp.float32)
    y = jax.random.normal(ky, (B, 1, H, W), jnp.float32)
    raw, fused = make_params(kp)

    bblk = _pick_block_batch(B)                 # demo: single grid step, bblk = B
    bc = make_block_consts(fused, bblk)         # hoisted out of the per-call path
    bf16_elu = _bf16_elu_supported()

    out_x, out_y = feature_extractor_enc(x, y, fused, bc, bf16_elu=bf16_elu)
    jax.block_until_ready((out_x, out_y))

    assert out_x.shape == (B, W2, E), out_x.shape
    assert out_y.shape == (B, W2, E), out_y.shape
    assert jnp.all(jnp.isfinite(out_x)) and jnp.all(jnp.isfinite(out_y))

    ref_x = reference_forward(x, raw)
    ref_y = reference_forward(y, raw)
    np.testing.assert_allclose(np.asarray(out_x), np.asarray(ref_x), rtol=5e-2, atol=5e-2)
    np.testing.assert_allclose(np.asarray(out_y), np.asarray(ref_y), rtol=5e-2, atol=5e-2)
    print("KERNEL_OK")
</pallas_src>

<mosaic_0001>
module attributes {stable_mosaic.version = 11 : i64} {
  func.func @fe_kernel(%arg0: i32, %arg1: memref<40x64xf32, #tpu.memory_space<vmem>>, %arg2: memref<40x64xf32, #tpu.memory_space<vmem>>, %arg3: memref<64x1024xf32, #tpu.memory_space<vmem>>, %arg4: memref<1x1024xf32, #tpu.memory_space<vmem>>, %arg5: memref<1024x256xbf16, #tpu.memory_space<vmem>>, %arg6: memref<80x256xf32, #tpu.memory_space<vmem>>, %arg7: memref<4x80xbf16, #tpu.memory_space<vmem>>, %arg8: memref<1x256xf32, #tpu.memory_space<vmem>>, %arg9: memref<256x160xbf16, #tpu.memory_space<vmem>>, %arg10: memref<1x160xf32, #tpu.memory_space<vmem>>, %arg11: memref<2x160xf32, #tpu.memory_space<vmem>>, %arg12: memref<2x160xf32, #tpu.memory_space<vmem>>) attributes {dimension_semantics = [#tpu.dimension_semantics<parallel>], iteration_bounds = array<i64: 1>, scalar_prefetch = 0 : i64, scratch_operands = 0 : i64, tpu.core_type = #tpu.core_type<tc>, window_params = [{transform_indices = @transform_0, window_bounds = array<i64: 40, 64>}, {transform_indices = @transform_1, window_bounds = array<i64: 40, 64>}, {pipeline_mode = #tpu.pipeline_mode<synchronous>, transform_indices = @transform_2, window_bounds = array<i64: 64, 1024>}, {pipeline_mode = #tpu.pipeline_mode<synchronous>, transform_indices = @transform_3, window_bounds = array<i64: 1, 1024>}, {pipeline_mode = #tpu.pipeline_mode<synchronous>, transform_indices = @transform_4, window_bounds = array<i64: 1024, 256>}, {pipeline_mode = #tpu.pipeline_mode<synchronous>, transform_indices = @transform_5, window_bounds = array<i64: 80, 256>}, {pipeline_mode = #tpu.pipeline_mode<synchronous>, transform_indices = @transform_6, window_bounds = array<i64: 4, 80>}, {pipeline_mode = #tpu.pipeline_mode<synchronous>, transform_indices = @transform_7, window_bounds = array<i64: 1, 256>}, {pipeline_mode = #tpu.pipeline_mode<synchronous>, transform_indices = @transform_8, window_bounds = array<i64: 256, 160>}, {pipeline_mode = #tpu.pipeline_mode<synchronous>, transform_indices = @transform_9, window_bounds = array<i64: 1, 160>}, {transform_indices = @transform_10, window_bounds = array<i64: 2, 160>}, {transform_indices = @transform_11, window_bounds = array<i64: 2, 160>}]} {
    %c0 = arith.constant 0 : index
    %c0_0 = arith.constant 0 : index
    %0 = vector.load %arg1[%c0, %c0_0] : memref<40x64xf32, #tpu.memory_space<vmem>>, vector<40x64xf32>
    %c0_1 = arith.constant 0 : index
    %c0_2 = arith.constant 0 : index
    %1 = vector.load %arg2[%c0_1, %c0_2] : memref<40x64xf32, #tpu.memory_space<vmem>>, vector<40x64xf32>
    %2 = tpu.concatenate %0, %1 in 0 : vector<40x64xf32>, vector<40x64xf32> -> vector<80x64xf32>
    %c0_3 = arith.constant 0 : index
    %c0_4 = arith.constant 0 : index
    %3 = vector.load %arg3[%c0_3, %c0_4] : memref<64x1024xf32, #tpu.memory_space<vmem>>, vector<64x1024xf32>
    %cst = arith.constant dense<0.000000e+00> : vector<80x1024xf32>
    %4 = tpu.matmul %2, %3, %cst {dimension_numbers = #tpu.dot_dimension_numbers<[1], [0], [0], [1], [0, 0, 1, 1], [], []>} : vector<80x64xf32>, vector<64x1024xf32>, vector<80x1024xf32> -> vector<80x1024xf32>
    %c0_5 = arith.constant 0 : index
    %c0_6 = arith.constant 0 : index
    %5 = vector.load %arg4[%c0_5, %c0_6] : memref<1x1024xf32, #tpu.memory_space<vmem>>, vector<1x1024xf32>
    %6 = vector.broadcast %5 : vector<1x1024xf32> to vector<80x1024xf32>
    %7 = arith.addf %4, %6 : vector<80x1024xf32>
    %cst_7 = arith.constant 0.000000e+00 : f32
    %8 = vector.broadcast %cst_7 : f32 to vector<80x1024xf32>
    %9 = arith.cmpf ogt, %7, %8 : vector<80x1024xf32>
    %cst_8 = arith.constant 0.000000e+00 : f32
    %10 = vector.broadcast %cst_8 : f32 to vector<80x1024xf32>
    %11 = arith.minimumf %7, %10 : vector<80x1024xf32>
    %12 = math.exp %11 : vector<80x1024xf32>
    %cst_9 = arith.constant 1.000000e+00 : f32
    %13 = vector.broadcast %cst_9 : f32 to vector<80x1024xf32>
    %14 = arith.subf %12, %13 : vector<80x1024xf32>
    %15 = arith.select %9, %7, %14 : vector<80x1024xi1>, vector<80x1024xf32>
    %16 = arith.truncf %15 : vector<80x1024xf32> to vector<80x1024xbf16>
    %c0_10 = arith.constant 0 : index
    %c0_11 = arith.constant 0 : index
    %17 = vector.load %arg5[%c0_10, %c0_11] : memref<1024x256xbf16, #tpu.memory_space<vmem>>, vector<1024x256xbf16>
    %cst_12 = arith.constant dense<0.000000e+00> : vector<80x256xf32>
    %18 = tpu.matmul %16, %17, %cst_12 {dimension_numbers = #tpu.dot_dimension_numbers<[1], [0], [0], [1], [0, 0, 1, 1], [], []>} : vector<80x1024xbf16>, vector<1024x256xbf16>, vector<80x256xf32> -> vector<80x256xf32>
    %c0_13 = arith.constant 0 : index
    %c0_14 = arith.constant 0 : index
    %19 = vector.load %arg6[%c0_13, %c0_14] : memref<80x256xf32, #tpu.memory_space<vmem>>, vector<80x256xf32>
    %20 = arith.mulf %18, %19 : vector<80x256xf32>
    %c0_15 = arith.constant 0 : index
    %c0_16 = arith.constant 0 : index
    %21 = vector.load %arg7[%c0_15, %c0_16] : memref<4x80xbf16, #tpu.memory_space<vmem>>, vector<4x80xbf16>
    %22 = arith.truncf %20 : vector<80x256xf32> to vector<80x256xbf16>
    %cst_17 = arith.constant dense<0.000000e+00> : vector<4x256xf32>
    %23 = tpu.matmul %21, %22, %cst_17 {dimension_numbers = #tpu.dot_dimension_numbers<[1], [0], [0], [1], [0, 0, 1, 1], [], []>} : vector<4x80xbf16>, vector<80x256xbf16>, vector<4x256xf32> -> vector<4x256xf32>
    %c0_18 = arith.constant 0 : index
    %c0_19 = arith.constant 0 : index
    %24 = vector.load %arg8[%c0_18, %c0_19] : memref<1x256xf32, #tpu.memory_space<vmem>>, vector<1x256xf32>
    %25 = vector.broadcast %24 : vector<1x256xf32> to vector<4x256xf32>
    %26 = arith.addf %23, %25 : vector<4x256xf32>
    %cst_20 = arith.constant 0.000000e+00 : f32
    %27 = vector.broadcast %cst_20 : f32 to vector<4x256xf32>
    %28 = arith.cmpf ogt, %26, %27 : vector<4x256xf32>
    %cst_21 = arith.constant 0.000000e+00 : f32
    %29 = vector.broadcast %cst_21 : f32 to vector<4x256xf32>
    %30 = arith.minimumf %26, %29 : vector<4x256xf32>
    %31 = math.exp %30 : vector<4x256xf32>
    %cst_22 = arith.constant 1.000000e+00 : f32
    %32 = vector.broadcast %cst_22 : f32 to vector<4x256xf32>
    %33 = arith.subf %31, %32 : vector<4x256xf32>
    %34 = arith.select %28, %26, %33 : vector<4x256xi1>, vector<4x256xf32>
    %35 = arith.truncf %34 : vector<4x256xf32> to vector<4x256xbf16>
    %c0_23 = arith.constant 0 : index
    %c0_24 = arith.constant 0 : index
    %36 = vector.load %arg9[%c0_23, %c0_24] : memref<256x160xbf16, #tpu.memory_space<vmem>>, vector<256x160xbf16>
    %cst_25 = arith.constant dense<0.000000e+00> : vector<4x160xf32>
    %37 = tpu.matmul %35, %36, %cst_25 {dimension_numbers = #tpu.dot_dimension_numbers<[1], [0], [0], [1], [0, 0, 1, 1], [], []>} : vector<4x256xbf16>, vector<256x160xbf16>, vector<4x160xf32> -> vector<4x160xf32>
    %c0_26 = arith.constant 0 : index
    %c0_27 = arith.constant 0 : index
    %38 = vector.load %arg10[%c0_26, %c0_27] : memref<1x160xf32, #tpu.memory_space<vmem>>, vector<1x160xf32>
    %39 = vector.broadcast %38 : vector<1x160xf32> to vector<4x160xf32>
    %40 = arith.addf %37, %39 : vector<4x160xf32>
    %41 = vector.extract_strided_slice %40 {offsets = [0, 0], sizes = [2, 160], strides = [1, 1]} : vector<4x160xf32> to vector<2x160xf32>
    %c0_28 = arith.constant 0 : index
    %c0_29 = arith.constant 0 : index
    %42 = vector.load %arg11[%c0_28, %c0_29] : memref<2x160xf32, #tpu.memory_space<vmem>>, vector<2x160xf32>
    tpu.vector_store %arg11[%c0_28, %c0_29], %41 {strides = array<i32>} : memref<2x160xf32, #tpu.memory_space<vmem>>, vector<2x160xf32>,
    %43 = vector.extract_strided_slice %40 {offsets = [2, 0], sizes = [2, 160], strides = [1, 1]} : vector<4x160xf32> to vector<2x160xf32>
    %c0_30 = arith.constant 0 : index
    %c0_31 = arith.constant 0 : index
    %44 = vector.load %arg12[%c0_30, %c0_31] : memref<2x160xf32, #tpu.memory_space<vmem>>, vector<2x160xf32>
    tpu.vector_store %arg12[%c0_30, %c0_31], %43 {strides = array<i32>} : memref<2x160xf32, #tpu.memory_space<vmem>>, vector<2x160xf32>,
    return
  }
  func.func @transform_0(%arg0: i32) -> (i32, i32) {
    %c0_i32 = arith.constant 0 : i32
    %c0_i32_0 = arith.constant 0 : i32
    return %arg0, %c0_i32 : i32, i32
  }
  func.func @transform_1(%arg0: i32) -> (i32, i32) {
    %c0_i32 = arith.constant 0 : i32
    %c0_i32_0 = arith.constant 0 : i32
    return %arg0, %c0_i32 : i32, i32
  }
  func.func @transform_2(%arg0: i32) -> (i32, i32) {
    %c0_i32 = arith.constant 0 : i32
    %c0_i32_0 = arith.constant 0 : i32
    %c0_i32_1 = arith.constant 0 : i32
    return %c0_i32, %c0_i32_0 : i32, i32
  }
  func.func @transform_3(%arg0: i32) -> (i32, i32) {
    %c0_i32 = arith.constant 0 : i32
    %c0_i32_0 = arith.constant 0 : i32
    %c0_i32_1 = arith.constant 0 : i32
    return %c0_i32, %c0_i32_0 : i32, i32
  }
  func.func @transform_4(%arg0: i32) -> (i32, i32) {
    %c0_i32 = arith.constant 0 : i32
    %c0_i32_0 = arith.constant 0 : i32
    %c0_i32_1 = arith.constant 0 : i32
    return %c0_i32, %c0_i32_0 : i32, i32
  }
  func.func @transform_5(%arg0: i32) -> (i32, i32) {
    %c0_i32 = arith.constant 0 : i32
    %c0_i32_0 = arith.constant 0 : i32
    %c0_i32_1 = arith.constant 0 : i32
    return %c0_i32, %c0_i32_0 : i32, i32
  }
  func.func @transform_6(%arg0: i32) -> (i32, i32) {
    %c0_i32 = arith.constant 0 : i32
    %c0_i32_0 = arith.constant 0 : i32
    %c0_i32_1 = arith.constant 0 : i32
    return %c0_i32, %c0_i32_0 : i32, i32
  }
  func.func @transform_7(%arg0: i32) -> (i32, i32) {
    %c0_i32 = arith.constant 0 : i32
    %c0_i32_0 = arith.constant 0 : i32
    %c0_i32_1 = arith.constant 0 : i32
    return %c0_i32, %c0_i32_0 : i32, i32
  }
  func.func @transform_8(%arg0: i32) -> (i32, i32) {
    %c0_i32 = arith.constant 0 : i32
    %c0_i32_0 = arith.constant 0 : i32
    %c0_i32_1 = arith.constant 0 : i32
    return %c0_i32, %c0_i32_0 : i32, i32
  }
  func.func @transform_9(%arg0: i32) -> (i32, i32) {
    %c0_i32 = arith.constant 0 : i32
    %c0_i32_0 = arith.constant 0 : i32
    %c0_i32_1 = arith.constant 0 : i32
    return %c0_i32, %c0_i32_0 : i32, i32
  }
  func.func @transform_10(%arg0: i32) -> (i32, i32) {
    %c0_i32 = arith.constant 0 : i32
    %c0_i32_0 = arith.constant 0 : i32
    return %arg0, %c0_i32 : i32, i32
  }
  func.func @transform_11(%arg0: i32) -> (i32, i32) {
    %c0_i32 = arith.constant 0 : i32
    %c0_i32_0 = arith.constant 0 : i32
    return %arg0, %c0_i32 : i32, i32
  }
}

</mosaic_0001>

<bundles_post_ra>
// kernel: feature_extractor_enc.1
= control target key start
LH: loop header
LB: loop body
LE: loop exit
PB: predicated region body
PF: predicated region fallthrough
CT: control target
= control target key end

     0   :  { %17 = vsyncpa [#allocation3], 0  ;;  %s5512_s0 = inlined_call_operand.vmem [shape: f32[40,64], index: 0, kind: input, shape index: {}]   ;;  %s5513_s1 = inlined_call_operand.vmem [shape: f32[40,64], index: 1, kind: input, shape index: {}]   ;;  %s5514_s2 = inlined_call_operand.hbm [shape: f32[64,1024], index: 2, kind: input, shape index: {}]   ;;  %s5515_s3 = inlined_call_operand.vmem [shape: f32[1,1024], index: 3, kind: input, shape index: {}]   ;;  %s5516_s4 = inlined_call_operand.hbm [shape: bf16[1024,256], index: 4, kind: input, shape index: {}]   ;;  %s5517_s5 = inlined_call_operand.vmem [shape: f32[80,256], index: 5, kind: input, shape index: {}]   ;;  %s5518_s6 = inlined_call_operand.vmem [shape: bf16[4,80], index: 6, kind: input, shape index: {}]   ;;  %s5519_s7 = inlined_call_operand.vmem [shape: f32[1,256], index: 7, kind: input, shape index: {}]   ;;  %s5520_s8 = inlined_call_operand.vmem [shape: bf16[256,160], index: 8, kind: input, shape index: {}]   ;;  %s5521_s9 = inlined_call_operand.vmem [shape: f32[1,160], index: 9, kind: input, shape index: {}]   ;;  %s5522_s10 = inlined_call_operand.vmem [shape: f32[2,160], index: 10, kind: output, shape index: {0}]   ;;  %s5523_s11 = inlined_call_operand.vmem [shape: f32[2,160], index: 11, kind: output, shape index: {1}]  }
   0x1   :  { %s27_s19 = sshll.u32 %s5514_s2, 4  ;;  %s28_s19 = int_to_ptr.hbm [resolvable:$true] %s27_s19 }
   0x2   :  { %18 = vsyncpa [#allocation5], 0  ;;  %s3980_s20 = smov [#allocation2]   ;;  %s42_s24 = sshll.u32 %s5516_s4, 4  ;;  %s43_s24 = int_to_ptr.hbm [resolvable:$true] %s42_s24 }
   0x3   :  { %s29_s21 = sshll.u32 %s3980_s20, 4  ;;  %s3981_s25 = smov 1024   ;;  %s30_s21 = int_to_ptr.vmem [resolvable:$true] %s29_s21 }
   0x4   :  { %s3982_s26 = smov 64   ;;  %s3983_s27 = smov [#allocation4]  }
   0x5   :  { %35 = dma.hbm_to_vmem [thread:$0]  %s28_s19, 8192, %s30_s21, [#allocation3], %s3981_s25, %s3981_s25, %s3982_s26  }
   0x6   :  { %s44_s28 = sshll.u32 %s3983_s27, 4  ;;  %s3984_s29 = smov 128   ;;  %s45_s28 = int_to_ptr.vmem [resolvable:$true] %s44_s28 }
   0x7   :  { %s3985_s30 = smov 8  }
   0x8   :  { %50 = dma.hbm_to_vmem [thread:$0]  %s43_s24, 16384, %s45_s28, [#allocation5], %s3984_s29, %s3984_s29, %s3985_s30  }
   0x9   :  { %3976 = dma.done.wait [#allocation3], 8192  }
   0xa   :  { %3977 = vsyncadd [#allocation3], 4294959104 }
   0xb   :  { %3978 = dma.done.wait [#allocation5], 16384  }
   0xc   :  { %3979 = vsyncadd [#allocation5], 4294950912  ;;  %v136_v0 = vld [vmem:[#allocation2 + $0x1c0] sm:$0xff]  ;;  %v137_v1 = vld [vmem:[#allocation2 + $0x1c8] sm:$0xff]  ;;  %vm162_vm0 = vcmask 523264  }
   0xd   :  { %v128_v2 = vld [vmem:[#allocation2 + $0x180] sm:$0xff]  ;;  %201 = vmatpush.msra.mxu0 %v136_v0  ;;  %3741 = vmatpush.msra.mxu2 %v136_v0  ;;  %v129_v3 = vld [vmem:[#allocation2 + $0x188] sm:$0xff]  ;;  %v4055_v16 = vld [vmem:[%s5512_s0] sm:$0xff] }
   0xe   :  { %248 = vmatpush.msra.mxu1 %v137_v1  ;;  %3749 = vmatpush.msra.mxu3 %v137_v1  ;;  %v120_v4 = vld [vmem:[#allocation2 + $0x140] sm:$0xff]  ;;  %v121_v5 = vld [vmem:[#allocation2 + $0x148] sm:$0xff]  ;;  %v4060_v17 = vld [vmem:[%s5513_s1 + $0x18] sm:$0xff] }
   0xf   :  { %202 = vmatpush.msra.mxu0 %v128_v2  ;;  %3742 = vmatpush.msra.mxu2 %v128_v2  ;;  %v112_v6 = vld [vmem:[#allocation2 + $0x100] sm:$0xff]  ;;  %v113_v7 = vld [vmem:[#allocation2 + $0x108] sm:$0xff]  ;;  %v138_v18 = vld [vmem:[#allocation2 + $0x1d0] sm:$0xff] }
  0x10   :  { %249 = vmatpush.msra.mxu1 %v129_v3  ;;  %3750 = vmatpush.msra.mxu3 %v129_v3  ;;  %v104_v8 = vld [vmem:[#allocation2 + $0xc0] sm:$0xff]  ;;  %v105_v9 = vld [vmem:[#allocation2 + $0xc8] sm:$0xff]  ;;  %v139_v19 = vld [vmem:[#allocation2 + $0x1d8] sm:$0xff] }
  0x11   :  { %203 = vmatpush.msra.mxu0 %v120_v4  ;;  %3743 = vmatpush.msra.mxu2 %v120_v4  ;;  %v96_v10 = vld [vmem:[#allocation2 + $0x80] sm:$0xff]  ;;  %v97_v11 = vld [vmem:[#allocation2 + $0x88] sm:$0xff]  ;;  %v130_v20 = vld [vmem:[#allocation2 + $0x190] sm:$0xff] }
  0x12   :  { %250 = vmatpush.msra.mxu1 %v121_v5  ;;  %3751 = vmatpush.msra.mxu3 %v121_v5  ;;  %v88_v12 = vld [vmem:[#allocation2 + $0x40] sm:$0xff]  ;;  %v89_v13 = vld [vmem:[#allocation2 + $0x48] sm:$0xff]  ;;  %v131_v21 = vld [vmem:[#allocation2 + $0x198] sm:$0xff] }
  0x13   :  { %204 = vmatpush.msra.mxu0 %v112_v6  ;;  %3744 = vmatpush.msra.mxu2 %v112_v6  ;;  %v80_v14 = vld [vmem:[#allocation2] sm:$0xff]  ;;  %v81_v15 = vld [vmem:[#allocation2 + $0x8] sm:$0xff]  ;;  %v122_v22 = vld [vmem:[#allocation2 + $0x150] sm:$0xff] }
  0x14   :  { %251 = vmatpush.msra.mxu1 %v113_v7  ;;  %3752 = vmatpush.msra.mxu3 %v113_v7  ;;  %v123_v23 = vld [vmem:[#allocation2 + $0x158] sm:$0xff]  ;;  %v114_v24 = vld [vmem:[#allocation2 + $0x110] sm:$0xff]  ;;  %v4073_v26 = vld [vmem:[%s5512_s0 + $0x8] sm:$0xff] }
  0x15   :  { %205 = vmatpush.msra.mxu0 %v104_v8  ;;  %3745 = vmatpush.msra.mxu2 %v104_v8  ;;  %v115_v25 = vld [vmem:[#allocation2 + $0x118] sm:$0xff]  ;;  %v106_v28 = vld [vmem:[#allocation2 + $0xd0] sm:$0xff]  ;;  %v4091_v36 = vld [vmem:[%s5512_s0 + $0x10] sm:$0xff] }
  0x16   :  { %252 = vmatpush.msra.mxu1 %v105_v9  ;;  %3753 = vmatpush.msra.mxu3 %v105_v9  ;;  %v4078_v27 = vld [vmem:[%s5513_s1 + $0x20] sm:$0xff]  ;;  %v98_v30 = vld [vmem:[#allocation2 + $0x90] sm:$0xff]  ;;  %v140_v38 = vld [vmem:[#allocation2 + $0x1e0] sm:$0xff] }
  0x17   :  { %206 = vmatpush.msra.mxu0 %v96_v10  ;;  %3746 = vmatpush.msra.mxu2 %v96_v10  ;;  %v107_v29 = vld [vmem:[#allocation2 + $0xd8] sm:$0xff]  ;;  %v90_v32 = vld [vmem:[#allocation2 + $0x50] sm:$0xff]  ;;  %v141_v39 = vld [vmem:[#allocation2 + $0x1e8] sm:$0xff] }
  0x18   :  { %253 = vmatpush.msra.mxu1 %v97_v11  ;;  %3754 = vmatpush.msra.mxu3 %v97_v11  ;;  %v99_v31 = vld [vmem:[#allocation2 + $0x98] sm:$0xff]  ;;  %v82_v34 = vld [vmem:[#allocation2 + $0x10] sm:$0xff]  ;;  %v132_v40 = vld [vmem:[#allocation2 + $0x1a0] sm:$0xff] }
  0x19   :  { %207 = vmatpush.msra.mxu0 %v88_v12  ;;  %3747 = vmatpush.msra.mxu2 %v88_v12  ;;  %v91_v33 = vld [vmem:[#allocation2 + $0x58] sm:$0xff]  ;;  %v4104_v37 = vld [vmem:[%s5512_s0 + $0x18] sm:$0xff]  ;;  %v133_v41 = vld [vmem:[#allocation2 + $0x1a8] sm:$0xff] }
  0x1a   :  { %254 = vmatpush.msra.mxu1 %v89_v13  ;;  %3755 = vmatpush.msra.mxu3 %v89_v13  ;;  %v83_v35 = vld [vmem:[#allocation2 + $0x18] sm:$0xff]  ;;  %v124_v42 = vld [vmem:[#allocation2 + $0x160] sm:$0xff]  ;;  %v125_v43 = vld [vmem:[#allocation2 + $0x168] sm:$0xff] }
  0x1b   :  { %208 = vmatpush.msra.mxu0 %v80_v14  ;;  %3748 = vmatpush.msra.mxu2 %v80_v14  ;;  %v4117_v44 = vld [vmem:[%s5512_s0 + $0x20] sm:$0xff]  ;;  %v116_v45 = vld [vmem:[#allocation2 + $0x120] sm:$0xff]  ;;  %v117_v46 = vld [vmem:[#allocation2 + $0x128] sm:$0xff] }
  0x1c   :  { %255 = vmatpush.msra.mxu1 %v81_v15  ;;  %3756 = vmatpush.msra.mxu3 %v81_v15  ;;  %v108_v47 = vld [vmem:[#allocation2 + $0xe0] sm:$0xff]  ;;  %v109_v48 = vld [vmem:[#allocation2 + $0xe8] sm:$0xff]  ;;  %v4130_v51 = vld [vmem:[%s5513_s1] sm:$0xff] }
  0x1d   :  { %2777 = vmatmul.msk.f32.vlgmr.msra.gmra.mxu0 %vm162_vm0, %v4055_v16  ;;  %2785 = vmatmul.msk.f32.vlgmr.msra.gmra.mxu2 %vm162_vm0, %v4060_v17  ;;  %v100_v49 = vld [vmem:[#allocation2 + $0xa0] sm:$0xff]  ;;  %v101_v50 = vld [vmem:[#allocation2 + $0xa8] sm:$0xff]  ;;  %v142_v56 = vld [vmem:[#allocation2 + $0x1f0] sm:$0xff] }
  0x1e   :  { %2787 = vmatmul.msk.f32.vlgmr.msra.gmra.mxu1 %vm162_vm0, %v4055_v16  ;;  %2795 = vmatmul.msk.f32.vlgmr.msra.gmra.mxu3 %vm162_vm0, %v4060_v17  ;;  %v92_v52 = vld [vmem:[#allocation2 + $0x60] sm:$0xff]  ;;  %v93_v53 = vld [vmem:[#allocation2 + $0x68] sm:$0xff]  ;;  %v143_v57 = vld [vmem:[#allocation2 + $0x1f8] sm:$0xff] }
  0x1f   :  { %295 = vmatpush.msrb.mxu2 %v138_v18  ;;  %342 = vmatpush.msrb.mxu3 %v139_v19  ;;  %v84_v54 = vld [vmem:[#allocation2 + $0x20] sm:$0xff]  ;;  %v85_v55 = vld [vmem:[#allocation2 + $0x28] sm:$0xff]  ;;  %v134_v59 = vld [vmem:[#allocation2 + $0x1b0] sm:$0xff] }
  0x20   :  { %389 = vmatpush.msrb.mxu0 %v140_v38  ;;  %436 = vmatpush.msrb.mxu1 %v141_v39  ;;  %v4143_v58 = vld [vmem:[%s5513_s1 + $0x8] sm:$0xff]  ;;  %v135_v60 = vld [vmem:[#allocation2 + $0x1b8] sm:$0xff]  ;;  %v126_v61 = vld [vmem:[#allocation2 + $0x170] sm:$0xff] }
  0x21   :  { %296 = vmatpush.msrb.mxu2 %v130_v20  ;;  %343 = vmatpush.msrb.mxu3 %v131_v21  ;;  %v127_v62 = vld [vmem:[#allocation2 + $0x178] sm:$0xff]  ;;  %v118_v63 = vld [vmem:[#allocation2 + $0x130] sm:$0xff]  ;;  %v4156_v1 = vld [vmem:[%s5513_s1 + $0x10] sm:$0xff] }
  0x22   :  { %390 = vmatpush.msrb.mxu0 %v132_v40  ;;  %437 = vmatpush.msrb.mxu1 %v133_v41  ;;  %v119_v0 = vld [vmem:[#allocation2 + $0x138] sm:$0xff]  ;;  %v110_v2 = vld [vmem:[#allocation2 + $0xf0] sm:$0xff]  ;;  %v2987_v18 = vld [vmem:[#allocation4 + $0x60] sm:$0xf] }
  0x23   :  { %297 = vmatpush.msrb.mxu2 %v122_v22  ;;  %344 = vmatpush.msrb.mxu3 %v123_v23  ;;  %v111_v3 = vld [vmem:[#allocation2 + $0xf8] sm:$0xff]  ;;  %v102_v4 = vld [vmem:[#allocation2 + $0xb0] sm:$0xff]  ;;  %v3594_v19 = vld [vmem:[#allocation4 + $0x64] sm:$0xf0] }
  0x24   :  { %391 = vmatpush.msrb.mxu0 %v124_v42  ;;  %438 = vmatpush.msrb.mxu1 %v125_v43  ;;  %v103_v5 = vld [vmem:[#allocation2 + $0xb8] sm:$0xff]  ;;  %v94_v6 = vld [vmem:[#allocation2 + $0x70] sm:$0xff]  ;;  %v3051_v20 = vld [vmem:[#allocation4 + $0xe0] sm:$0xf]  ;;  %v2988_v21 = vor.u32 %v3594_v19, %v2987_v18 }
  0x25   :  { %298 = vmatpush.msrb.mxu2 %v114_v24  ;;  %345 = vmatpush.msrb.mxu3 %v115_v25  ;;  %v95_v7 = vld [vmem:[#allocation2 + $0x78] sm:$0xff]  ;;  %v86_v8 = vld [vmem:[#allocation2 + $0x30] sm:$0xff]  ;;  %v3610_v22 = vld [vmem:[#allocation4 + $0xe4] sm:$0xf0] }
  0x26   :  { %2778 = vmatmul.msk.f32.gmra.mxu0 %vm162_vm0, %v4073_v26  ;;  %2786 = vmatmul.msk.f32.gmra.mxu2 %vm162_vm0, %v4078_v27  ;;  %v87_v9 = vld [vmem:[#allocation2 + $0x38] sm:$0xff]  ;;  %v2995_v10 = vld [vmem:[#allocation4 + $0x70] sm:$0xf]  ;;  %v3052_v23 = vor.u32 %v3610_v22, %v3051_v20  ;;  %v3606_v38 = vld [vmem:[#allocation4 + $0xc4] sm:$0xf0] }
  0x27   :  { %2788 = vmatmul.msk.f32.gmra.mxu1 %vm162_vm0, %v4073_v26  ;;  %2796 = vmatmul.msk.f32.gmra.mxu3 %vm162_vm0, %v4078_v27  ;;  %v3596_v11 = vld [vmem:[#allocation4 + $0x74] sm:$0xf0]  ;;  %v3059_v12 = vld [vmem:[#allocation4 + $0xf0] sm:$0xf] }
  0x28   :  { %299 = vmatpush.msrb.mxu2 %v106_v28  ;;  %346 = vmatpush.msrb.mxu3 %v107_v29  ;;  %v2996_v13 = vor.u32 %v3596_v11, %v2995_v10  ;;  %v3612_v14 = vld [vmem:[#allocation4 + $0xf4] sm:$0xf0]  ;;  %v2979_v24 = vld [vmem:[#allocation4 + $0x50] sm:$0xf]  ;;  %v3179_v11 = vld [vmem:[#allocation4 + $0x1e0] sm:$0xf] }
  0x29   :  { %392 = vmatpush.msrb.mxu0 %v116_v45  ;;  %439 = vmatpush.msrb.mxu1 %v117_v46  ;;  %v3060_v15 = vor.u32 %v3612_v14, %v3059_v12  ;;  %v3592_v25 = vld [vmem:[#allocation4 + $0x54] sm:$0xf0]  ;;  %v3043_v28 = vld [vmem:[#allocation4 + $0xd0] sm:$0xf]  ;;  %v2955_v46 = vld [vmem:[#allocation4 + $0x20] sm:$0xf] }
  0x2a   :  { %300 = vmatpush.msrb.mxu2 %v98_v30  ;;  %347 = vmatpush.msrb.mxu3 %v99_v31  ;;  %v2980_v29 = vor.u32 %v3592_v25, %v2979_v24  ;;  %v3608_v30 = vld [vmem:[#allocation4 + $0xd4] sm:$0xf0]  ;;  %v2963_v40 = vld [vmem:[#allocation4 + $0x30] sm:$0xf] }
  0x2b   :  { %393 = vmatpush.msrb.mxu0 %v108_v47  ;;  %440 = vmatpush.msrb.mxu1 %v109_v48  ;;  %v3044_v31 = vor.u32 %v3608_v30, %v3043_v28  ;;  %v3588_v41 = vld [vmem:[#allocation4 + $0x34] sm:$0xf0]  ;;  %v3027_v42 = vld [vmem:[#allocation4 + $0xb0] sm:$0xf]  ;;  %v3586_v47 = vld [vmem:[#allocation4 + $0x24] sm:$0xf0] }
  0x2c   :  { %301 = vmatpush.msrb.mxu2 %v90_v32  ;;  %348 = vmatpush.msrb.mxu3 %v91_v33  ;;  %v2971_v32 = vld [vmem:[#allocation4 + $0x40] sm:$0xf]  ;;  %v3590_v33 = vld [vmem:[#allocation4 + $0x44] sm:$0xf0]  ;;  %v3604_v43 = vld [vmem:[#allocation4 + $0xb4] sm:$0xf0] }
  0x2d   :  { %394 = vmatpush.msrb.mxu0 %v100_v49  ;;  %441 = vmatpush.msrb.mxu1 %v101_v50  ;;  %v3028_v45 = vor.u32 %v3604_v43, %v3027_v42  ;;  %v3019_v48 = vld [vmem:[#allocation4 + $0xa0] sm:$0xf]  ;;  %v2956_v49 = vor.u32 %v3586_v47, %v2955_v46  ;;  %v3602_v50 = vld [vmem:[#allocation4 + $0xa4] sm:$0xf0]  ;;  %v4225_v12 = vld [vmem:[%s5515_s3] sm:$0xff] }
  0x2e   :  { %302 = vmatpush.msrb.mxu2 %v82_v34  ;;  %349 = vmatpush.msrb.mxu3 %v83_v35  ;;  %v2972_v34 = vor.u32 %v3590_v33, %v2971_v32  ;;  %v3035_v35 = vld [vmem:[#allocation4 + $0xc0] sm:$0xf]  ;;  %v3107_v14 = vld [vmem:[#allocation4 + $0x150] sm:$0xf]  ;;  %v3640_v19 = vld [vmem:[#allocation4 + $0x1d4] sm:$0xf0] }
  0x2f   :  { %2779 = vmatmul.msk.f32.gmra.mxu0 %vm162_vm0, %v4091_v36  ;;  %2789 = vmatmul.msk.f32.gmra.mxu1 %vm162_vm0, %v4091_v36  ;;  %v3036_v39 = vor.u32 %v3606_v38, %v3035_v35  ;;  %v3171_v18 = vld [vmem:[#allocation4 + $0x1d0] sm:$0xf]  ;;  %v4236_v20 = vperm.slane %v4225_v12, 0  ;;  %v3622_v30 = vld [vmem:[#allocation4 + $0x144] sm:$0xf0] }
  0x30   :  { %2797 = vmatmul.msk.f32.vlgmr.msrb.gmra.mxu2 %vm162_vm0, %v4055_v16  ;;  %2807 = vmatmul.msk.f32.vlgmr.msrb.gmra.mxu3 %vm162_vm0, %v4055_v16  ;;  %v3172_v24 = vor.u32 %v3640_v19, %v3171_v18  ;;  %v3638_v32 = vld [vmem:[#allocation4 + $0x1c4] sm:$0xf0]  ;;  %v3636_v43 = vld [vmem:[#allocation4 + $0x1b4] sm:$0xf0] }
  0x31   :  { %395 = vmatpush.msrb.mxu0 %v92_v52  ;;  %442 = vmatpush.msrb.mxu1 %v93_v53  ;;  %v3020_v52 = vor.u32 %v3602_v50, %v3019_v48  ;;  %v2947_v53 = vld [vmem:[#allocation4 + $0x10] sm:$0xf] }
  0x32   :  { %483 = vmatpush.msra.mxu2 %v142_v56  ;;  %530 = vmatpush.msra.mxu3 %v143_v57  ;;  %v3600_v56 = vld [vmem:[#allocation4 + $0x94] sm:$0xf0]  ;;  %v3123_v57 = vld [vmem:[#allocation4 + $0x170] sm:$0xf] }
  0x33   :  { %396 = vmatpush.msrb.mxu0 %v84_v54  ;;  %443 = vmatpush.msrb.mxu1 %v85_v55  ;;  %v3584_v54 = vld [vmem:[#allocation4 + $0x14] sm:$0xf0]  ;;  %v3011_v55 = vld [vmem:[#allocation4 + $0x90] sm:$0xf] }
  0x34   :  { %484 = vmatpush.msra.mxu2 %v134_v59  ;;  %531 = vmatpush.msra.mxu3 %v135_v60  ;;  %v3628_v59 = vld [vmem:[#allocation4 + $0x174] sm:$0xf0]  ;;  %v3012_v60 = vor.u32 %v3600_v56, %v3011_v55  ;;  %v3147_v56 = vld [vmem:[#allocation4 + $0x1a0] sm:$0xf] }
  0x35   :  { %1857 = vmatpush.bf16.msra.mxu0 %v2996_v13  ;;  %1891 = vmatpush.bf16.msra.mxu1 %v3060_v15  ;;  %v3624_v15 = vld [vmem:[#allocation4 + $0x154] sm:$0xf0] }
  0x36   :  { %485 = vmatpush.msra.mxu2 %v126_v61  ;;  %532 = vmatpush.msra.mxu3 %v127_v62  ;;  %v3124_v61 = vor.u32 %v3628_v59, %v3123_v57  ;;  %v3187_v62 = vld [vmem:[#allocation4 + $0x1f0] sm:$0xf]  ;;  %v3634_v57 = vld [vmem:[#allocation4 + $0x1a4] sm:$0xf0] }
  0x37   :  { %2780 = vmatmul.msk.f32.gmra.mxu0 %vm162_vm0, %v4104_v37  ;;  %2790 = vmatmul.msk.f32.gmra.mxu1 %vm162_vm0, %v4104_v37 }
  0x38   :  { %2798 = vmatmul.msk.f32.gmra.mxu2 %vm162_vm0, %v4073_v26  ;;  %2808 = vmatmul.msk.f32.gmra.mxu3 %vm162_vm0, %v4073_v26 }
  0x39   :  { %486 = vmatpush.msra.mxu2 %v118_v63  ;;  %533 = vmatpush.msra.mxu3 %v119_v0  ;;  %v3644_v63 = vld [vmem:[#allocation4 + $0x1f4] sm:$0xf0] }
  0x3a   :  { %1858 = vmatpush.bf16.msra.mxu0 %v2988_v21  ;;  %1892 = vmatpush.bf16.msra.mxu1 %v3052_v23  ;;  %v3188_v0 = vor.u32 %v3644_v63, %v3187_v62  ;;  %v3108_v21 = vor.u32 %v3624_v15, %v3107_v14  ;;  %v4239_v23 = vperm.slane %v4225_v12, 1  ;;  %v3148_v63 = vor.u32 %v3634_v57, %v3147_v56  ;;  %v3632_v15 = vld [vmem:[#allocation4 + $0x194] sm:$0xf0] }
  0x3b   :  { %487 = vmatpush.msra.mxu2 %v110_v2  ;;  %534 = vmatpush.msra.mxu3 %v111_v3  ;;  %v2939_v2 = vld [vmem:[#allocation4] sm:$0xf]  ;;  %v3582_v3 = vld [vmem:[#allocation4 + $0x4] sm:$0xf0] }
  0x3d   :  { %488 = vmatpush.msra.mxu2 %v102_v4  ;;  %535 = vmatpush.msra.mxu3 %v103_v5  ;;  %v3003_v4 = vld [vmem:[#allocation4 + $0x80] sm:$0xf]  ;;  %v2940_v5 = vor.u32 %v3582_v3, %v2939_v2 }
  0x3e   :  { %1859 = vmatpush.bf16.msra.mxu0 %v2980_v29  ;;  %1893 = vmatpush.bf16.msra.mxu1 %v3044_v31  ;;  %v3099_v29 = vld [vmem:[#allocation4 + $0x140] sm:$0xf] }
  0x3f   :  { %2781 = vmatmul.msk.f32.gmra.mxu0 %vm162_vm0, %v4117_v44  ;;  %2791 = vmatmul.msk.f32.gmra.mxu1 %vm162_vm0, %v4117_v44 }
  0x40   :  { %2799 = vmatmul.msk.f32.gmra.mxu2 %vm162_vm0, %v4091_v36  ;;  %2809 = vmatmul.msk.f32.gmra.mxu3 %vm162_vm0, %v4091_v36 }
  0x41   :  { %489 = vmatpush.msra.mxu2 %v94_v6  ;;  %536 = vmatpush.msra.mxu3 %v95_v7  ;;  %v3598_v6 = vld [vmem:[#allocation4 + $0x84] sm:$0xf0]  ;;  %v3115_v7 = vld [vmem:[#allocation4 + $0x160] sm:$0xf] }
  0x42   :  { %1860 = vmatpush.bf16.msra.mxu0 %v2972_v34  ;;  %1894 = vmatpush.bf16.msra.mxu1 %v3036_v39  ;;  %v3100_v34 = vor.u32 %v3622_v30, %v3099_v29  ;;  %v3091_v39 = vld [vmem:[#allocation4 + $0x130] sm:$0xf] }
  0x43   :  { %490 = vmatpush.msra.mxu2 %v86_v8  ;;  %537 = vmatpush.msra.mxu3 %v87_v9  ;;  %v3626_v8 = vld [vmem:[#allocation4 + $0x164] sm:$0xf0]  ;;  %v3004_v9 = vor.u32 %v3598_v6, %v3003_v4 }
  0x44   :  { %v3116_v10 = vor.u32 %v3626_v8, %v3115_v7 }
  0x45   :  { %1925 = vmatpush.bf16.msrb.mxu2 %v3124_v61  ;;  %1959 = vmatpush.bf16.msrb.mxu3 %v3188_v0 }
  0x46   :  { %1895 = vmatpush.bf16.msra.mxu1 %v3028_v45 }
  0x47   :  { %2782 = vmatmul.msk.f32.gmra.mxu0 %vm162_vm0, %v4130_v51  ;;  %2792 = vmatmul.msk.f32.gmra.mxu1 %vm162_vm0, %v4130_v51 }
  0x48   :  { %2800 = vmatmul.msk.f32.gmra.mxu2 %vm162_vm0, %v4104_v37  ;;  %2810 = vmatmul.msk.f32.gmra.mxu3 %vm162_vm0, %v4104_v37 }
  0x49   :  { %1926 = vmatpush.bf16.msrb.mxu2 %v3116_v10  ;;  %v3616_v10 = vld [vmem:[#allocation4 + $0x114] sm:$0xf0] }
  0x4a   :  { %1896 = vmatpush.bf16.msra.mxu1 %v3020_v52 }
  0x4d   :  { %1927 = vmatpush.bf16.msrb.mxu2 %v3108_v21 }
  0x4e   :  { %1897 = vmatpush.bf16.msra.mxu1 %v3012_v60 }
  0x4f   :  { %2783 = vmatmul.msk.f32.gmra.mxu0 %vm162_vm0, %v4143_v58  ;;  %2793 = vmatmul.msk.f32.gmra.mxu1 %vm162_vm0, %v4143_v58 }
  0x50   :  { %2801 = vmatmul.msk.f32.gmra.mxu2 %vm162_vm0, %v4117_v44  ;;  %2811 = vmatmul.msk.f32.gmra.mxu3 %vm162_vm0, %v4117_v44 }
  0x51   :  { %1928 = vmatpush.bf16.msrb.mxu2 %v3100_v34  ;;  %v4300_v34 = vperm.slane %v4225_v12, 3 }
  0x52   :  { %1898 = vmatpush.bf16.msra.mxu1 %v3004_v9  ;;  %v3075_v9 = vld [vmem:[#allocation4 + $0x110] sm:$0xf] }
  0x57   :  { %2784 = vmatmul.msk.f32.gmra.mxu0 %vm162_vm0, %v4156_v1  ;;  %2794 = vmatmul.msk.f32.gmra.mxu1 %vm162_vm0, %v4156_v1 }
  0x58   :  { %2802 = vmatmul.msk.f32.gmra.mxu2 %vm162_vm0, %v4130_v51  ;;  %2812 = vmatmul.msk.f32.gmra.mxu3 %vm162_vm0, %v4130_v51 }
  0x5f   :  { %2817 = vmatmul.msk.f32.vlgmr.msrb.gmra.mxu0 %vm162_vm0, %v4055_v16  ;;  %2827 = vmatmul.msk.f32.vlgmr.msrb.gmra.mxu1 %vm162_vm0, %v4055_v16 }
  0x60   :  { %2803 = vmatmul.msk.f32.gmra.mxu2 %vm162_vm0, %v4143_v58  ;;  %2813 = vmatmul.msk.f32.gmra.mxu3 %vm162_vm0, %v4143_v58 }
  0x67   :  { %2818 = vmatmul.msk.f32.gmra.mxu0 %vm162_vm0, %v4073_v26  ;;  %2828 = vmatmul.msk.f32.gmra.mxu1 %vm162_vm0, %v4073_v26 }
  0x68   :  { %2804 = vmatmul.msk.f32.gmra.mxu2 %vm162_vm0, %v4156_v1  ;;  %2814 = vmatmul.msk.f32.gmra.mxu3 %vm162_vm0, %v4156_v1 }
  0x6f   :  { %2819 = vmatmul.msk.f32.gmra.mxu0 %vm162_vm0, %v4091_v36  ;;  %2829 = vmatmul.msk.f32.gmra.mxu1 %vm162_vm0, %v4091_v36 }
  0x70   :  { %2805 = vmatmul.msk.f32.gmra.mxu2 %vm162_vm0, %v4060_v17  ;;  %2815 = vmatmul.msk.f32.gmra.mxu3 %vm162_vm0, %v4060_v17 }
  0x77   :  { %2820 = vmatmul.msk.f32.gmra.mxu0 %vm162_vm0, %v4104_v37  ;;  %2830 = vmatmul.msk.f32.gmra.mxu1 %vm162_vm0, %v4104_v37 }
  0x78   :  { %2806 = vmatmul.msk.f32.gmra.mxu2 %vm162_vm0, %v4078_v27  ;;  %2816 = vmatmul.msk.f32.gmra.mxu3 %vm162_vm0, %v4078_v27 }
  0x7f   :  { %2821 = vmatmul.msk.f32.gmra.mxu0 %vm162_vm0, %v4117_v44  ;;  %2831 = vmatmul.msk.f32.gmra.mxu1 %vm162_vm0, %v4117_v44 }
  0x80   :  { %2837 = vmatmul.msk.f32.vlgmr.msra.gmra.mxu2 %vm162_vm0, %v4055_v16  ;;  %2847 = vmatmul.msk.f32.vlgmr.msra.gmra.mxu3 %vm162_vm0, %v4055_v16  ;;  %v2964_v16 = vor.u32 %v3588_v41, %v2963_v40  ;;  %v3620_v40 = vld [vmem:[#allocation4 + $0x134] sm:$0xf0] }
  0x81   :  { %v3092_v48 = vor.u32 %v3620_v40, %v3091_v39  ;;  %v3067_v40 = vld [vmem:[#allocation4 + $0x100] sm:$0xf] }
  0x82   :  { %1861 = vmatpush.bf16.msra.mxu0 %v2964_v16  ;;  %v3155_v16 = vld [vmem:[#allocation4 + $0x1b0] sm:$0xf] }
  0x83   :  { %v3156_v50 = vor.u32 %v3636_v43, %v3155_v16  ;;  %1929 = vmatpush.bf16.msrb.mxu2 %v3092_v48  ;;  %v3614_v16 = vld [vmem:[#allocation4 + $0x104] sm:$0xf0]  ;;  %v3131_v43 = vld [vmem:[#allocation4 + $0x180] sm:$0xf] }
  0x86   :  { %1862 = vmatpush.bf16.msra.mxu0 %v2956_v49 }
  0x87   :  { %2822 = vmatmul.msk.f32.gmra.mxu0 %vm162_vm0, %v4130_v51  ;;  %2832 = vmatmul.msk.f32.gmra.mxu1 %vm162_vm0, %v4130_v51 }
  0x88   :  { %2838 = vmatmul.msk.f32.gmra.mxu2 %vm162_vm0, %v4073_v26  ;;  %2848 = vmatmul.msk.f32.gmra.mxu3 %vm162_vm0, %v4073_v26  ;;  %v2948_v26 = vor.u32 %v3584_v54, %v2947_v53  ;;  %v3083_v54 = vld [vmem:[#allocation4 + $0x120] sm:$0xf] }
  0x8a   :  { %1863 = vmatpush.bf16.msra.mxu0 %v2948_v26 }
  0x8e   :  { %1864 = vmatpush.bf16.msra.mxu0 %v2940_v5 }
  0x8f   :  { %2823 = vmatmul.msk.f32.gmra.mxu0 %vm162_vm0, %v4143_v58  ;;  %2833 = vmatmul.msk.f32.gmra.mxu1 %vm162_vm0, %v4143_v58 }
  0x90   :  { %2839 = vmatmul.msk.f32.gmra.mxu2 %vm162_vm0, %v4091_v36  ;;  %2849 = vmatmul.msk.f32.gmra.mxu3 %vm162_vm0, %v4091_v36  ;;  %v3642_v36 = vld [vmem:[#allocation4 + $0x1e4] sm:$0xf0] }
  0x91   :  { %v3180_v13 = vor.u32 %v3642_v36, %v3179_v11  ;;  %v3139_v11 = vld [vmem:[#allocation4 + $0x190] sm:$0xf] }
  0x93   :  { %1960 = vmatpush.bf16.msrb.mxu3 %v3180_v13 }
  0x97   :  { %2824 = vmatmul.msk.f32.gmra.mxu0 %vm162_vm0, %v4156_v1  ;;  %2834 = vmatmul.msk.f32.gmra.mxu1 %vm162_vm0, %v4156_v1 }
  0x98   :  { %2840 = vmatmul.msk.f32.gmra.mxu2 %vm162_vm0, %v4104_v37  ;;  %2850 = vmatmul.msk.f32.gmra.mxu3 %vm162_vm0, %v4104_v37  ;;  %v3163_v37 = vld [vmem:[#allocation4 + $0x1c0] sm:$0xf] }
  0x99   :  { %1961 = vmatpush.bf16.msrb.mxu3 %v3172_v24  ;;  %v3164_v38 = vor.u32 %v3638_v32, %v3163_v37  ;;  %v3140_v24 = vor.u32 %v3632_v15, %v3139_v11 }
  0x9a   :  { %v210_v22 = vpop.f32.mrf.mxu0 }
  0x9b   :  { %v4242_v25 = vadd.f32 %v210_v22, %v4236_v20  ;;  %v257_v28 = vpop.f32.mrf.mxu1  ;;  %v4289_v22 = vperm.slane %v4225_v12, 2 }
  0x9c   :  { %v4245_v31 = vadd.f32 %v257_v28, %v4239_v23 }
  0x9d   :  { %v649_v33 = vmin.f32 %v4242_v25, 0.0  ;;  %1962 = vmatpush.bf16.msrb.mxu3 %v3164_v38  ;;  %vm569_vm1 = vcmp.gt.f32.partialorder %v4242_v25, 0.0 }
  0x9e   :  { %v650_v35 = vmin.f32 %v4245_v31, 0.0  ;;  %vm570_vm2 = vcmp.gt.f32.partialorder %v4245_v31, 0.0 }
  0x9f   :  { %2825 = vmatmul.msk.f32.gmra.mxu0 %vm162_vm0, %v4060_v17  ;;  %2835 = vmatmul.msk.f32.gmra.mxu1 %vm162_vm0, %v4060_v17  ;;  %v729_v41 = vmul.f32 1.442695, %v649_v33 }
  0xa0   :  { %2841 = vmatmul.msk.f32.gmra.mxu2 %vm162_vm0, %v4117_v44  ;;  %2851 = vmatmul.msk.f32.gmra.mxu3 %vm162_vm0, %v4117_v44  ;;  %v234_v42 = vpop.f32.mrf.mxu2  ;;  %v731_v45 = vmul.f32 1.442695, %v650_v35  ;;  %v3618_v44 = vld [vmem:[#allocation4 + $0x124] sm:$0xf0] }
  0xa1   :  { %v4258_v46 = vadd.f32 %v234_v42, %v4236_v20  ;;  %v281_v47 = vpop.f32.mrf.mxu3  ;;  %3763 = vpow2.f32 %v729_v41  ;;  %v3084_v61 = vor.u32 %v3618_v44, %v3083_v54  ;;  %1963 = vmatpush.bf16.msrb.mxu3 %v3156_v50  ;;  %v3068_v54 = vor.u32 %v3614_v16, %v3067_v40  ;;  %v3630_v44 = vld [vmem:[#allocation4 + $0x184] sm:$0xf0] }
  0xa2   :  { %v4261_v49 = vadd.f32 %v281_v47, %v4239_v23  ;;  %3765 = vpow2.f32 %v731_v45 }
  0xa3   :  { %v713_v52 = vmin.f32 %v4258_v46, 0.0  ;;  %v213_v53 = vpop.f32.mrf.mxu0  ;;  %1930 = vmatpush.bf16.msrb.mxu2 %v3084_v61  ;;  %vm633_vm5 = vcmp.gt.f32.partialorder %v4258_v46, 0.0 }
  0xa4   :  { %v4265_v55 = vadd.f32 %v213_v53, %v4236_v20  ;;  %v260_v26 = vpop.f32.mrf.mxu1  ;;  %v714_v0 = vmin.f32 %v4261_v49, 0.0  ;;  %vm634_vm8 = vcmp.gt.f32.partialorder %v4261_v49, 0.0 }
  0xa5   :  { %v857_v59 = vmul.f32 1.442695, %v713_v52  ;;  %v4268_v60 = vadd.f32 %v260_v26, %v4239_v23  ;;  %1964 = vmatpush.bf16.msrb.mxu3 %v3148_v63 }
  0xa6   :  { %v657_v62 = vmin.f32 %v4265_v55, 0.0  ;;  %v859_v13 = vmul.f32 1.442695, %v714_v0  ;;  %vm577_vm3 = vcmp.gt.f32.partialorder %v4265_v55, 0.0 }
  0xa7   :  { %v658_v2 = vmin.f32 %v4268_v60, 0.0  ;;  %2826 = vmatmul.msk.f32.gmra.mxu0 %vm162_vm0, %v4078_v27  ;;  %2836 = vmatmul.msk.f32.gmra.mxu1 %vm162_vm0, %v4078_v27  ;;  %3767 = vpow2.f32 %v857_v59  ;;  %v3764_v6 = vpop.eup %3763  ;;  %vm578_vm4 = vcmp.gt.f32.partialorder %v4268_v60, 0.0 }
  0xa8   :  { %v745_v3 = vmul.f32 1.442695, %v657_v62  ;;  %2842 = vmatmul.msk.f32.gmra.mxu2 %vm162_vm0, %v4130_v51  ;;  %2852 = vmatmul.msk.f32.gmra.mxu3 %vm162_vm0, %v4130_v51  ;;  %v3766_v36 = vpop.eup %3765  ;;  %v3076_v51 = vor.u32 %v3616_v10, %v3075_v9  ;;  %v2857_v28 = vadd.f32 -1.0, %v3764_v6 }
  0xa9   :  { %v747_v4 = vmul.f32 1.442695, %v658_v2  ;;  %v237_v5 = vpop.f32.mrf.mxu2  ;;  %v2858_v32 = vadd.f32 -1.0, %v3766_v36  ;;  %1965 = vmatpush.bf16.msrb.mxu3 %v3140_v24 }
  0xaa   :  { %3769 = vpow2.f32 %v745_v3  ;;  %v4282_v7 = vadd.f32 %v237_v5, %v4236_v20  ;;  %v284_v8 = vpop.f32.mrf.mxu3  ;;  %1931 = vmatpush.bf16.msrb.mxu2 %v3076_v51  ;;  %v969_v47 = vsel %vm569_vm1, %v4242_v25, %v2857_v28  ;;  %v3132_v25 = vor.u32 %v3630_v44, %v3131_v43 }
  0xab   :  { %3771 = vpow2.f32 %v747_v4  ;;  %v4285_v14 = vadd.f32 %v284_v8, %v4239_v23  ;;  %v970_v50 = vsel %vm570_vm2, %v4245_v31, %v2858_v32 }
  0xac   :  { %v721_v18 = vmin.f32 %v4282_v7, 0.0  ;;  %v216_v19 = vpop.f32.mrf.mxu0  ;;  %v263_v21 = vpop.f32.mrf.mxu1  ;;  %3773 = vpow2.f32 %v859_v13  ;;  %vm641_vm6 = vcmp.gt.f32.partialorder %v4282_v7, 0.0 }
  0xad   :  { %v722_v29 = vmin.f32 %v4285_v14, 0.0  ;;  %v4293_v30 = vadd.f32 %v216_v19, %v4236_v20  ;;  %v4296_v37 = vadd.f32 %v263_v21, %v4239_v23  ;;  %v3768_v35 = vpop.eup %3767  ;;  %1966 = vmatpush.bf16.msrb.mxu3 %v3132_v25  ;;  %vm642_vm7 = vcmp.gt.f32.partialorder %v4285_v14, 0.0 }
  0xae   :  { %v873_v33 = vmul.f32 1.442695, %v721_v18  ;;  %1932 = vmatpush.bf16.msrb.mxu2 %v3068_v54 }
  0xaf   :  { %v875_v38 = vmul.f32 1.442695, %v722_v29  ;;  %v665_v39 = vmin.f32 %v4293_v30, 0.0  ;;  %v666_v42 = vmin.f32 %v4296_v37, 0.0  ;;  %vm585_vm9 = vcmp.gt.f32.partialorder %v4293_v30, 0.0 }
  0xb0   :  { %v3770_v41 = vpop.eup %3769  ;;  %3775 = vpow2.f32 %v873_v33  ;;  %2843 = vmatmul.msk.f32.gmra.mxu2 %vm162_vm0, %v4143_v58  ;;  %2853 = vmatmul.msk.f32.gmra.mxu3 %vm162_vm0, %v4143_v58  ;;  %v2921_v58 = vadd.f32 -1.0, %v3768_v35  ;;  %vm586_vm11 = vcmp.gt.f32.partialorder %v4296_v37, 0.0 }
  0xb1   :  { %v3772_v45 = vpop.eup %3771  ;;  %v2865_v48 = vadd.f32 -1.0, %v3770_v41  ;;  %3777 = vpow2.f32 %v875_v38  ;;  %v761_v53 = vmul.f32 1.442695, %v665_v39  ;;  %v763_v62 = vmul.f32 1.442695, %v666_v42 }
  0xb2   :  { %v2866_v52 = vadd.f32 -1.0, %v3772_v45  ;;  %v3774_v2 = vpop.eup %3773  ;;  %v1033_v13 = vsel %vm633_vm5, %v4258_v46, %v2921_v58 }
  0xb3   :  { %v977_v26 = vsel %vm577_vm3, %v4265_v55, %v2865_v48  ;;  %v304_v56 = vpop.f32.mrf.mxu2  ;;  %v351_v57 = vpop.f32.mrf.mxu3  ;;  %3779 = vpow2.f32 %v761_v53  ;;  %v2922_v28 = vadd.f32 -1.0, %v3774_v2 }
  0xb4   :  { %v4320_v59 = vpack.c.bf16 %v977_v26, %v969_v47  ;;  %v978_v61 = vsel %vm578_vm4, %v4268_v60, %v2866_v52  ;;  %v4324_v63 = vadd.f32 %v304_v56, %v4289_v22  ;;  %v219_v31 = vpop.f32.mrf.mxu0  ;;  %v266_v0 = vpop.f32.mrf.mxu1  ;;  %v4329_v4 = vadd.f32 %v351_v57, %v4300_v34 }
  0xb5   :  { %v4326_v3 = vpack.c.bf16 %v978_v61, %v970_v50  ;;  %v4332_v55 = vadd.f32 %v219_v31, %v4236_v20  ;;  %v4335_v5 = vadd.f32 %v266_v0, %v4239_v23  ;;  %3781 = vpow2.f32 %v763_v62 }
  0xb6   :  { %v3776_v60 = vpop.eup %3775  ;;  %v651_v6 = vmin.f32 %v4324_v63, 0.0  ;;  %1865 = vmatmul.bf16.vlgmr.msra.gmra.mxu0 %v4320_v59  ;;  %v652_v10 = vmin.f32 %v4329_v4, 0.0  ;;  %v1034_v48 = vsel %vm634_vm8, %v4261_v49, %v2922_v28  ;;  %vm571_vm13 = vcmp.gt.f32.partialorder %v4324_v63, 0.0 }
  0xb7   :  { %v3778_v8 = vpop.eup %3777  ;;  %v2929_v9 = vadd.f32 -1.0, %v3776_v60  ;;  %v673_v11 = vmin.f32 %v4332_v55, 0.0  ;;  %1899 = vmatmul.bf16.vlgmr.msra.gmra.mxu1 %v4326_v3  ;;  %v674_v36 = vmin.f32 %v4335_v5, 0.0  ;;  %vm593_vm10 = vcmp.gt.f32.partialorder %v4332_v55, 0.0 }
  0xb8   :  { %2844 = vmatmul.msk.f32.gmra.mxu2 %vm162_vm0, %v4156_v1  ;;  %2854 = vmatmul.msk.f32.gmra.mxu3 %vm162_vm0, %v4156_v1  ;;  %v2930_v51 = vadd.f32 -1.0, %v3778_v8  ;;  %v733_v15 = vmul.f32 1.442695, %v651_v6  ;;  %v735_v29 = vmul.f32 1.442695, %v652_v10  ;;  %vm594_vm12 = vcmp.gt.f32.partialorder %v4335_v5, 0.0 }
  0xb9   :  { %v777_v18 = vmul.f32 1.442695, %v673_v11  ;;  %v1041_v19 = vsel %vm641_vm6, %v4282_v7, %v2929_v9  ;;  %v779_v21 = vmul.f32 1.442695, %v674_v36  ;;  %v3780_v35 = vpop.eup %3779  ;;  %vm572_vm14 = vcmp.gt.f32.partialorder %v4329_v4, 0.0 }
  0xba   :  { %v4351_v24 = vpack.c.bf16 %v1041_v19, %v1033_v13  ;;  %v1042_v41 = vsel %vm642_vm7, %v4285_v14, %v2930_v51  ;;  %v2873_v47 = vadd.f32 -1.0, %v3780_v35 }
  0xbb   :  { %v307_v32 = vpop.f32.mrf.mxu2  ;;  %v354_v33 = vpop.f32.mrf.mxu3  ;;  %3783 = vpow2.f32 %v777_v18  ;;  %v4377_v14 = vpack.c.bf16 %v1042_v41, %v1034_v48 }
  0xbc   :  { %5545 = vst [vmem:[#allocation8_spill] sm:$0xff] %v4351_v24  ;;  %v4355_v1 = vadd.f32 %v307_v32, %v4289_v22  ;;  %v4358_v46 = vadd.f32 %v354_v33, %v4300_v34  ;;  %v222_v38 = vpop.f32.mrf.mxu0  ;;  %v269_v39 = vpop.f32.mrf.mxu1  ;;  %3785 = vpow2.f32 %v733_v15  ;;  %v985_v2 = vsel %vm585_vm9, %v4293_v30, %v2873_v47 }
  0xbd   :  { %v4361_v7 = vadd.f32 %v222_v38, %v4236_v20  ;;  %v4364_v40 = vadd.f32 %v269_v39, %v4239_v23  ;;  %v3782_v42 = vpop.eup %3781  ;;  %3787 = vpow2.f32 %v779_v21  ;;  %5546 = vst [vmem:[#allocation9_spill] sm:$0xff] %v4377_v14 }
  0xbe   :  { %v659_v16 = vmin.f32 %v4355_v1, 0.0  ;;  %v660_v43 = vmin.f32 %v4358_v46, 0.0  ;;  %3789 = vpow2.f32 %v735_v29  ;;  %v2874_v49 = vadd.f32 -1.0, %v3782_v42 }
  0xbf   :  { %v681_v45 = vmin.f32 %v4361_v7, 0.0  ;;  %v682_v53 = vmin.f32 %v4364_v40, 0.0  ;;  %vm579_vm15 = vcmp.gt.f32.partialorder %v4355_v1, 0.0  ;;  %vm601_vm1 = vcmp.gt.f32.partialorder %v4361_v7, 0.0 }
  0xc0   :  { %v749_v50 = vmul.f32 1.442695, %v659_v16  ;;  %v751_v52 = vmul.f32 1.442695, %v660_v43  ;;  %2845 = vmatmul.msk.f32.gmra.mxu2 %vm162_vm0, %v4060_v17  ;;  %2855 = vmatmul.msk.f32.gmra.mxu3 %vm162_vm0, %v4060_v17  ;;  %v986_v30 = vsel %vm586_vm11, %v4296_v37, %v2874_v49  ;;  %v3660_v49 = vld [vmem:[#allocation4 + $0x274] sm:$0xf0] }
  0xc1   :  { %v3784_v54 = vpop.eup %3783  ;;  %v793_v44 = vmul.f32 1.442695, %v681_v45  ;;  %v795_v61 = vmul.f32 1.442695, %v682_v53  ;;  %vm602_vm3 = vcmp.gt.f32.partialorder %v4364_v40, 0.0 }
  0xc2   :  { %3791 = vpow2.f32 %v749_v50  ;;  %v3786_v58 = vpop.eup %3785  ;;  %v2881_v57 = vadd.f32 -1.0, %v3784_v54 }
  0xc3   :  { %3793 = vpow2.f32 %v751_v52  ;;  %v310_v26 = vpop.f32.mrf.mxu2  ;;  %v357_v56 = vpop.f32.mrf.mxu3  ;;  %v2859_v10 = vadd.f32 -1.0, %v3786_v58 }
  0xc4   :  { %v3788_v25 = vpop.eup %3787  ;;  %v4383_v17 = vadd.f32 %v310_v26, %v4289_v22  ;;  %v4386_v62 = vadd.f32 %v357_v56, %v4300_v34  ;;  %v225_v31 = vpop.f32.mrf.mxu0  ;;  %v993_v9 = vsel %vm593_vm10, %v4332_v55, %v2881_v57  ;;  %3795 = vpow2.f32 %v793_v44  ;;  %v3251_v44 = vld [vmem:[#allocation4 + $0x270] sm:$0xf] }
  0xc5   :  { %v272_v0 = vpop.f32.mrf.mxu1  ;;  %v3790_v60 = vpop.eup %3789  ;;  %v4392_v6 = vadd.f32 %v225_v31, %v4236_v20  ;;  %v4407_v51 = vpack.c.bf16 %v993_v9, %v985_v2  ;;  %v2882_v15 = vadd.f32 -1.0, %v3788_v25  ;;  %3797 = vpow2.f32 %v795_v61 }
  0xc6   :  { %v4395_v8 = vadd.f32 %v272_v0, %v4239_v23  ;;  %v667_v11 = vmin.f32 %v4383_v17, 0.0  ;;  %v2860_v55 = vadd.f32 -1.0, %v3790_v60  ;;  %v668_v19 = vmin.f32 %v4386_v62, 0.0 }
  0xc7   :  { %v689_v36 = vmin.f32 %v4392_v6, 0.0  ;;  %1870 = vmatmul.bf16.gmra.mxu0 %v4407_v51  ;;  %v994_v32 = vsel %vm594_vm12, %v4335_v5, %v2882_v15  ;;  %v3252_v31 = vor.u32 %v3660_v49, %v3251_v44  ;;  %vm609_vm2 = vcmp.gt.f32.partialorder %v4392_v6, 0.0 }
  0xc8   :  { %v690_v13 = vmin.f32 %v4395_v8, 0.0  ;;  %v3792_v18 = vpop.eup %3791  ;;  %2846 = vmatmul.msk.f32.gmra.mxu2 %vm162_vm0, %v4078_v27  ;;  %2856 = vmatmul.msk.f32.gmra.mxu3 %vm162_vm0, %v4078_v27  ;;  %v4421_v35 = vpack.c.bf16 %v994_v32, %v986_v30  ;;  %v971_v27 = vsel %vm571_vm13, %v4324_v63, %v2859_v10  ;;  %vm580_vm0 = vcmp.gt.f32.partialorder %v4358_v46, 0.0 }
  0xc9   :  { %v3794_v37 = vpop.eup %3793  ;;  %v2867_v21 = vadd.f32 -1.0, %v3792_v18  ;;  %v809_v28 = vmul.f32 1.442695, %v689_v36  ;;  %v765_v39 = vmul.f32 1.442695, %v667_v11  ;;  %v972_v5 = vsel %vm572_vm14, %v4329_v4, %v2860_v55  ;;  %1993 = vmatpush.bf16.msrb.mxu0 %v3252_v31 }
  0xca   :  { %v811_v29 = vmul.f32 1.442695, %v690_v13  ;;  %v2868_v33 = vadd.f32 -1.0, %v3794_v37  ;;  %v3796_v16 = vpop.eup %3795  ;;  %1904 = vmatmul.bf16.gmra.mxu1 %v4421_v35  ;;  %v767_v48 = vmul.f32 1.442695, %v668_v19  ;;  %vm610_vm4 = vcmp.gt.f32.partialorder %v4395_v8, 0.0 }
  0xcb   :  { %v979_v38 = vsel %vm579_vm15, %v4355_v1, %v2867_v21  ;;  %v313_v41 = vpop.f32.mrf.mxu2  ;;  %v360_v42 = vpop.f32.mrf.mxu3  ;;  %3799 = vpow2.f32 %v809_v28  ;;  %v2889_v61 = vadd.f32 -1.0, %v3796_v16  ;;  %vm587_vm5 = vcmp.gt.f32.partialorder %v4383_v17, 0.0  ;;  %v3315_v16 = vld [vmem:[#allocation4 + $0x2f0] sm:$0xf] }
  0xcc   :  { %v980_v43 = vsel %vm580_vm0, %v4358_v46, %v2868_v33  ;;  %v4432_v45 = vadd.f32 %v313_v41, %v4289_v22  ;;  %v228_v47 = vpop.f32.mrf.mxu0  ;;  %3801 = vpow2.f32 %v811_v29  ;;  %v4435_v1 = vadd.f32 %v360_v42, %v4300_v34  ;;  %v3798_v52 = vpop.eup %3797 }
  0xcd   :  { %v275_v63 = vpop.f32.mrf.mxu1  ;;  %v4438_v50 = vadd.f32 %v228_v47, %v4236_v20  ;;  %v4440_v4 = vpack.c.bf16 %v979_v38, %v971_v27  ;;  %v4442_v46 = vpack.c.bf16 %v980_v43, %v972_v5  ;;  %3803 = vpow2.f32 %v765_v39 }
  0xce   :  { %v675_v53 = vmin.f32 %v4432_v45, 0.0  ;;  %v4446_v54 = vadd.f32 %v275_v63, %v4239_v23  ;;  %v676_v58 = vmin.f32 %v4435_v1, 0.0  ;;  %3805 = vpow2.f32 %v767_v48 }
  0xcf   :  { %v697_v26 = vmin.f32 %v4438_v50, 0.0  ;;  %v2890_v60 = vadd.f32 -1.0, %v3798_v52  ;;  %v1001_v29 = vsel %vm601_vm1, %v4361_v7, %v2889_v61  ;;  %vm588_vm6 = vcmp.gt.f32.partialorder %v4386_v62, 0.0 }
  0xd0   :  { %v781_v56 = vmul.f32 1.442695, %v675_v53  ;;  %v698_v57 = vmin.f32 %v4446_v54, 0.0  ;;  %1933 = vmatmul.bf16.vlgmr.msrb.gmra.mxu2 %v4440_v4  ;;  %1967 = vmatmul.bf16.vlgmr.msrb.gmra.mxu3 %v4442_v46  ;;  %v783_v25 = vmul.f32 1.442695, %v676_v58  ;;  %vm595_vm7 = vcmp.gt.f32.partialorder %v4432_v45, 0.0 }
  0xd1   :  { %v3800_v0 = vpop.eup %3799  ;;  %v825_v2 = vmul.f32 1.442695, %v697_v26  ;;  %vm596_vm8 = vcmp.gt.f32.partialorder %v4435_v1, 0.0  ;;  %v4495_v44 = vperm.slane %v4225_v12, 4  ;;  %vm617_vm9 = vcmp.gt.f32.partialorder %v4438_v50, 0.0 }
  0xd2   :  { %3807 = vpow2.f32 %v781_v56  ;;  %v3802_v9 = vpop.eup %3801  ;;  %v2897_v30 = vadd.f32 -1.0, %v3800_v0  ;;  %v827_v36 = vmul.f32 1.442695, %v698_v57  ;;  %vm618_vm10 = vcmp.gt.f32.partialorder %v4446_v54, 0.0 }
  0xd3   :  { %3809 = vpow2.f32 %v783_v25  ;;  %v316_v10 = vpop.f32.mrf.mxu2  ;;  %v363_v11 = vpop.f32.mrf.mxu3  ;;  %v2898_v19 = vadd.f32 -1.0, %v3802_v9 }
  0xd4   :  { %v4459_v13 = vadd.f32 %v316_v10, %v4289_v22  ;;  %v4462_v15 = vadd.f32 %v363_v11, %v4300_v34  ;;  %v231_v18 = vpop.f32.mrf.mxu0  ;;  %v3804_v37 = vpop.eup %3803  ;;  %v1009_v32 = vsel %vm609_vm2, %v4392_v6, %v2897_v30  ;;  %3811 = vpow2.f32 %v825_v2 }
  0xd5   :  { %v278_v55 = vpop.f32.mrf.mxu1  ;;  %v4465_v21 = vadd.f32 %v231_v18, %v4236_v20  ;;  %v1002_v20 = vsel %vm602_vm3, %v4364_v40, %v2890_v60  ;;  %v3806_v33 = vpop.eup %3805  ;;  %v2875_v6 = vadd.f32 -1.0, %v3804_v37  ;;  %3813 = vpow2.f32 %v827_v36  ;;  %v3676_v40 = vld [vmem:[#allocation4 + $0x2f4] sm:$0xf0]  ;;  %v3243_v18 = vld [vmem:[#allocation4 + $0x260] sm:$0xf] }
  0xd6   :  { %v4468_v28 = vadd.f32 %v278_v55, %v4239_v23  ;;  %v683_v23 = vmin.f32 %v4459_v13, 0.0  ;;  %v684_v27 = vmin.f32 %v4462_v15, 0.0  ;;  %v4485_v41 = vpack.c.bf16 %v1009_v32, %v1001_v29  ;;  %v3658_v55 = vld [vmem:[#allocation4 + $0x264] sm:$0xf0]  ;;  %v3307_v37 = vld [vmem:[#allocation4 + $0x2e0] sm:$0xf] }
  0xd7   :  { %v705_v7 = vmin.f32 %v4465_v21, 0.0  ;;  %v1010_v42 = vsel %vm610_vm4, %v4395_v8, %v2898_v19  ;;  %v2876_v52 = vadd.f32 -1.0, %v3806_v33  ;;  %v3316_v57 = vor.u32 %v3676_v40, %v3315_v16  ;;  %v3674_v29 = vld [vmem:[#allocation4 + $0x2e4] sm:$0xf0] }
  0xd8   :  { %v706_v38 = vmin.f32 %v4468_v28, 0.0  ;;  %v3808_v39 = vpop.eup %3807  ;;  %v4490_v48 = vpack.c.bf16 %v1010_v42, %v1002_v20  ;;  %1875 = vmatmul.bf16.gmra.mxu0 %v4485_v41  ;;  %v797_v49 = vmul.f32 1.442695, %v683_v23  ;;  %v799_v58 = vmul.f32 1.442695, %v684_v27 }
  0xd9   :  { %v3810_v5 = vpop.eup %3809  ;;  %v2883_v43 = vadd.f32 -1.0, %v3808_v39  ;;  %v841_v47 = vmul.f32 1.442695, %v705_v7  ;;  %v4508_v2 = vperm.slane %v4225_v12, 5  ;;  %2027 = vmatpush.bf16.msrb.mxu1 %v3316_v57  ;;  %v988_v36 = vsel %vm588_vm6, %v4386_v62, %v2876_v52  ;;  %v3656_v57 = vld [vmem:[#allocation4 + $0x254] sm:$0xf0] }
  0xda   :  { %v843_v63 = vmul.f32 1.442695, %v706_v38  ;;  %v2884_v53 = vadd.f32 -1.0, %v3810_v5  ;;  %v3812_v25 = vpop.eup %3811  ;;  %1909 = vmatmul.bf16.gmra.mxu1 %v4490_v48  ;;  %vm625_vm11 = vcmp.gt.f32.partialorder %v4465_v21, 0.0  ;;  %vm626_vm12 = vcmp.gt.f32.partialorder %v4468_v28, 0.0 }
  0xdb   :  { %v319_v8 = vpop.f32.mrf.mxu2  ;;  %v366_v26 = vpop.f32.mrf.mxu3  ;;  %v995_v56 = vsel %vm595_vm7, %v4432_v45, %v2883_v43  ;;  %3815 = vpow2.f32 %v841_v47  ;;  %v987_v45 = vsel %vm587_vm5, %v4383_v17, %v2875_v6  ;;  %v2905_v19 = vadd.f32 -1.0, %v3812_v25 }
  0xdc   :  { %v4502_v61 = vadd.f32 %v319_v8, %v4289_v22  ;;  %v4505_v31 = vadd.f32 %v366_v26, %v4300_v34  ;;  %v398_v0 = vpop.f32.mrf.mxu0  ;;  %3817 = vpow2.f32 %v843_v63  ;;  %v996_v9 = vsel %vm596_vm8, %v4435_v1, %v2884_v53  ;;  %v3814_v10 = vpop.eup %3813 }
  0xdd   :  { %v445_v60 = vpop.f32.mrf.mxu1  ;;  %v4519_v12 = vpack.c.bf16 %v995_v56, %v987_v45  ;;  %3819 = vpow2.f32 %v797_v49  ;;  %v4524_v17 = vpack.c.bf16 %v996_v9, %v988_v36  ;;  %v4527_v1 = vadd.f32 %v398_v0, %v4495_v44  ;;  %v3235_v56 = vld [vmem:[#allocation4 + $0x250] sm:$0xf] }
  0xde   :  { %v691_v11 = vmin.f32 %v4502_v61, 0.0  ;;  %v692_v30 = vmin.f32 %v4505_v31, 0.0  ;;  %3821 = vpow2.f32 %v799_v58  ;;  %v4531_v33 = vadd.f32 %v445_v60, %v4508_v2 }
  0xdf   :  { %v2906_v62 = vadd.f32 -1.0, %v3814_v10  ;;  %v3244_v27 = vor.u32 %v3658_v55, %v3243_v18  ;;  %v3308_v7 = vor.u32 %v3674_v29, %v3307_v37  ;;  %v653_v16 = vmin.f32 %v4527_v1, 0.0 }
  0xe0   :  { %v813_v32 = vmul.f32 1.442695, %v691_v11  ;;  %v815_v20 = vmul.f32 1.442695, %v692_v30  ;;  %1938 = vmatmul.bf16.gmra.mxu2 %v4519_v12  ;;  %1972 = vmatmul.bf16.gmra.mxu3 %v4524_v17  ;;  %v1017_v40 = vsel %vm617_vm9, %v4438_v50, %v2905_v19  ;;  %v654_v63 = vmin.f32 %v4531_v33, 0.0 }
  0xe1   :  { %v3816_v23 = vpop.eup %3815  ;;  %1994 = vmatpush.bf16.msrb.mxu0 %v3244_v27  ;;  %2028 = vmatpush.bf16.msrb.mxu1 %v3308_v7  ;;  %v1018_v50 = vsel %vm618_vm10, %v4446_v54, %v2906_v62  ;;  %vm603_vm13 = vcmp.gt.f32.partialorder %v4459_v13, 0.0  ;;  %v737_v45 = vmul.f32 1.442695, %v653_v16  ;;  %v3672_v11 = vld [vmem:[#allocation4 + $0x2d4] sm:$0xf0]  ;;  %vm611_vm14 = vcmp.gt.f32.partialorder %v4502_v61, 0.0 }
  0xe2   :  { %3823 = vpow2.f32 %v813_v32  ;;  %v3818_v38 = vpop.eup %3817  ;;  %v2913_v39 = vadd.f32 -1.0, %v3816_v23  ;;  %v739_v18 = vmul.f32 1.442695, %v654_v63  ;;  %vm604_vm15 = vcmp.gt.f32.partialorder %v4462_v15, 0.0  ;;  %v3227_v63 = vld [vmem:[#allocation4 + $0x240] sm:$0xf] }
  0xe3   :  { %3825 = vpow2.f32 %v815_v20  ;;  %v322_v6 = vpop.f32.mrf.mxu2  ;;  %v369_v42 = vpop.f32.mrf.mxu3  ;;  %v2914_v5 = vadd.f32 -1.0, %v3818_v38  ;;  %vm612_vm0 = vcmp.gt.f32.partialorder %v4505_v31, 0.0  ;;  %vm573_vm2 = vcmp.gt.f32.partialorder %v4527_v1, 0.0 }
  0xe4   :  { %v4542_v43 = vadd.f32 %v322_v6, %v4289_v22  ;;  %v4545_v47 = vadd.f32 %v369_v42, %v4300_v34  ;;  %v401_v52 = vpop.f32.mrf.mxu0  ;;  %v3820_v49 = vpop.eup %3819  ;;  %v1025_v58 = vsel %vm625_vm11, %v4465_v21, %v2913_v39  ;;  %v3299_v21 = vld [vmem:[#allocation4 + $0x2d0] sm:$0xf]  ;;  %3827 = vpow2.f32 %v737_v45 }
  0xe5   :  { %v448_v53 = vpop.f32.mrf.mxu1  ;;  %v4555_v8 = vadd.f32 %v401_v52, %v4495_v44  ;;  %v3822_v25 = vpop.eup %3821  ;;  %v4563_v9 = vpack.c.bf16 %v1025_v58, %v1017_v40  ;;  %v1026_v54 = vsel %vm626_vm12, %v4468_v28, %v2914_v5  ;;  %v2891_v36 = vadd.f32 -1.0, %v3820_v49  ;;  %v3654_v52 = vld [vmem:[#allocation4 + $0x244] sm:$0xf0]  ;;  %v3291_v58 = vld [vmem:[#allocation4 + $0x2c0] sm:$0xf] }
  0xe6   :  { %v4558_v26 = vadd.f32 %v448_v53, %v4508_v2  ;;  %v699_v0 = vmin.f32 %v4542_v43, 0.0  ;;  %v700_v60 = vmin.f32 %v4545_v47, 0.0  ;;  %v4570_v55 = vpack.c.bf16 %v1026_v54, %v1018_v50  ;;  %v3670_v50 = vld [vmem:[#allocation4 + $0x2c4] sm:$0xf0] }
  0xe7   :  { %v661_v10 = vmin.f32 %v4555_v8, 0.0  ;;  %v2892_v37 = vadd.f32 -1.0, %v3822_v25  ;;  %v3236_v28 = vor.u32 %v3656_v57, %v3235_v56  ;;  %v3300_v27 = vor.u32 %v3672_v11, %v3299_v21  ;;  %v3652_v21 = vld [vmem:[#allocation4 + $0x234] sm:$0xf0]  ;;  %v3283_v11 = vld [vmem:[#allocation4 + $0x2b0] sm:$0xf] }
  0xe8   :  { %v3824_v30 = vpop.eup %3823  ;;  %5547 = vst [vmem:[#allocation10_spill] sm:$0xff] %v4570_v55  ;;  %v829_v32 = vmul.f32 1.442695, %v699_v0  ;;  %v662_v20 = vmin.f32 %v4558_v26, 0.0  ;;  %v831_v23 = vmul.f32 1.442695, %v700_v60  ;;  %1880 = vmatmul.bf16.gmra.mxu0 %v4563_v9  ;;  %3829 = vpow2.f32 %v739_v18 }
  0xe9   :  { %v3826_v19 = vpop.eup %3825  ;;  %v2899_v29 = vadd.f32 -1.0, %v3824_v30  ;;  %v753_v39 = vmul.f32 1.442695, %v661_v10  ;;  %1995 = vmatpush.bf16.msrb.mxu0 %v3236_v28  ;;  %2029 = vmatpush.bf16.msrb.mxu1 %v3300_v27  ;;  %v1004_v25 = vsel %vm604_vm15, %v4462_v15, %v2892_v37  ;;  %v3228_v54 = vor.u32 %v3654_v52, %v3227_v63  ;;  %v3668_v30 = vld [vmem:[#allocation4 + $0x2b4] sm:$0xf0] }
  0xea   :  { %v2900_v62 = vadd.f32 -1.0, %v3826_v19  ;;  %1914 = vmatmul.bf16.gmra.mxu1 %v4570_v55  ;;  %3831 = vpow2.f32 %v829_v32  ;;  %v755_v53 = vmul.f32 1.442695, %v662_v20  ;;  %v3292_v10 = vor.u32 %v3670_v50, %v3291_v58  ;;  %v3650_v63 = vld [vmem:[#allocation4 + $0x224] sm:$0xf0] }
  0xeb   :  { %v325_v7 = vpop.f32.mrf.mxu2  ;;  %v372_v38 = vpop.f32.mrf.mxu3  ;;  %v1011_v6 = vsel %vm611_vm14, %v4502_v61, %v2899_v29  ;;  %v1003_v61 = vsel %vm603_vm13, %v4459_v13, %v2891_v36  ;;  %3833 = vpow2.f32 %v831_v23  ;;  %v3219_v13 = vld [vmem:[#allocation4 + $0x230] sm:$0xf]  ;;  %v3284_v20 = vor.u32 %v3668_v30, %v3283_v11  ;;  %v3275_v52 = vld [vmem:[#allocation4 + $0x2a0] sm:$0xf]  ;;  %v3666_v50 = vld [vmem:[#allocation4 + $0x2a4] sm:$0xf0] }
  0xec   :  { %v4581_v42 = vadd.f32 %v325_v7, %v4289_v22  ;;  %v4584_v16 = vadd.f32 %v372_v38, %v4300_v34  ;;  %v404_v40 = vpop.f32.mrf.mxu0  ;;  %v1012_v49 = vsel %vm612_vm0, %v4505_v31, %v2900_v62  ;;  %v4591_v57 = vpack.c.bf16 %v1011_v6, %v1003_v61  ;;  %v3828_v36 = vpop.eup %3827  ;;  %v3211_v6 = vld [vmem:[#allocation4 + $0x220] sm:$0xf]  ;;  %v3181_v55 = vld [vmem:[#allocation4 + $0x1e8] sm:$0xf0] }
  0xed   :  { %v451_v5 = vpop.f32.mrf.mxu1  ;;  %3835 = vpow2.f32 %v753_v39  ;;  %v4597_v60 = vpack.c.bf16 %v1012_v49, %v1004_v25  ;;  %v4601_v45 = vadd.f32 %v404_v40, %v4495_v44  ;;  %1996 = vmatpush.bf16.msrb.mxu0 %v3228_v54  ;;  %2030 = vmatpush.bf16.msrb.mxu1 %v3292_v10  ;;  %v3220_v19 = vor.u32 %v3652_v21, %v3219_v13 }
  0xee   :  { %v707_v56 = vmin.f32 %v4581_v42, 0.0  ;;  %5548 = vst [vmem:[#allocation11_spill] sm:$0xff] %v4591_v57  ;;  %v708_v0 = vmin.f32 %v4584_v16, 0.0  ;;  %3837 = vpow2.f32 %v755_v53  ;;  %v3830_v15 = vpop.eup %3829  ;;  %vm619_vm1 = vcmp.gt.f32.partialorder %v4542_v43, 0.0 }
  0xef   :  { %5549 = vst [vmem:[#allocation12_spill] sm:$0xff] %v4597_v60  ;;  %v669_v28 = vmin.f32 %v4601_v45, 0.0  ;;  %vm620_vm3 = vcmp.gt.f32.partialorder %v4545_v47, 0.0  ;;  %v4615_v61 = vadd.f32 -1.0, %v3828_v36  ;;  %vm574_vm4 = vcmp.gt.f32.partialorder %v4531_v33, 0.0 }
  0xf0   :  { %v845_v31 = vmul.f32 1.442695, %v707_v56  ;;  %1943 = vmatmul.bf16.gmra.mxu2 %v4591_v57  ;;  %v847_v18 = vmul.f32 1.442695, %v708_v0  ;;  %1977 = vmatmul.bf16.gmra.mxu3 %v4597_v60  ;;  %v3832_v37 = vpop.eup %3831  ;;  %v4618_v49 = vadd.f32 -1.0, %v3830_v15  ;;  %v4621_v58 = vadd.f32 %v451_v5, %v4508_v2 }
  0xf1   :  { %v3834_v62 = vpop.eup %3833  ;;  %1997 = vmatpush.bf16.msrb.mxu0 %v3220_v19  ;;  %2031 = vmatpush.bf16.msrb.mxu1 %v3284_v20  ;;  %v2907_v25 = vadd.f32 -1.0, %v3832_v37  ;;  %vm627_vm5 = vcmp.gt.f32.partialorder %v4581_v42, 0.0  ;;  %vm628_vm6 = vcmp.gt.f32.partialorder %v4584_v16, 0.0  ;;  %vm581_vm7 = vcmp.gt.f32.partialorder %v4555_v8, 0.0  ;;  %v3648_v15 = vld [vmem:[#allocation4 + $0x214] sm:$0xf0] }
  0xf2   :  { %3839 = vpow2.f32 %v845_v31  ;;  %vm582_vm8 = vcmp.gt.f32.partialorder %v4558_v26, 0.0  ;;  %v769_v0 = vmul.f32 1.442695, %v669_v28  ;;  %v3212_v5 = vor.u32 %v3650_v63, %v3211_v6  ;;  %v3267_v19 = vld [vmem:[#allocation4 + $0x290] sm:$0xf] }
  0xf3   :  { %3841 = vpow2.f32 %v847_v18  ;;  %v328_v29 = vpop.f32.mrf.mxu2  ;;  %v375_v32 = vpop.f32.mrf.mxu3  ;;  %v2908_v10 = vadd.f32 -1.0, %v3834_v62  ;;  %v3276_v36 = vor.u32 %v3666_v50, %v3275_v52  ;;  %v3203_v18 = vld [vmem:[#allocation4 + $0x210] sm:$0xf]  ;;  %v3664_v62 = vld [vmem:[#allocation4 + $0x294] sm:$0xf0]  ;;  %vm589_vm12 = vcmp.gt.f32.partialorder %v4601_v45, 0.0 }
  0xf4   :  { %v4605_v23 = vadd.f32 %v328_v29, %v4289_v22  ;;  %v407_v27 = vpop.f32.mrf.mxu0  ;;  %v3836_v38 = vpop.eup %3835  ;;  %v4609_v39 = vadd.f32 %v375_v32, %v4300_v34  ;;  %v670_v32 = vmin.f32 %v4621_v58, 0.0  ;;  %3843 = vpow2.f32 %v769_v0  ;;  %v3379_v63 = vld [vmem:[#allocation4 + $0x370] sm:$0xf]  ;;  %v3692_v52 = vld [vmem:[#allocation4 + $0x374] sm:$0xf0] }
  0xf5   :  { %v454_v7 = vpop.f32.mrf.mxu1  ;;  %v3838_v53 = vpop.eup %3837  ;;  %v4629_v54 = vadd.f32 %v407_v27, %v4495_v44  ;;  %v2869_v37 = vadd.f32 -1.0, %v3836_v38  ;;  %1998 = vmatpush.bf16.msrb.mxu0 %v3212_v5  ;;  %2032 = vmatpush.bf16.msrb.mxu1 %v3276_v36  ;;  %vm590_vm14 = vcmp.gt.f32.partialorder %v4621_v58, 0.0 }
  0xf6   :  { %v715_v40 = vmin.f32 %v4605_v23, 0.0  ;;  %v716_v31 = vmin.f32 %v4609_v39, 0.0  ;;  %v2870_v29 = vadd.f32 -1.0, %v3838_v53  ;;  %v4644_v38 = vadd.f32 %v454_v7, %v4508_v2  ;;  %v3443_v53 = vld [vmem:[#allocation4 + $0x3f0] sm:$0xf] }
  0xf7   :  { %v677_v0 = vmin.f32 %v4629_v54, 0.0  ;;  %v3708_v7 = vld [vmem:[#allocation4 + $0x3f4] sm:$0xf0]  ;;  %vm635_vm9 = vcmp.gt.f32.partialorder %v4605_v23, 0.0  ;;  %vm636_vm10 = vcmp.gt.f32.partialorder %v4609_v39, 0.0  ;;  %vm597_vm15 = vcmp.gt.f32.partialorder %v4629_v54, 0.0 }
  0xf8   :  { %v3840_v56 = vpop.eup %3839  ;;  %v861_v30 = vmul.f32 1.442695, %v715_v40  ;;  %1885 = vmatmul.bf16.gmra.mxu0 %v4351_v24  ;;  %vm598_vm0 = vcmp.gt.f32.partialorder %v4644_v38, 0.0 }
  0xf9   :  { %v3842_v13 = vpop.eup %3841  ;;  %v2915_v21 = vadd.f32 -1.0, %v3840_v56 }
  0xfa   :  { %v2916_v11 = vadd.f32 -1.0, %v3842_v13  ;;  %1919 = vmatmul.bf16.gmra.mxu1 %v4377_v14  ;;  %3845 = vpow2.f32 %v861_v30  ;;  %v3927_v30 = vld [vmem:[%s5515_s3] sm:$0xff] }
  0xfb   :  { %v331_v20 = vpop.f32.mrf.mxu2  ;;  %v378_v28 = vpop.f32.mrf.mxu3  ;;  %v1027_v27 = vsel %vm627_vm5, %v4581_v42, %v2915_v21  ;;  %v863_v42 = vmul.f32 1.442695, %v716_v31  ;;  %v1020_v31 = vsel %vm620_vm3, %v4545_v47, %v2908_v10  ;;  %v3259_v47 = vld [vmem:[#allocation4 + $0x280] sm:$0xf]  ;;  %v973_v10 = vsel %vm573_vm2, %v4527_v1, %v4615_v61 }
  0xfc   :  { %v4638_v6 = vadd.f32 %v331_v20, %v4289_v22  ;;  %v4641_v40 = vadd.f32 %v378_v28, %v4300_v34  ;;  %v410_v50 = vpop.f32.mrf.mxu0  ;;  %v1019_v22 = vsel %vm619_vm1, %v4542_v43, %v2907_v25  ;;  %v1028_v34 = vsel %vm628_vm6, %v4584_v16, %v2916_v11  ;;  %v3195_v25 = vld [vmem:[#allocation4 + $0x200] sm:$0xf]  ;;  %v3646_v28 = vld [vmem:[#allocation4 + $0x204] sm:$0xf0] }
  0xfd   :  { %v4646_v56 = vpop.f32.mrf.mxu1  ;;  %v4656_v21 = vpack.c.bf16 %v1027_v27, %v1019_v22  ;;  %v4662_v36 = vpack.c.bf16 %v1028_v34, %v1020_v31  ;;  %v3204_v20 = vor.u32 %v3648_v15, %v3203_v18  ;;  %v3268_v43 = vor.u32 %v3664_v62, %v3267_v19  ;;  %v3662_v19 = vld [vmem:[#allocation4 + $0x284] sm:$0xf0]  ;;  %v3844_v62 = vpop.eup %3843  ;;  %v3371_v61 = vld [vmem:[#allocation4 + $0x360] sm:$0xf] }
  0xfe   :  { %v723_v13 = vmin.f32 %v4638_v6, 0.0  ;;  %v724_v5 = vmin.f32 %v4641_v40, 0.0  ;;  %v3380_v16 = vor.u32 %v3692_v52, %v3379_v63  ;;  %v3444_v11 = vor.u32 %v3708_v7, %v3443_v53  ;;  %v3690_v53 = vld [vmem:[#allocation4 + $0x364] sm:$0xf0] }
  0xff   :  { %5550 = vst [vmem:[#allocation13_spill] sm:$0xff] %v4656_v21  ;;  %v4668_v27 = vperm.slane %v3927_v30, 6  ;;  %3847 = vpow2.f32 %v863_v42  ;;  %v678_v15 = vmin.f32 %v4644_v38, 0.0  ;;  %1999 = vmatpush.bf16.msrb.mxu0 %v3204_v20  ;;  %v974_v63 = vsel %vm574_vm4, %v4531_v33, %v4618_v49  ;;  %2033 = vmatpush.bf16.msrb.mxu1 %v3268_v43  ;;  %v3435_v49 = vld [vmem:[#allocation4 + $0x3e0] sm:$0xf] }
 0x100   :  { %5551 = vst [vmem:[#allocation14_spill] sm:$0xff] %v4662_v36  ;;  %v877_v14 = vmul.f32 1.442695, %v723_v13  ;;  %1948 = vmatmul.bf16.gmra.mxu2 %v4656_v21  ;;  %v879_v18 = vmul.f32 1.442695, %v724_v5  ;;  %1982 = vmatmul.bf16.gmra.mxu3 %v4662_v36  ;;  %v4680_v52 = vperm.slane %v3927_v30, 7  ;;  %v3196_v1 = vor.u32 %v3646_v28, %v3195_v25  ;;  %v3846_v13 = vpop.eup %3845 }
 0x101   :  { %2061 = vmatpush.bf16.msra.mxu2 %v3380_v16  ;;  %v981_v42 = vsel %vm581_vm7, %v4555_v8, %v2869_v37  ;;  %v982_v22 = vsel %vm582_vm8, %v4558_v26, %v2870_v29  ;;  %v771_v34 = vmul.f32 1.442695, %v670_v32  ;;  %2095 = vmatpush.bf16.msra.mxu3 %v3444_v11  ;;  %v3706_v7 = vld [vmem:[#allocation4 + $0x3e4] sm:$0xf0]  ;;  %v785_v31 = vmul.f32 1.442695, %v677_v0 }
 0x102   :  { %3849 = vpow2.f32 %v877_v14  ;;  %v4692_v20 = vadd.f32 %v410_v50, %v4495_v44  ;;  %v3363_v8 = vld [vmem:[#allocation4 + $0x350] sm:$0xf]  ;;  %v3688_v37 = vld [vmem:[#allocation4 + $0x354] sm:$0xf0]  ;;  %v787_v26 = vmul.f32 1.442695, %v678_v15  ;;  %v3260_v29 = vor.u32 %v3662_v19, %v3259_v47 }
 0x103   :  { %3851 = vpow2.f32 %v879_v18  ;;  %v492_v33 = vpop.f32.mrf.mxu2  ;;  %v539_v14 = vpop.f32.mrf.mxu3  ;;  %2000 = vmatpush.bf16.msrb.mxu0 %v3196_v1  ;;  %v3372_v32 = vor.u32 %v3690_v53, %v3371_v61  ;;  %v4694_v28 = vpack.c.bf16 %v981_v42, %v973_v10  ;;  %v4696_v16 = vpack.c.bf16 %v982_v22, %v974_v63  ;;  %v3427_v11 = vld [vmem:[#allocation4 + $0x3d0] sm:$0xf]  ;;  %v3704_v50 = vld [vmem:[#allocation4 + $0x3d4] sm:$0xf0]  ;;  %v3355_v15 = vld [vmem:[#allocation4 + $0x340] sm:$0xf] }
 0x104   :  { %v4689_v5 = vadd.f32 %v492_v33, %v4668_v27  ;;  %v413_v43 = vpop.f32.mrf.mxu0  ;;  %v4700_v0 = vadd.f32 %v539_v14, %v4680_v52  ;;  %3853 = vpow2.f32 %v771_v34  ;;  %2034 = vmatpush.bf16.msrb.mxu1 %v3260_v29  ;;  %v3436_v18 = vor.u32 %v3706_v7, %v3435_v49  ;;  %v3686_v61 = vld [vmem:[#allocation4 + $0x344] sm:$0xf0]  ;;  %v3419_v34 = vld [vmem:[#allocation4 + $0x3c0] sm:$0xf] }
 0x105   :  { %v460_v25 = vpop.f32.mrf.mxu1  ;;  %5552 = vst [vmem:[#allocation15_spill] sm:$0xff] %v4694_v28  ;;  %v3848_v30 = vpop.eup %3847  ;;  %2062 = vmatpush.bf16.msra.mxu2 %v3372_v32  ;;  %v3364_v47 = vor.u32 %v3688_v37, %v3363_v8  ;;  %v4703_v19 = vadd.f32 -1.0, %v3844_v62  ;;  %3855 = vpow2.f32 %v785_v31  ;;  %v685_v1 = vmin.f32 %v4692_v20, 0.0  ;;  %v3702_v7 = vld [vmem:[#allocation4 + $0x3c4] sm:$0xf0] }
 0x106   :  { %5553 = vst [vmem:[#allocation16_spill] sm:$0xff] %v4696_v16  ;;  %v655_v63 = vmin.f32 %v4689_v5, 0.0  ;;  %vm643_vm11 = vcmp.gt.f32.partialorder %v4638_v6, 0.0  ;;  %3857 = vpow2.f32 %v787_v26  ;;  %2096 = vmatpush.bf16.msra.mxu3 %v3436_v18  ;;  %v3428_v22 = vor.u32 %v3704_v50, %v3427_v11  ;;  %v3339_v36 = vld [vmem:[#allocation4 + $0x320] sm:$0xf] }
 0x107   :  { %v2923_v33 = vadd.f32 -1.0, %v3846_v13  ;;  %v656_v49 = vmin.f32 %v4700_v0, 0.0  ;;  %v4711_v62 = vadd.f32 %v4646_v56, %v4508_v2  ;;  %v2924_v31 = vadd.f32 -1.0, %v3848_v30 }
 0x108   :  { %v3850_v10 = vpop.eup %3849  ;;  %2001 = vmatmul.bf16.vlgmr.msrb.gmra.mxu0 %v4694_v28  ;;  %vm644_vm13 = vcmp.gt.f32.partialorder %v4641_v40, 0.0  ;;  %v4717_v13 = vadd.f32 %v413_v43, %v4495_v44  ;;  %v3356_v26 = vor.u32 %v3686_v61, %v3355_v15  ;;  %v741_v29 = vmul.f32 1.442695, %v655_v63  ;;  %v3347_v63 = vld [vmem:[#allocation4 + $0x330] sm:$0xf] }
 0x109   :  { %v3852_v53 = vpop.eup %3851  ;;  %v2931_v42 = vadd.f32 -1.0, %v3850_v10  ;;  %2063 = vmatpush.bf16.msra.mxu2 %v3364_v47  ;;  %v801_v32 = vmul.f32 1.442695, %v685_v1  ;;  %v4728_v43 = vadd.f32 %v460_v25, %v4508_v2  ;;  %v3420_v47 = vor.u32 %v3702_v7, %v3419_v34  ;;  %v3684_v1 = vld [vmem:[#allocation4 + $0x334] sm:$0xf0] }
 0x10a   :  { %v2932_v14 = vadd.f32 -1.0, %v3852_v53  ;;  %2035 = vmatmul.bf16.vlgmr.msrb.gmra.mxu1 %v4696_v16  ;;  %v3854_v18 = vpop.eup %3853  ;;  %2097 = vmatpush.bf16.msra.mxu3 %v3428_v22  ;;  %v3411_v61 = vld [vmem:[#allocation4 + $0x3b0] sm:$0xf]  ;;  %v1035_v25 = vsel %vm635_vm9, %v4605_v23, %v2923_v33  ;;  %v3700_v34 = vld [vmem:[#allocation4 + $0x3b4] sm:$0xf0]  ;;  %v3348_v28 = vor.u32 %v3684_v1, %v3347_v63  ;;  %vm575_vm1 = vcmp.gt.f32.partialorder %v4689_v5, 0.0 }
 0x10b   :  { %v495_v8 = vpop.f32.mrf.mxu2  ;;  %v542_v37 = vpop.f32.mrf.mxu3  ;;  %v1043_v15 = vsel %vm643_vm11, %v4638_v6, %v2931_v42  ;;  %v693_v42 = vmin.f32 %v4717_v13, 0.0  ;;  %3859 = vpow2.f32 %v801_v32  ;;  %v3682_v23 = vld [vmem:[#allocation4 + $0x324] sm:$0xf0]  ;;  %v694_v21 = vmin.f32 %v4728_v43, 0.0 }
 0x10c   :  { %v4721_v56 = vadd.f32 %v495_v8, %v4668_v27  ;;  %v4724_v11 = vadd.f32 %v542_v37, %v4680_v52  ;;  %v416_v50 = vpop.f32.mrf.mxu0  ;;  %v1044_v10 = vsel %vm644_vm13, %v4641_v40, %v2932_v14  ;;  %v3856_v53 = vpop.eup %3855  ;;  %v743_v8 = vmul.f32 1.442695, %v656_v49  ;;  %v3698_v32 = vld [vmem:[#allocation4 + $0x3a4] sm:$0xf0] }
 0x10d   :  { %v463_v30 = vpop.f32.mrf.mxu1  ;;  %v686_v37 = vmin.f32 %v4711_v62, 0.0  ;;  %v3858_v7 = vpop.eup %3857  ;;  %2064 = vmatpush.bf16.msra.mxu2 %v3356_v26  ;;  %v4743_v40 = vpack.c.bf16 %v1043_v15, %v1035_v25  ;;  %v1036_v14 = vsel %vm636_vm10, %v4609_v39, %v2924_v31  ;;  %3861 = vpow2.f32 %v741_v29  ;;  %v3403_v31 = vld [vmem:[#allocation4 + $0x3a0] sm:$0xf] }
 0x10e   :  { %v663_v22 = vmin.f32 %v4721_v56, 0.0  ;;  %v664_v6 = vmin.f32 %v4724_v11, 0.0  ;;  %v4748_v16 = vpack.c.bf16 %v1044_v10, %v1036_v14  ;;  %2098 = vmatpush.bf16.msra.mxu3 %v3420_v47  ;;  %v3412_v26 = vor.u32 %v3700_v34, %v3411_v61 }
 0x10f   :  { %5554 = vst [vmem:[#allocation17_spill] sm:$0xff] %v4743_v40  ;;  %v803_v15 = vmul.f32 1.442695, %v686_v37  ;;  %v4754_v39 = vadd.f32 %v416_v50, %v4495_v44  ;;  %v2878_v10 = vadd.f32 -1.0, %v3854_v18  ;;  %v817_v63 = vmul.f32 1.442695, %v693_v42 }
 0x110   :  { %v757_v49 = vmul.f32 1.442695, %v663_v22  ;;  %5555 = vst [vmem:[#allocation18_spill] sm:$0xff] %v4748_v16  ;;  %v759_v33 = vmul.f32 1.442695, %v664_v6  ;;  %1953 = vmatmul.bf16.gmra.mxu2 %v4743_v40  ;;  %1987 = vmatmul.bf16.gmra.mxu3 %v4748_v16  ;;  %v3340_v22 = vor.u32 %v3682_v23, %v3339_v36  ;;  %v2885_v47 = vadd.f32 -1.0, %v3856_v53 }
 0x111   :  { %2065 = vmatpush.bf16.msra.mxu2 %v3348_v28  ;;  %v2886_v25 = vadd.f32 -1.0, %v3858_v7  ;;  %v4757_v61 = vadd.f32 %v463_v30, %v4508_v2  ;;  %v819_v50 = vmul.f32 1.442695, %v694_v21  ;;  %v3404_v37 = vor.u32 %v3698_v32, %v3403_v31  ;;  %v3331_v7 = vld [vmem:[#allocation4 + $0x310] sm:$0xf] }
 0x112   :  { %3863 = vpow2.f32 %v757_v49  ;;  %2099 = vmatpush.bf16.msra.mxu3 %v3412_v26  ;;  %v701_v28 = vmin.f32 %v4754_v39, 0.0  ;;  %v989_v36 = vsel %vm589_vm12, %v4601_v45, %v4703_v19  ;;  %v3680_v6 = vld [vmem:[#allocation4 + $0x314] sm:$0xf0]  ;;  %v997_v49 = vsel %vm597_vm15, %v4629_v54, %v2885_v47  ;;  %v3395_v23 = vld [vmem:[#allocation4 + $0x390] sm:$0xf] }
 0x113   :  { %3865 = vpow2.f32 %v743_v8  ;;  %v498_v29 = vpop.f32.mrf.mxu2  ;;  %v545_v1 = vpop.f32.mrf.mxu3  ;;  %v702_v14 = vmin.f32 %v4757_v61, 0.0  ;;  %v990_v45 = vsel %vm590_vm14, %v4621_v58, %v2878_v10  ;;  %v998_v19 = vsel %vm598_vm0, %v4644_v38, %v2886_v25  ;;  %v3323_v25 = vld [vmem:[#allocation4 + $0x300] sm:$0xf]  ;;  %v3625_v16 = vld [vmem:[#allocation4 + $0x164] sm:$0xf] }
 0x114   :  { %3867 = vpow2.f32 %v759_v33  ;;  %v419_v18 = vpop.f32.mrf.mxu0  ;;  %v3860_v8 = vpop.eup %3859  ;;  %v4767_v34 = vadd.f32 %v498_v29, %v4668_v27  ;;  %v4770_v21 = vadd.f32 %v545_v1, %v4680_v52  ;;  %v3696_v33 = vld [vmem:[#allocation4 + $0x394] sm:$0xf0]  ;;  %v4785_v31 = vpack.c.bf16 %v997_v49, %v989_v36  ;;  %v3678_v36 = vld [vmem:[#allocation4 + $0x304] sm:$0xf0]  ;;  %v3117_v40 = vld [vmem:[#allocation4 + $0x168] sm:$0xf0] }
 0x115   :  { %3869 = vpow2.f32 %v803_v15  ;;  %v466_v53 = vpop.f32.mrf.mxu1  ;;  %v3862_v30 = vpop.eup %3861  ;;  %2066 = vmatpush.bf16.msra.mxu2 %v3340_v22  ;;  %v4783_v15 = vadd.f32 -1.0, %v3860_v8  ;;  %vm576_vm2 = vcmp.gt.f32.partialorder %v4700_v0, 0.0  ;;  %v833_v58 = vmul.f32 1.442695, %v701_v28 }
 0x116   :  { %3871 = vpow2.f32 %v817_v63  ;;  %2100 = vmatpush.bf16.msra.mxu3 %v3404_v37  ;;  %5556 = vst [vmem:[#allocation19_spill] sm:$0xff] %v4785_v31  ;;  %v2863_v32 = vadd.f32 -1.0, %v3862_v30  ;;  %v4788_v10 = vpack.c.bf16 %v998_v19, %v990_v45  ;;  %v3332_v63 = vor.u32 %v3680_v6, %v3331_v7 }
 0x117   :  { %3873 = vpow2.f32 %v819_v50  ;;  %vm605_vm3 = vcmp.gt.f32.partialorder %v4692_v20, 0.0  ;;  %vm583_vm4 = vcmp.gt.f32.partialorder %v4721_v56, 0.0  ;;  %vm613_vm5 = vcmp.gt.f32.partialorder %v4717_v13, 0.0 }
 0x118   :  { %v3864_v42 = vpop.eup %3863  ;;  %5557 = vst [vmem:[#allocation20_spill] sm:$0xff] %v4788_v10  ;;  %v671_v29 = vmin.f32 %v4767_v34, 0.0  ;;  %2006 = vmatmul.bf16.gmra.mxu0 %v4785_v31  ;;  %v3396_v1 = vor.u32 %v3696_v33, %v3395_v23  ;;  %vm606_vm6 = vcmp.gt.f32.partialorder %v4711_v62, 0.0  ;;  %vm584_vm7 = vcmp.gt.f32.partialorder %v4724_v11, 0.0  ;;  %v3387_v23 = vld [vmem:[#allocation4 + $0x380] sm:$0xf] }
 0x119   :  { %v3866_v26 = vpop.eup %3865  ;;  %v2871_v38 = vadd.f32 -1.0, %v3864_v42  ;;  %vm614_vm8 = vcmp.gt.f32.partialorder %v4728_v43, 0.0  ;;  %v672_v37 = vmin.f32 %v4770_v21, 0.0  ;;  %v835_v8 = vmul.f32 1.442695, %v702_v14  ;;  %2067 = vmatpush.bf16.msra.mxu2 %v3332_v63 }
 0x11a   :  { %v3868_v54 = vpop.eup %3867  ;;  %2040 = vmatmul.bf16.gmra.mxu1 %v4788_v10  ;;  %v2864_v7 = vadd.f32 -1.0, %v3866_v26  ;;  %2101 = vmatpush.bf16.msra.mxu3 %v3396_v1  ;;  %v4807_v49 = vadd.f32 %v419_v18, %v4495_v44  ;;  %v975_v14 = vsel %vm575_vm1, %v4689_v5, %v2863_v32  ;;  %3875 = vpow2.f32 %v833_v58  ;;  %v3694_v33 = vld [vmem:[#allocation4 + $0x384] sm:$0xf0] }
 0x11b   :  { %v501_v22 = vpop.f32.mrf.mxu2  ;;  %v548_v47 = vpop.f32.mrf.mxu3  ;;  %v2872_v6 = vadd.f32 -1.0, %v3868_v54  ;;  %v4814_v19 = vadd.f32 %v466_v53, %v4508_v2  ;;  %v983_v54 = vsel %vm583_vm4, %v4721_v56, %v2871_v38  ;;  %v773_v63 = vmul.f32 1.442695, %v671_v29 }
 0x11c   :  { %v3870_v50 = vpop.eup %3869  ;;  %v4801_v28 = vadd.f32 %v501_v22, %v4668_v27  ;;  %v4804_v42 = vadd.f32 %v548_v47, %v4680_v52  ;;  %v3324_v1 = vor.u32 %v3678_v36, %v3323_v25  ;;  %v422_v22 = vpop.f32.mrf.mxu0  ;;  %v775_v47 = vmul.f32 1.442695, %v672_v37 }
 0x11d   :  { %v3872_v30 = vpop.eup %3871  ;;  %3877 = vpow2.f32 %v835_v8  ;;  %v710_v32 = vmin.f32 %v4814_v19, 0.0  ;;  %v469_v58 = vpop.f32.mrf.mxu1  ;;  %v984_v53 = vsel %vm584_vm7, %v4724_v11, %v2872_v6  ;;  %v709_v31 = vmin.f32 %v4807_v49, 0.0 }
 0x11e   :  { %v679_v45 = vmin.f32 %v4801_v28, 0.0  ;;  %v3874_v26 = vpop.eup %3873  ;;  %v680_v18 = vmin.f32 %v4804_v42, 0.0  ;;  %2068 = vmatpush.bf16.msra.mxu2 %v3324_v1  ;;  %v3388_v56 = vor.u32 %v3694_v33, %v3387_v23  ;;  %v2894_v38 = vadd.f32 -1.0, %v3870_v50 }
 0x11f   :  { %v4825_v29 = vpack.c.bf16 %v983_v54, %v975_v14  ;;  %v2901_v25 = vadd.f32 -1.0, %v3872_v30  ;;  %v976_v37 = vsel %vm576_vm2, %v4700_v0, %v2864_v7  ;;  %v2902_v8 = vadd.f32 -1.0, %v3874_v26 }
 0x120   :  { %v789_v5 = vmul.f32 1.442695, %v679_v45  ;;  %v791_v10 = vmul.f32 1.442695, %v680_v18  ;;  %2102 = vmatpush.bf16.msra.mxu3 %v3388_v56  ;;  %v4831_v11 = vadd.f32 %v422_v22, %v4495_v44  ;;  %v3876_v6 = vpop.eup %3875  ;;  %v4833_v18 = vpack.c.bf16 %v984_v53, %v976_v37 }
 0x121   :  { %5558 = vst [vmem:[#allocation21_spill] sm:$0xff] %v4825_v29  ;;  %v851_v50 = vmul.f32 1.442695, %v710_v32  ;;  %2069 = vmatmul.bf16.vlgmr.msra.gmra.mxu2 %v4825_v29  ;;  %v849_v0 = vmul.f32 1.442695, %v709_v31  ;;  %v1005_v23 = vsel %vm605_vm3, %v4692_v20, %v4783_v15  ;;  %v4852_v26 = vadd.f32 %v469_v58, %v4508_v2 }
 0x122   :  { %3879 = vpow2.f32 %v789_v5  ;;  %5559 = vst [vmem:[#allocation22_spill] sm:$0xff] %v4833_v18  ;;  %v717_v33 = vmin.f32 %v4831_v11, 0.0  ;;  %v1006_v31 = vsel %vm606_vm6, %v4711_v62, %v2894_v38  ;;  %v1014_v54 = vsel %vm614_vm8, %v4728_v43, %v2902_v8 }
 0x123   :  { %3881 = vpow2.f32 %v773_v63  ;;  %v504_v36 = vpop.f32.mrf.mxu2  ;;  %v551_v45 = vpop.f32.mrf.mxu3  ;;  %2103 = vmatmul.bf16.vlgmr.msra.gmra.mxu3 %v4833_v18  ;;  %v4861_v15 = vpack.c.bf16 %v1014_v54, %v1006_v31  ;;  %vm591_vm9 = vcmp.gt.f32.partialorder %v4767_v34, 0.0  ;;  %vm592_vm10 = vcmp.gt.f32.partialorder %v4770_v21, 0.0 }
 0x124   :  { %3883 = vpow2.f32 %v791_v10  ;;  %v4837_v30 = vadd.f32 %v504_v36, %v4668_v27  ;;  %v4840_v7 = vadd.f32 %v551_v45, %v4680_v52  ;;  %v3878_v14 = vpop.eup %3877  ;;  %v1013_v10 = vsel %vm613_vm5, %v4717_v13, %v2901_v25 }
 0x125   :  { %3885 = vpow2.f32 %v775_v47  ;;  %5560 = vst [vmem:[#allocation23_spill] sm:$0xff] %v4861_v15  ;;  %v4865_v22 = vpack.c.bf16 %v1013_v10, %v1005_v23  ;;  %v425_v47 = vpop.f32.mrf.mxu0  ;;  %v4868_v5 = vadd.f32 -1.0, %v3876_v6  ;;  %vm622_vm11 = vcmp.gt.f32.partialorder %v4757_v61, 0.0  ;;  %v472_v32 = vpop.f32.mrf.mxu1 }
 0x126   :  { %3887 = vpow2.f32 %v851_v50  ;;  %v687_v20 = vmin.f32 %v4837_v30, 0.0  ;;  %v688_v1 = vmin.f32 %v4840_v7, 0.0  ;;  %vm599_vm12 = vcmp.gt.f32.partialorder %v4801_v28, 0.0 }
 0x127   :  { %3889 = vpow2.f32 %v849_v0  ;;  %5561 = vst [vmem:[#allocation24_spill] sm:$0xff] %v4865_v22  ;;  %vm600_vm13 = vcmp.gt.f32.partialorder %v4804_v42, 0.0  ;;  %v4874_v43 = vadd.f32 %v425_v47, %v4495_v44  ;;  %vm621_vm14 = vcmp.gt.f32.partialorder %v4754_v39, 0.0 }
 0x128   :  { %v3880_v63 = vpop.eup %3879  ;;  %v2910_v53 = vadd.f32 -1.0, %v3878_v14  ;;  %v865_v38 = vmul.f32 1.442695, %v717_v33  ;;  %v718_v25 = vmin.f32 %v4852_v26, 0.0  ;;  %2011 = vmatmul.bf16.gmra.mxu0 %v4865_v22  ;;  %v805_v36 = vmul.f32 1.442695, %v687_v20 }
 0x129   :  { %v3882_v13 = vpop.eup %3881  ;;  %v2887_v56 = vadd.f32 -1.0, %v3880_v63  ;;  %v4887_v6 = vadd.f32 %v472_v32, %v4508_v2  ;;  %vm630_vm15 = vcmp.gt.f32.partialorder %v4814_v19, 0.0  ;;  %v807_v14 = vmul.f32 1.442695, %v688_v1  ;;  %v3595_v63 = vld [vmem:[#allocation4 + $0x74] sm:$0xf] }
 0x12a   :  { %v3884_v62 = vpop.eup %3883  ;;  %2045 = vmatmul.bf16.gmra.mxu1 %v4861_v15  ;;  %v2879_v50 = vadd.f32 -1.0, %v3882_v13  ;;  %v725_v54 = vmin.f32 %v4874_v43, 0.0  ;;  %3891 = vpow2.f32 %v865_v38  ;;  %v867_v47 = vmul.f32 1.442695, %v718_v25  ;;  %v2997_v13 = vld [vmem:[#allocation4 + $0x78] sm:$0xf0] }
 0x12b   :  { %v3886_v58 = vpop.eup %3885  ;;  %v507_v37 = vpop.f32.mrf.mxu2  ;;  %v2888_v0 = vadd.f32 -1.0, %v3884_v62  ;;  %v999_v2 = vsel %vm599_vm12, %v4801_v28, %v2887_v56  ;;  %v3611_v62 = vld [vmem:[#allocation4 + $0xf4] sm:$0xf]  ;;  %3893 = vpow2.f32 %v805_v36  ;;  %v3061_v25 = vld [vmem:[#allocation4 + $0xf8] sm:$0xf0]  ;;  %vm629_vm0 = vcmp.gt.f32.partialorder %v4807_v49, 0.0 }
 0x12c   :  { %v554_v8 = vpop.f32.mrf.mxu3  ;;  %v4881_v45 = vadd.f32 %v507_v37, %v4668_v27  ;;  %v3888_v23 = vpop.eup %3887  ;;  %v2880_v10 = vadd.f32 -1.0, %v3886_v58  ;;  %v726_v58 = vmin.f32 %v4887_v6, 0.0  ;;  %3895 = vpow2.f32 %v807_v14  ;;  %v3593_v15 = vld [vmem:[#allocation4 + $0x64] sm:$0xf] }
 0x12d   :  { %v4884_v44 = vadd.f32 %v554_v8, %v4680_v52  ;;  %v3890_v20 = vpop.eup %3889  ;;  %v2918_v37 = vadd.f32 -1.0, %v3888_v23  ;;  %v991_v8 = vsel %vm591_vm9, %v4767_v34, %v2879_v50  ;;  %v1000_v38 = vsel %vm600_vm13, %v4804_v42, %v2888_v0  ;;  %v3053_v42 = vld [vmem:[#allocation4 + $0xe8] sm:$0xf0] }
 0x12e   :  { %v695_v33 = vmin.f32 %v4881_v45, 0.0  ;;  %v2917_v28 = vadd.f32 -1.0, %v3890_v20  ;;  %v881_v56 = vmul.f32 1.442695, %v725_v54  ;;  %v4903_v36 = vpack.c.bf16 %v999_v2, %v991_v8 }
 0x12f   :  { %v696_v31 = vmin.f32 %v4884_v44, 0.0  ;;  %v992_v14 = vsel %vm592_vm10, %v4770_v21, %v2880_v10  ;;  %v3000_v23 = vor.u32 %v3595_v63, %v2997_v13  ;;  %v883_v0 = vmul.f32 1.442695, %v726_v58  ;;  %v2981_v58 = vld [vmem:[#allocation4 + $0x58] sm:$0xf0] }
 0x130   :  { %v821_v1 = vmul.f32 1.442695, %v695_v33  ;;  %5562 = vst [vmem:[#allocation25_spill] sm:$0xff] %v4903_v36  ;;  %v2989_v33 = vld [vmem:[#allocation4 + $0x68] sm:$0xf0]  ;;  %v4910_v54 = vpack.c.bf16 %v1000_v38, %v992_v14  ;;  %v3892_v8 = vpop.eup %3891  ;;  %v1022_v21 = vsel %vm622_vm11, %v4757_v61, %v2910_v53  ;;  %v1030_v10 = vsel %vm630_vm15, %v4814_v19, %v2918_v37 }
 0x131   :  { %v823_v32 = vmul.f32 1.442695, %v696_v31  ;;  %v3609_v31 = vld [vmem:[#allocation4 + $0xe4] sm:$0xf]  ;;  %2074 = vmatmul.bf16.gmra.mxu2 %v4903_v36  ;;  %2129 = vmatpush.bf16.msra.mxu0 %v3000_v23  ;;  %v2992_v63 = vor.u32 %v3593_v15, %v2989_v33  ;;  %v3894_v13 = vpop.eup %3893  ;;  %v3591_v53 = vld [vmem:[#allocation4 + $0x54] sm:$0xf] }
 0x132   :  { %3897 = vpow2.f32 %v821_v1  ;;  %5563 = vst [vmem:[#allocation26_spill] sm:$0xff] %v4910_v54  ;;  %v3064_v1 = vor.u32 %v3611_v62, %v3061_v25  ;;  %v1021_v62 = vsel %vm621_vm14, %v4754_v39, %v4868_v5  ;;  %v3056_v61 = vor.u32 %v3609_v31, %v3053_v42  ;;  %v3896_v19 = vpop.eup %3895  ;;  %v3607_v37 = vld [vmem:[#allocation4 + $0xd4] sm:$0xf]  ;;  %v3045_v38 = vld [vmem:[#allocation4 + $0xd8] sm:$0xf0] }
 0x133   :  { %3899 = vpow2.f32 %v867_v47  ;;  %v510_v34 = vpop.f32.mrf.mxu2  ;;  %v1866_v20 = vpop.f32.mrf.mxu0  ;;  %2108 = vmatmul.bf16.gmra.mxu3 %v4910_v54  ;;  %vm607_vm1 = vcmp.gt.f32.partialorder %v4837_v30, 0.0  ;;  %vm637_vm2 = vcmp.gt.f32.partialorder %v4831_v11, 0.0  ;;  %v4933_v39 = vpack.c.bf16 %v1030_v10, %v1022_v21  ;;  %v3589_v33 = vld [vmem:[#allocation4 + $0x44] sm:$0xf]  ;;  %v2973_v23 = vld [vmem:[#allocation4 + $0x48] sm:$0xf0] }
 0x134   :  { %v557_v50 = vpop.f32.mrf.mxu3  ;;  %3901 = vpow2.f32 %v823_v32  ;;  %v1900_v2 = vpop.f32.mrf.mxu1  ;;  %v1029_v32 = vsel %vm629_vm0, %v4807_v49, %v2917_v28  ;;  %2163 = vmatpush.bf16.msra.mxu1 %v3064_v1  ;;  %v4929_v15 = vadd.f32 %v510_v34, %v4668_v27  ;;  %vm638_vm3 = vcmp.gt.f32.partialorder %v4852_v26, 0.0  ;;  %v3605_v31 = vld [vmem:[#allocation4 + $0xc4] sm:$0xf]  ;;  %v3037_v21 = vld [vmem:[#allocation4 + $0xc8] sm:$0xf0] }
 0x135   :  { %v4912_v47 = vadd.f32 %v1900_v2, %v1866_v20  ;;  %3903 = vpow2.f32 %v881_v56  ;;  %5564 = vst [vmem:[#allocation27_spill] sm:$0xff] %v4933_v39  ;;  %vm645_vm4 = vcmp.gt.f32.partialorder %v4874_v43, 0.0  ;;  %v4938_v49 = vadd.f32 %v557_v50, %v4680_v52  ;;  %2130 = vmatpush.bf16.msra.mxu0 %v2992_v63  ;;  %v3643_v54 = vld [vmem:[#allocation4 + $0x1f4] sm:$0xf]  ;;  %v3189_v36 = vld [vmem:[#allocation4 + $0x1f8] sm:$0xf0] }
 0x136   :  { %3905 = vpow2.f32 %v883_v0  ;;  %v4940_v28 = vpack.c.bf16 %v1029_v32, %v1021_v62  ;;  %v2984_v56 = vor.u32 %v3591_v53, %v2981_v58  ;;  %vm608_vm5 = vcmp.gt.f32.partialorder %v4840_v7, 0.0  ;;  %v4959_v53 = vld [vmem:[#allocation4 + $0x34] sm:$0xf]  ;;  %v2965_v58 = vld [vmem:[#allocation4 + $0x38] sm:$0xf0] }
 0x137   :  { %vm615_vm6 = vcmp.gt.f32.partialorder %v4881_v45, 0.0  ;;  %vm616_vm7 = vcmp.gt.f32.partialorder %v4884_v44, 0.0  ;;  %vm646_vm8 = vcmp.gt.f32.partialorder %v4887_v6, 0.0  ;;  %v3048_v34 = vor.u32 %v3607_v37, %v3045_v38  ;;  %v3627_v37 = vld [vmem:[#allocation4 + $0x174] sm:$0xf] }
 0x138   :  { %v3898_v25 = vpop.eup %3897  ;;  %5565 = vst [vmem:[#allocation28_spill] sm:$0xff] %v4940_v28  ;;  %2164 = vmatpush.bf16.msra.mxu1 %v3056_v61  ;;  %v2895_v50 = vadd.f32 -1.0, %v3894_v13  ;;  %v4946_v42 = vadd.f32 -1.0, %v3892_v8  ;;  %v703_v20 = vmin.f32 %v4929_v15, 0.0  ;;  %2016 = vmatmul.bf16.gmra.mxu0 %v4940_v28  ;;  %v2896_v63 = vadd.f32 -1.0, %v3896_v19 }
 0x139   :  { %v3900_v5 = vpop.eup %3899  ;;  %v2903_v0 = vadd.f32 -1.0, %v3898_v25  ;;  %v3125_v38 = vld [vmem:[#allocation4 + $0x178] sm:$0xf0]  ;;  %v704_v19 = vmin.f32 %v4938_v49, 0.0  ;;  %2131 = vmatpush.bf16.msra.mxu0 %v2984_v56  ;;  %v3603_v28 = vld [vmem:[#allocation4 + $0xb4] sm:$0xf]  ;;  %v3040_v29 = vor.u32 %v3605_v31, %v3037_v21  ;;  %v3192_v57 = vor.u32 %v3643_v54, %v3189_v36 }
 0x13a   :  { %v3902_v14 = vpop.eup %3901  ;;  %v4950_v62 = vadd.f32 -1.0, %v3900_v5  ;;  %2050 = vmatmul.bf16.gmra.mxu1 %v4933_v39  ;;  %v2976_v39 = vor.u32 %v3589_v33, %v2973_v23  ;;  %v837_v24 = vmul.f32 1.442695, %v703_v20  ;;  %v3128_v33 = vor.u32 %v3627_v37, %v3125_v38  ;;  %v3641_v23 = vld [vmem:[#allocation4 + $0x1e4] sm:$0xf] }
 0x13b   :  { %v513_v2 = vpop.f32.mrf.mxu2  ;;  %v3904_v10 = vpop.eup %3903  ;;  %v2904_v25 = vadd.f32 -1.0, %v3902_v14  ;;  %v1015_v56 = vsel %vm615_vm6, %v4881_v45, %v2903_v0  ;;  %v1007_v60 = vsel %vm607_vm1, %v4837_v30, %v2895_v50  ;;  %v2968_v20 = vor.u32 %v4959_v53, %v2965_v58  ;;  %v3585_v21 = vld [vmem:[#allocation4 + $0x24] sm:$0xf]  ;;  %v2957_v45 = vld [vmem:[#allocation4 + $0x28] sm:$0xf0]  ;;  %2231 = vmatpush.bf16.msrb.mxu3 %v3192_v57 }
 0x13c   :  { %v560_v1 = vpop.f32.mrf.mxu3  ;;  %v4954_v32 = vadd.f32 %v513_v2, %v4668_v27  ;;  %v1868_v13 = vpop.f32.mrf.mxu0  ;;  %v3029_v2 = vld [vmem:[#allocation4 + $0xb8] sm:$0xf0]  ;;  %2165 = vmatpush.bf16.msra.mxu1 %v3048_v34  ;;  %v2933_v14 = vadd.f32 -1.0, %v3904_v10  ;;  %2197 = vmatpush.bf16.msrb.mxu2 %v3128_v33  ;;  %v3120_v0 = vor.u32 %v3625_v16, %v3117_v40  ;;  %v3623_v36 = vld [vmem:[#allocation4 + $0x154] sm:$0xf]  ;;  %v1037_v16 = vsel %vm637_vm2, %v4831_v11, %v4946_v42 }
 0x13d   :  { %v4957_v8 = vadd.f32 %v560_v1, %v4680_v52  ;;  %v1902_v61 = vpop.f32.mrf.mxu1  ;;  %v3906_v1 = vpop.eup %3905  ;;  %v1016_v31 = vsel %vm616_vm7, %v4884_v44, %v2904_v25  ;;  %2132 = vmatpush.bf16.msra.mxu0 %v2976_v39  ;;  %v3032_v30 = vor.u32 %v3603_v28, %v3029_v2  ;;  %v3109_v54 = vld [vmem:[#allocation4 + $0x158] sm:$0xf0]  ;;  %v1008_v44 = vsel %vm608_vm5, %v4840_v7, %v2896_v63  ;;  %v3601_v40 = vld [vmem:[#allocation4 + $0xa4] sm:$0xf]  ;;  %v3639_v7 = vld [vmem:[#allocation4 + $0x1d4] sm:$0xf] }
 0x13e   :  { %v4962_v5 = vadd.f32 %v1902_v61, %v1868_v13  ;;  %v711_v22 = vmin.f32 %v4954_v32, 0.0  ;;  %v2934_v34 = vadd.f32 -1.0, %v3906_v1  ;;  %v3184_v10 = vor.u32 %v3641_v23, %v3181_v55  ;;  %v3173_v28 = vld [vmem:[#allocation4 + $0x1d8] sm:$0xf0]  ;;  %v3583_v42 = vld [vmem:[#allocation4 + $0x14] sm:$0xf] }
 0x13f   :  { %v712_v18 = vmin.f32 %v4957_v8, 0.0  ;;  %v4986_v57 = vpack.c.bf16 %v1016_v31, %v1008_v44  ;;  %v2960_v11 = vor.u32 %v3585_v21, %v2957_v45  ;;  %v3112_v63 = vor.u32 %v3623_v36, %v3109_v54  ;;  %v2949_v58 = vld [vmem:[#allocation4 + $0x18] sm:$0xf0]  ;;  %v3621_v37 = vld [vmem:[#allocation4 + $0x144] sm:$0xf] }
 0x140   :  { %v853_v13 = vmul.f32 1.442695, %v711_v22  ;;  %v839_v22 = vmul.f32 1.442695, %v704_v19  ;;  %2166 = vmatpush.bf16.msra.mxu1 %v3040_v29  ;;  %v1038_v29 = vsel %vm638_vm3, %v4852_v26, %v4950_v62  ;;  %v1046_v55 = vsel %vm646_vm8, %v4887_v6, %v2934_v34  ;;  %2198 = vmatpush.bf16.msrb.mxu2 %v3120_v0  ;;  %v3101_v26 = vld [vmem:[#allocation4 + $0x148] sm:$0xf0] }
 0x141   :  { %v855_v61 = vmul.f32 1.442695, %v712_v18  ;;  %v4976_v18 = vpack.c.bf16 %v1015_v56, %v1007_v60  ;;  %v3021_v60 = vld [vmem:[#allocation4 + $0xa8] sm:$0xf0]  ;;  %2133 = vmatpush.bf16.msra.mxu0 %v2968_v20  ;;  %v3599_v38 = vld [vmem:[#allocation4 + $0x94] sm:$0xf]  ;;  %2232 = vmatpush.bf16.msrb.mxu3 %v3184_v10  ;;  %v3176_v6 = vor.u32 %v3639_v7, %v3173_v28  ;;  %v5004_v1 = vpack.c.bf16 %v1046_v55, %v1038_v29 }
 0x142   :  { %3907 = vpow2.f32 %v853_v13  ;;  %v3024_v53 = vor.u32 %v3601_v40, %v3021_v60  ;;  %v3013_v25 = vld [vmem:[#allocation4 + $0x98] sm:$0xf0]  ;;  %v3165_v56 = vld [vmem:[#allocation4 + $0x1c8] sm:$0xf0]  ;;  %vm623_vm9 = vcmp.gt.f32.partialorder %v4929_v15, 0.0  ;;  %v3104_v20 = vor.u32 %v3621_v37, %v3101_v26 }
 0x143   :  { %3909 = vpow2.f32 %v837_v24  ;;  %v516_v39 = vpop.f32.mrf.mxu2  ;;  %2079 = vmatmul.bf16.gmra.mxu2 %v4976_v18  ;;  %v1045_v24 = vsel %vm645_vm4, %v4874_v43, %v2933_v14  ;;  %2113 = vmatmul.bf16.gmra.mxu3 %v4986_v57  ;;  %v3637_v14 = vld [vmem:[#allocation4 + $0x1c4] sm:$0xf]  ;;  %v2941_v31 = vld [vmem:[#allocation4 + $0x8] sm:$0xf0]  ;;  %v3016_v0 = vor.u32 %v3599_v38, %v3013_v25  ;;  %v3093_v36 = vld [vmem:[#allocation4 + $0x138] sm:$0xf0] }
 0x144   :  { %v563_v50 = vpop.f32.mrf.mxu3  ;;  %3911 = vpow2.f32 %v855_v61  ;;  %v1871_v43 = vpop.f32.mrf.mxu0  ;;  %2167 = vmatpush.bf16.msra.mxu1 %v3032_v30  ;;  %v5000_v62 = vadd.f32 %v516_v39, %v4668_v27  ;;  %v5002_v2 = vpack.c.bf16 %v1045_v24, %v1037_v16  ;;  %v2952_v61 = vor.u32 %v3583_v42, %v2949_v58  ;;  %v3581_v34 = vld [vmem:[#allocation4 + $0x4] sm:$0xf]  ;;  %2199 = vmatpush.bf16.msrb.mxu2 %v3112_v63  ;;  %v3619_v30 = vld [vmem:[#allocation4 + $0x134] sm:$0xf]  ;;  %v3005_v16 = vld [vmem:[#allocation4 + $0x88] sm:$0xf0] }
 0x145   :  { %3913 = vpow2.f32 %v839_v22  ;;  %v5008_v23 = vadd.f32 %v563_v50, %v4680_v52  ;;  %2134 = vmatpush.bf16.msra.mxu0 %v2960_v11  ;;  %v3597_v22 = vld [vmem:[#allocation4 + $0x84] sm:$0xf]  ;;  %vm631_vm10 = vcmp.gt.f32.partialorder %v4954_v32, 0.0  ;;  %2233 = vmatpush.bf16.msrb.mxu3 %v3176_v6  ;;  %v3168_v40 = vor.u32 %v3637_v14, %v3165_v56  ;;  %v3635_v7 = vld [vmem:[#allocation4 + $0x1b4] sm:$0xf] }
 0x146   :  { %v719_v44 = vmin.f32 %v5000_v62, 0.0  ;;  %vm632_vm11 = vcmp.gt.f32.partialorder %v4957_v8, 0.0  ;;  %v2944_v29 = vor.u32 %v3581_v34, %v2941_v31  ;;  %v3157_v28 = vld [vmem:[#allocation4 + $0x1b8] sm:$0xf0]  ;;  %v3096_v63 = vor.u32 %v3619_v30, %v3093_v36  ;;  %v3617_v37 = vld [vmem:[#allocation4 + $0x124] sm:$0xf] }
 0x147   :  { %v1905_v13 = vpop.f32.mrf.mxu1  ;;  %v720_v42 = vmin.f32 %v5008_v23, 0.0  ;;  %v3160_v6 = vor.u32 %v3635_v7, %v3157_v28  ;;  %vm624_vm12 = vcmp.gt.f32.partialorder %v4938_v49, 0.0  ;;  %vm639_vm14 = vcmp.gt.f32.partialorder %v5000_v62, 0.0 }
 0x148   :  { %v3908_v19 = vpop.eup %3907  ;;  %v5010_v45 = vadd.f32 %v1905_v13, %v1871_v43  ;;  %2168 = vmatpush.bf16.msra.mxu1 %v3024_v53  ;;  %2021 = vmatmul.bf16.gmra.mxu0 %v5002_v2  ;;  %v869_v38 = vmul.f32 1.442695, %v719_v44  ;;  %vm640_vm0 = vcmp.gt.f32.partialorder %v5008_v23, 0.0  ;;  %vm2458_vm1 = vcmask 654336  }
 0x149   :  { %v3910_v33 = vpop.eup %3909  ;;  %v2919_v54 = vadd.f32 -1.0, %v3908_v19  ;;  %2135 = vmatpush.bf16.msra.mxu0 %v2952_v61  ;;  %2200 = vmatpush.bf16.msrb.mxu2 %v3104_v20  ;;  %v3633_v19 = vld [vmem:[#allocation4 + $0x1a4] sm:$0xf]  ;;  %v871_v31 = vmul.f32 1.442695, %v720_v42  ;;  %vm2755_vm4 = vcmask 1041408  }
 0x14a   :  { %v3912_v21 = vpop.eup %3911  ;;  %2055 = vmatmul.bf16.gmra.mxu1 %v5004_v1  ;;  %v2911_v55 = vadd.f32 -1.0, %v3910_v33  ;;  %2234 = vmatpush.bf16.msrb.mxu3 %v3168_v40  ;;  %v3149_v33 = vld [vmem:[#allocation4 + $0x1a8] sm:$0xf0]  ;;  %vm2758_vm5 = vcmask 257026  }
 0x14b   :  { %v519_v39 = vpop.f32.mrf.mxu2  ;;  %v3914_v60 = vpop.eup %3913  ;;  %v2920_v11 = vadd.f32 -1.0, %v3912_v21  ;;  %v1031_v25 = vsel %vm631_vm10, %v4954_v32, %v2919_v54  ;;  %v3152_v54 = vor.u32 %v3633_v19, %v3149_v33  ;;  %vm2759_vm6 = vmor %vm2758_vm5, %vm2755_vm4 }
 0x14c   :  { %v566_v50 = vpop.f32.mrf.mxu3  ;;  %v5018_v10 = vadd.f32 %v519_v39, %v4668_v27  ;;  %v1873_v58 = vpop.f32.mrf.mxu0  ;;  %2169 = vmatpush.bf16.msra.mxu1 %v3016_v0  ;;  %v3008_v27 = vor.u32 %v3597_v22, %v3005_v16  ;;  %v2912_v26 = vadd.f32 -1.0, %v3914_v60  ;;  %v1023_v61 = vsel %vm623_vm9, %v4929_v15, %v2911_v55  ;;  %v3615_v0 = vld [vmem:[#allocation4 + $0x114] sm:$0xf]  ;;  %v3077_v22 = vld [vmem:[#allocation4 + $0x118] sm:$0xf0] }
 0x14d   :  { %v5021_v24 = vadd.f32 %v566_v50, %v4680_v52  ;;  %v3085_v52 = vld [vmem:[#allocation4 + $0x128] sm:$0xf0]  ;;  %v1032_v34 = vsel %vm632_vm11, %v4957_v8, %v2920_v11  ;;  %2136 = vmatpush.bf16.msra.mxu0 %v2944_v29  ;;  %2201 = vmatpush.bf16.msrb.mxu2 %v3096_v63  ;;  %v5038_v21 = vpack.c.bf16 %v1031_v25, %v1023_v61  ;;  %v3631_v39 = vld [vmem:[#allocation4 + $0x194] sm:$0xf]  ;;  %v3141_v50 = vld [vmem:[#allocation4 + $0x198] sm:$0xf0] }
 0x14e   :  { %v727_v43 = vmin.f32 %v5018_v10, 0.0  ;;  %v3088_v32 = vor.u32 %v3617_v37, %v3085_v52  ;;  %v1024_v30 = vsel %vm624_vm12, %v4938_v49, %v2912_v26  ;;  %2235 = vmatpush.bf16.msrb.mxu3 %v3160_v6  ;;  %v3080_v16 = vor.u32 %v3615_v0, %v3077_v22  ;;  %v3613_v49 = vld [vmem:[#allocation4 + $0x104] sm:$0xf]  ;;  %v3069_v60 = vld [vmem:[#allocation4 + $0x108] sm:$0xf0] }
 0x14f   :  { %v728_v53 = vmin.f32 %v5021_v24, 0.0  ;;  %v1907_v13 = vpop.f32.mrf.mxu1  ;;  %v5042_v8 = vpack.c.bf16 %v1032_v34, %v1024_v30  ;;  %v3144_v7 = vor.u32 %v3631_v39, %v3141_v50  ;;  %v3629_v55 = vld [vmem:[#allocation4 + $0x184] sm:$0xf]  ;;  %v3133_v11 = vld [vmem:[#allocation4 + $0x188] sm:$0xf0]  ;;  %vm647_vm13 = vcmp.gt.f32.partialorder %v5018_v10, 0.0 }
 0x150   :  { %v885_v14 = vmul.f32 1.442695, %v727_v43  ;;  %v5036_v20 = vadd.f32 %v1907_v13, %v1873_v58  ;;  %2170 = vmatpush.bf16.msra.mxu1 %v3008_v27  ;;  %v3136_v52 = vor.u32 %v3629_v55, %v3133_v11  ;;  %vm648_vm15 = vcmp.gt.f32.partialorder %v5021_v24, 0.0  ;;  %v3317_v50 = vld [vmem:[#allocation4 + $0x2f8] sm:$0xf0] }
 0x151   :  { %v887_v56 = vmul.f32 1.442695, %v728_v53  ;;  %2202 = vmatpush.bf16.msrb.mxu2 %v3088_v32  ;;  %v3309_v11 = vld [vmem:[#allocation4 + $0x2e8] sm:$0xf0] }
 0x152   :  { %3915 = vpow2.f32 %v885_v14  ;;  %2236 = vmatpush.bf16.msrb.mxu3 %v3152_v54  ;;  %v3659_v54 = vld [vmem:[#allocation4 + $0x274] sm:$0xf] }
 0x153   :  { %3917 = vpow2.f32 %v869_v38  ;;  %v1934_v15 = vpop.f32.mrf.mxu2  ;;  %2084 = vmatmul.bf16.gmra.mxu2 %v5038_v21  ;;  %2118 = vmatmul.bf16.gmra.mxu3 %v5042_v8 }
 0x154   :  { %v1968_v36 = vpop.f32.mrf.mxu3  ;;  %3919 = vpow2.f32 %v887_v56  ;;  %v1935_v44 = vadd.f32 %v1934_v15, %v4912_v47  ;;  %v3072_v47 = vor.u32 %v3613_v49, %v3069_v60 }
 0x155   :  { %3921 = vpow2.f32 %v871_v31  ;;  %v1876_v29 = vpop.f32.mrf.mxu0  ;;  %2203 = vmatpush.bf16.msrb.mxu2 %v3080_v16 }
 0x156   :  { %v5046_v40 = vadd.f32 %v1968_v36, %v1935_v44  ;;  %2237 = vmatpush.bf16.msrb.mxu3 %v3144_v7  ;;  %v3253_v44 = vld [vmem:[#allocation4 + $0x278] sm:$0xf0] }
 0x157   :  { %v1910_v63 = vpop.f32.mrf.mxu1  ;;  %v3256_v39 = vor.u32 %v3659_v54, %v3253_v44  ;;  %v3213_v44 = vld [vmem:[#allocation4 + $0x228] sm:$0xf0] }
 0x158   :  { %v3916_v28 = vpop.eup %3915  ;;  %v1911_v53 = vadd.f32 %v1910_v63, %v1876_v29  ;;  %2137 = vmatmul.bf16.vlgmr.msra.gmra.mxu0 %v4320_v59 }
 0x159   :  { %v3918_v42 = vpop.eup %3917  ;;  %v2935_v58 = vadd.f32 -1.0, %v3916_v28  ;;  %2204 = vmatpush.bf16.msrb.mxu2 %v3072_v47  ;;  %2265 = vmatpush.bf16.msrb.mxu0 %v3256_v39  ;;  %v3245_v28 = vld [vmem:[#allocation4 + $0x268] sm:$0xf0] }
 0x15a   :  { %v3920_v43 = vpop.eup %3919  ;;  %2171 = vmatmul.bf16.vlgmr.msra.gmra.mxu1 %v4326_v3  ;;  %v2927_v25 = vadd.f32 -1.0, %v3918_v42  ;;  %2238 = vmatpush.bf16.msrb.mxu3 %v3136_v52 }
 0x15b   :  { %v1936_v27 = vpop.f32.mrf.mxu2  ;;  %v3922_v26 = vpop.eup %3921  ;;  %v2936_v6 = vadd.f32 -1.0, %v3920_v43  ;;  %v1047_v59 = vsel %vm647_vm13, %v5018_v10, %v2935_v58  ;;  %v3655_v58 = vld [vmem:[#allocation4 + $0x254] sm:$0xf] }
 0x15c   :  { %v1970_v37 = vpop.f32.mrf.mxu3  ;;  %v1937_v38 = vadd.f32 %v1936_v27, %v4962_v5  ;;  %v2928_v14 = vadd.f32 -1.0, %v3922_v26  ;;  %v1039_v3 = vsel %vm639_vm14, %v5000_v62, %v2927_v25  ;;  %v3237_v27 = vld [vmem:[#allocation4 + $0x258] sm:$0xf0] }
 0x15d   :  { %v1878_v56 = vpop.f32.mrf.mxu0  ;;  %v1048_v5 = vsel %vm648_vm15, %v5021_v24, %v2936_v6  ;;  %v5060_v61 = vpack.c.bf16 %v1047_v59, %v1039_v3  ;;  %v3240_v26 = vor.u32 %v3655_v58, %v3237_v27  ;;  %v3707_v27 = vld [vmem:[#allocation4 + $0x3f4] sm:$0xf] }
 0x15e   :  { %v5052_v19 = vadd.f32 %v1970_v37, %v1937_v38  ;;  %v1040_v34 = vsel %vm640_vm0, %v5008_v23, %v2928_v14  ;;  %v3671_v37 = vld [vmem:[#allocation4 + $0x2d4] sm:$0xf]  ;;  %v3301_v38 = vld [vmem:[#allocation4 + $0x2d8] sm:$0xf0] }
 0x15f   :  { %v1912_v33 = vpop.f32.mrf.mxu1  ;;  %v5064_v10 = vpack.c.bf16 %v1048_v5, %v1040_v34  ;;  %v3304_v25 = vor.u32 %v3671_v37, %v3301_v38  ;;  %v3293_v5 = vld [vmem:[#allocation4 + $0x2c8] sm:$0xf0]  ;;  %v3651_v34 = vld [vmem:[#allocation4 + $0x234] sm:$0xf]  ;;  %v3445_v37 = vld [vmem:[#allocation4 + $0x3f8] sm:$0xf0] }
 0x160   :  { %v1913_v13 = vadd.f32 %v1912_v33, %v1878_v56  ;;  %v3669_v56 = vld [vmem:[#allocation4 + $0x2c4] sm:$0xf] }
 0x163   :  { %v1939_v32 = vpop.f32.mrf.mxu2  ;;  %2089 = vmatmul.bf16.gmra.mxu2 %v5060_v61  ;;  %2123 = vmatmul.bf16.gmra.mxu3 %v5064_v10 }
 0x164   :  { %v1940_v31 = vadd.f32 %v1939_v32, %v5010_v45  ;;  %v1973_v0 = vpop.f32.mrf.mxu3  ;;  %v3675_v45 = vld [vmem:[#allocation4 + $0x2f4] sm:$0xf]  ;;  %v3221_v32 = vld [vmem:[#allocation4 + $0x238] sm:$0xf0] }
 0x165   :  { %v1881_v24 = vpop.f32.mrf.mxu0  ;;  %v3320_v49 = vor.u32 %v3675_v45, %v3317_v50  ;;  %v3665_v45 = vld [vmem:[#allocation4 + $0x2a4] sm:$0xf] }
 0x166   :  { %v5068_v62 = vadd.f32 %v1973_v0, %v1940_v31  ;;  %v3296_v31 = vor.u32 %v3669_v56, %v3293_v5  ;;  %v3667_v0 = vld [vmem:[#allocation4 + $0x2b4] sm:$0xf] }
 0x167   :  { %v1915_v22 = vpop.f32.mrf.mxu1  ;;  %2299 = vmatpush.bf16.msrb.mxu1 %v3320_v49 }
 0x168   :  { %v5070_v30 = vadd.f32 %v1915_v22, %v1881_v24  ;;  %2142 = vmatmul.bf16.gmra.mxu0 %v4407_v51  ;;  %v3657_v51 = vld [vmem:[#allocation4 + $0x264] sm:$0xf]  ;;  %v3285_v24 = vld [vmem:[#allocation4 + $0x2b8] sm:$0xf0] }
 0x16a   :  { %2176 = vmatmul.bf16.gmra.mxu1 %v4421_v35  ;;  %v3673_v35 = vld [vmem:[#allocation4 + $0x2e4] sm:$0xf] }
 0x16b   :  { %v1941_v15 = vpop.f32.mrf.mxu2  ;;  %v3312_v47 = vor.u32 %v3673_v35, %v3309_v11  ;;  %v3205_v35 = vld [vmem:[#allocation4 + $0x218] sm:$0xf0] }
 0x16c   :  { %v1942_v23 = vadd.f32 %v1941_v15, %v5036_v20  ;;  %v1975_v36 = vpop.f32.mrf.mxu3  ;;  %v3248_v20 = vor.u32 %v3657_v51, %v3245_v28  ;;  %v3224_v15 = vor.u32 %v3651_v34, %v3221_v32  ;;  %v3647_v28 = vld [vmem:[#allocation4 + $0x214] sm:$0xf] }
 0x16d   :  { %v1883_v60 = vpop.f32.mrf.mxu0  ;;  %2300 = vmatpush.bf16.msrb.mxu1 %v3312_v47  ;;  %v3208_v11 = vor.u32 %v3647_v28, %v3205_v35 }
 0x16e   :  { %v5075_v16 = vadd.f32 %v1975_v36, %v1942_v23  ;;  %2266 = vmatpush.bf16.msrb.mxu0 %v3248_v20  ;;  %v3288_v23 = vor.u32 %v3667_v0, %v3285_v24  ;;  %v3687_v0 = vld [vmem:[#allocation4 + $0x354] sm:$0xf] }
 0x16f   :  { %v1917_v29 = vpop.f32.mrf.mxu1 }
 0x170   :  { %v5077_v7 = vadd.f32 %v1917_v29, %v1883_v60  ;;  %v3277_v60 = vld [vmem:[#allocation4 + $0x2a8] sm:$0xf0] }
 0x171   :  { %2301 = vmatpush.bf16.msrb.mxu1 %v3304_v25  ;;  %v3280_v29 = vor.u32 %v3665_v45, %v3277_v60  ;;  %v5566_v25 = vld [vmem:[#allocation10_spill] sm:$0xff]  ;;  %v3357_v60 = vld [vmem:[#allocation4 + $0x348] sm:$0xf0] }
 0x172   :  { %2267 = vmatpush.bf16.msrb.mxu0 %v3240_v26 }
 0x173   :  { %v1944_v55 = vpop.f32.mrf.mxu2  ;;  %2205 = vmatmul.bf16.vlgmr.msrb.gmra.mxu2 %v4440_v4  ;;  %2239 = vmatmul.bf16.vlgmr.msrb.gmra.mxu3 %v4442_v46  ;;  %v3229_v46 = vld [vmem:[#allocation4 + $0x248] sm:$0xf0] }
 0x174   :  { %v1945_v42 = vadd.f32 %v1944_v55, %v1911_v53  ;;  %v1978_v63 = vpop.f32.mrf.mxu3  ;;  %v3653_v53 = vld [vmem:[#allocation4 + $0x244] sm:$0xf]  ;;  %v3663_v55 = vld [vmem:[#allocation4 + $0x294] sm:$0xf] }
 0x175   :  { %v1886_v52 = vpop.f32.mrf.mxu0  ;;  %v3232_v3 = vor.u32 %v3653_v53, %v3229_v46  ;;  %2302 = vmatpush.bf16.msrb.mxu1 %v3296_v31  ;;  %v3197_v53 = vld [vmem:[#allocation4 + $0x208] sm:$0xf0]  ;;  %v3661_v46 = vld [vmem:[#allocation4 + $0x284] sm:$0xf] }
 0x176   :  { %v5081_v43 = vadd.f32 %v1978_v63, %v1945_v42  ;;  %v3269_v42 = vld [vmem:[#allocation4 + $0x298] sm:$0xf0]  ;;  %v3691_v63 = vld [vmem:[#allocation4 + $0x374] sm:$0xf]  ;;  %v3437_v31 = vld [vmem:[#allocation4 + $0x3e8] sm:$0xf0] }
 0x177   :  { %v1920_v6 = vpop.f32.mrf.mxu1  ;;  %2268 = vmatpush.bf16.msrb.mxu0 %v3232_v3  ;;  %v3272_v47 = vor.u32 %v3663_v55, %v3269_v42  ;;  %v3373_v3 = vld [vmem:[#allocation4 + $0x368] sm:$0xf0]  ;;  %v3683_v42 = vld [vmem:[#allocation4 + $0x334] sm:$0xf] }
 0x178   :  { %v5083_v14 = vadd.f32 %v1920_v6, %v1886_v52  ;;  %2147 = vmatmul.bf16.gmra.mxu0 %v4485_v41  ;;  %v3421_v55 = vld [vmem:[#allocation4 + $0x3c8] sm:$0xf0] }
 0x179   :  { %2303 = vmatpush.bf16.msrb.mxu1 %v3288_v23  ;;  %v3429_v23 = vld [vmem:[#allocation4 + $0x3d8] sm:$0xf0] }
 0x17a   :  { %2181 = vmatmul.bf16.gmra.mxu1 %v4490_v48 }
 0x17b   :  { %v1946_v4 = vpop.f32.mrf.mxu2  ;;  %2269 = vmatpush.bf16.msrb.mxu0 %v3224_v15 }
 0x17c   :  { %v1947_v59 = vadd.f32 %v1946_v4, %v1913_v13  ;;  %v1980_v33 = vpop.f32.mrf.mxu3  ;;  %v3649_v13 = vld [vmem:[#allocation4 + $0x224] sm:$0xf] }
 0x17d   :  { %v1888_v41 = vpop.f32.mrf.mxu0  ;;  %v3216_v49 = vor.u32 %v3649_v13, %v3213_v44  ;;  %2304 = vmatpush.bf16.msrb.mxu1 %v3280_v29  ;;  %v3701_v29 = vld [vmem:[#allocation4 + $0x3c4] sm:$0xf] }
 0x17e   :  { %v5087_v22 = vadd.f32 %v1980_v33, %v1947_v59  ;;  %v3261_v59 = vld [vmem:[#allocation4 + $0x288] sm:$0xf0]  ;;  %v3689_v33 = vld [vmem:[#allocation4 + $0x364] sm:$0xf] }
 0x17f   :  { %v1922_v36 = vpop.f32.mrf.mxu1  ;;  %2270 = vmatpush.bf16.msrb.mxu0 %v3216_v49  ;;  %v3264_v34 = vor.u32 %v3661_v46, %v3261_v59  ;;  %v3376_v32 = vor.u32 %v3689_v33, %v3373_v3  ;;  %v3685_v49 = vld [vmem:[#allocation4 + $0x344] sm:$0xf]  ;;  %v3679_v59 = vld [vmem:[#allocation4 + $0x314] sm:$0xf] }
 0x180   :  { %v5089_v54 = vadd.f32 %v1922_v36, %v1888_v41  ;;  %v3703_v41 = vld [vmem:[#allocation4 + $0x3d4] sm:$0xf] }
 0x181   :  { %2305 = vmatpush.bf16.msrb.mxu1 %v3272_v47  ;;  %v3432_v44 = vor.u32 %v3703_v41, %v3429_v23  ;;  %v3413_v47 = vld [vmem:[#allocation4 + $0x3b8] sm:$0xf0]  ;;  %v5571_v41 = vld [vmem:[#allocation13_spill] sm:$0xff] }
 0x182   :  { %v3325_v23 = vld [vmem:[#allocation4 + $0x308] sm:$0xf0] }
 0x183   :  { %v1949_v48 = vpop.f32.mrf.mxu2  ;;  %2210 = vmatmul.bf16.gmra.mxu2 %v4519_v12  ;;  %2244 = vmatmul.bf16.gmra.mxu3 %v4524_v17  ;;  %v3381_v12 = vld [vmem:[#allocation4 + $0x378] sm:$0xf0]  ;;  %v3448_v17 = vor.u32 %v3707_v27, %v3445_v37 }
 0x184   :  { %v1950_v39 = vadd.f32 %v1949_v48, %v5070_v30  ;;  %v1983_v50 = vpop.f32.mrf.mxu3  ;;  %v3384_v58 = vor.u32 %v3691_v63, %v3381_v12  ;;  %2271 = vmatpush.bf16.msrb.mxu0 %v3208_v11  ;;  %v3424_v11 = vor.u32 %v3701_v29, %v3421_v55  ;;  %v3349_v63 = vld [vmem:[#allocation4 + $0x338] sm:$0xf0]  ;;  %v3699_v12 = vld [vmem:[#allocation4 + $0x3b4] sm:$0xf]  ;;  %v5574_v55 = vld [vmem:[#allocation16_spill] sm:$0xff] }
 0x185   :  { %v2002_v20 = vpop.f32.mrf.mxu0  ;;  %2367 = vmatpush.bf16.msra.mxu3 %v3448_v17  ;;  %2306 = vmatpush.bf16.msrb.mxu1 %v3264_v34  ;;  %v3333_v34 = vld [vmem:[#allocation4 + $0x318] sm:$0xf0] }
 0x186   :  { %v5094_v51 = vadd.f32 %v1983_v50, %v1950_v39  ;;  %v2003_v30 = vadd.f32 %v2002_v20, %v5046_v40  ;;  %2333 = vmatpush.bf16.msra.mxu2 %v3384_v58  ;;  %v3645_v40 = vld [vmem:[#allocation4 + $0x204] sm:$0xf]  ;;  %v5567_v39 = vld [vmem:[#allocation11_spill] sm:$0xff] }
 0x187   :  { %v2036_v52 = vpop.f32.mrf.mxu1  ;;  %v3200_v56 = vor.u32 %v3645_v40, %v3197_v53  ;;  %v5568_v20 = vld [vmem:[#allocation12_spill] sm:$0xff]  ;;  %v3341_v40 = vld [vmem:[#allocation4 + $0x328] sm:$0xf0] }
 0x188   :  { %v5097_v26 = vadd.f32 %v2036_v52, %v2003_v30  ;;  %2152 = vmatmul.bf16.gmra.mxu0 %v4563_v9  ;;  %v3705_v9 = vld [vmem:[#allocation4 + $0x3e4] sm:$0xf]  ;;  %v3416_v52 = vor.u32 %v3699_v12, %v3413_v47 }
 0x189   :  { %2272 = vmatpush.bf16.msrb.mxu0 %v3200_v56  ;;  %v3440_v15 = vor.u32 %v3705_v9, %v3437_v31  ;;  %v3697_v53 = vld [vmem:[#allocation4 + $0x3a4] sm:$0xf]  ;;  %v3397_v9 = vld [vmem:[#allocation4 + $0x398] sm:$0xf0] }
 0x18a   :  { %2186 = vmatmul.bf16.gmra.mxu1 %v5566_v25  ;;  %2334 = vmatpush.bf16.msra.mxu2 %v3376_v32  ;;  %v5570_v25 = vld [vmem:[#allocation9_spill] sm:$0xff]  ;;  %v3695_v32 = vld [vmem:[#allocation4 + $0x394] sm:$0xf] }
 0x18b   :  { %v1951_v38 = vpop.f32.mrf.mxu2  ;;  %2368 = vmatpush.bf16.msra.mxu3 %v3440_v15  ;;  %v3336_v15 = vor.u32 %v3679_v59, %v3333_v34 }
 0x18c   :  { %v1952_v6 = vadd.f32 %v1951_v38, %v5077_v7  ;;  %v1985_v4 = vpop.f32.mrf.mxu3  ;;  %v3365_v7 = vld [vmem:[#allocation4 + $0x358] sm:$0xf0]  ;;  %v5569_v38 = vld [vmem:[#allocation8_spill] sm:$0xff] }
 0x18d   :  { %v2004_v24 = vpop.f32.mrf.mxu0  ;;  %v3368_v13 = vor.u32 %v3687_v0, %v3365_v7  ;;  %v3400_v7 = vor.u32 %v3695_v32, %v3397_v9  ;;  %v2405_v32 = vld [vmem:[%s5517_s5 + $0x20] sm:$0xff] }
 0x18e   :  { %v5102_v5 = vadd.f32 %v1985_v4, %v1952_v6  ;;  %v2005_v36 = vadd.f32 %v2004_v24, %v5052_v19  ;;  %v3360_v19 = vor.u32 %v3685_v49, %v3357_v60  ;;  %v3681_v4 = vld [vmem:[#allocation4 + $0x324] sm:$0xf] }
 0x18f   :  { %v2038_v48 = vpop.f32.mrf.mxu1  ;;  %2335 = vmatpush.bf16.msra.mxu2 %v3368_v13  ;;  %2369 = vmatpush.bf16.msra.mxu3 %v3432_v44  ;;  %v3344_v56 = vor.u32 %v3681_v4, %v3341_v40  ;;  %v3389_v13 = vld [vmem:[#allocation4 + $0x388] sm:$0xf0]  ;;  %v5572_v44 = vld [vmem:[#allocation14_spill] sm:$0xff] }
 0x190   :  { %v5105_v45 = vadd.f32 %v2038_v48, %v2005_v36  ;;  %v3693_v36 = vld [vmem:[#allocation4 + $0x384] sm:$0xf] }
 0x193   :  { %2215 = vmatmul.bf16.gmra.mxu2 %v5567_v39  ;;  %v1954_v50 = vpop.f32.mrf.mxu2  ;;  %2249 = vmatmul.bf16.gmra.mxu3 %v5568_v20  ;;  %v3392_v39 = vor.u32 %v3693_v36, %v3389_v13 }
 0x194   :  { %v1955_v28 = vadd.f32 %v1954_v50, %v5083_v14  ;;  %v1988_v35 = vpop.f32.mrf.mxu3  ;;  %2336 = vmatpush.bf16.msra.mxu2 %v3360_v19  ;;  %2370 = vmatpush.bf16.msra.mxu3 %v3424_v11  ;;  %v3352_v14 = vor.u32 %v3683_v42, %v3349_v63  ;;  %v5573_v19 = vld [vmem:[#allocation15_spill] sm:$0xff] }
 0x195   :  { %v2007_v58 = vpop.f32.mrf.mxu0  ;;  %v2401_v63 = vld [vmem:[%s5517_s5] sm:$0xff] }
 0x196   :  { %v5110_v30 = vadd.f32 %v1988_v35, %v1955_v28  ;;  %v2008_v27 = vadd.f32 %v2007_v58, %v5068_v62  ;;  %v3405_v62 = vld [vmem:[#allocation4 + $0x3a8] sm:$0xf0] }
 0x197   :  { %v2041_v37 = vpop.f32.mrf.mxu1  ;;  %v3408_v3 = vor.u32 %v3697_v53, %v3405_v62  ;;  %v5578_v62 = vld [vmem:[#allocation20_spill] sm:$0xff] }
 0x198   :  { %v2042_v17 = vadd.f32 %v2041_v37, %v2008_v27  ;;  %2157 = vmatmul.bf16.gmra.mxu0 %v5569_v38  ;;  %2337 = vmatpush.bf16.msra.mxu2 %v3352_v14  ;;  %v5575_v14 = vld [vmem:[#allocation17_spill] sm:$0xff] }
 0x199   :  { %2371 = vmatpush.bf16.msra.mxu3 %v3416_v52  ;;  %v5576_v52 = vld [vmem:[#allocation18_spill] sm:$0xff] }
 0x19a   :  { %2191 = vmatmul.bf16.gmra.mxu1 %v5570_v25 }
 0x19b   :  { %v1956_v6 = vpop.f32.mrf.mxu2 }
 0x19c   :  { %v1957_v46 = vadd.f32 %v1956_v6, %v5089_v54  ;;  %v1990_v33 = vpop.f32.mrf.mxu3  ;;  %2338 = vmatpush.bf16.msra.mxu2 %v3344_v56  ;;  %v3677_v54 = vld [vmem:[#allocation4 + $0x304] sm:$0xf]  ;;  %v5577_v56 = vld [vmem:[#allocation19_spill] sm:$0xff] }
 0x19d   :  { %v2009_v0 = vpop.f32.mrf.mxu0  ;;  %2372 = vmatpush.bf16.msra.mxu3 %v3408_v3  ;;  %v3328_v48 = vor.u32 %v3677_v54, %v3325_v23  ;;  %v5580_v54 = vld [vmem:[#allocation22_spill] sm:$0xff] }
 0x19e   :  { %v5116_v31 = vadd.f32 %v1990_v33, %v1957_v46  ;;  %v2010_v53 = vadd.f32 %v2009_v0, %v5075_v16 }
 0x19f   :  { %v2043_v24 = vpop.f32.mrf.mxu1 }
 0x1a0   :  { %2339 = vmatpush.bf16.msra.mxu2 %v3336_v15  ;;  %v2044_v59 = vadd.f32 %v2043_v24, %v2010_v53 }
 0x1a1   :  { %2373 = vmatpush.bf16.msra.mxu3 %v3400_v7 }
 0x1a3   :  { %2220 = vmatmul.bf16.gmra.mxu2 %v5571_v41  ;;  %2254 = vmatmul.bf16.gmra.mxu3 %v5572_v44  ;;  %v5579_v41 = vld [vmem:[#allocation21_spill] sm:$0xff] }
 0x1a4   :  { %v2070_v50 = vpop.f32.mrf.mxu2  ;;  %2340 = vmatpush.bf16.msra.mxu2 %v3328_v48 }
 0x1a5   :  { %v2071_v49 = vadd.f32 %v2070_v50, %v5097_v26  ;;  %v2012_v60 = vpop.f32.mrf.mxu0  ;;  %2374 = vmatpush.bf16.msra.mxu3 %v3392_v39  ;;  %v2403_v26 = vld [vmem:[%s5517_s5 + $0x10] sm:$0xff] }
 0x1a6   :  { %v2104_v29 = vpop.f32.mrf.mxu3  ;;  %v2013_v24 = vadd.f32 %v2012_v60, %v5081_v43 }
 0x1a7   :  { %v2046_v28 = vpop.f32.mrf.mxu1  ;;  %v2105_v35 = vadd.f32 %v2104_v29, %v2071_v49  ;;  %v5581_v49 = vld [vmem:[#allocation24_spill] sm:$0xff] }
 0x1a8   :  { %2273 = vmatmul.bf16.vlgmr.msrb.gmra.mxu0 %v5573_v19  ;;  %v2047_v39 = vadd.f32 %v2046_v28, %v2013_v24  ;;  %v2411_v28 = vld [vmem:[%s5517_s5 + $0x50] sm:$0xff] }
 0x1a9   :  { %v5130_v27 = vmul.f32 %v2401_v63, %v2105_v35  ;;  %v5582_v35 = vld [vmem:[#allocation23_spill] sm:$0xff] }
 0x1aa   :  { %2307 = vmatmul.bf16.vlgmr.msrb.gmra.mxu1 %v5574_v55 }
 0x1ac   :  { %v2072_v20 = vpop.f32.mrf.mxu2 }
 0x1ad   :  { %v2073_v11 = vadd.f32 %v2072_v20, %v5105_v45  ;;  %v2014_v42 = vpop.f32.mrf.mxu0 }
 0x1ae   :  { %v2106_v12 = vpop.f32.mrf.mxu3  ;;  %v2015_v50 = vadd.f32 %v2014_v42, %v5087_v22 }
 0x1af   :  { %v2048_v47 = vpop.f32.mrf.mxu1  ;;  %v2107_v58 = vadd.f32 %v2106_v12, %v2073_v11  ;;  %v2409_v11 = vld [vmem:[%s5517_s5 + $0x40] sm:$0xff] }
 0x1b0   :  { %v2049_v19 = vadd.f32 %v2048_v47, %v2015_v50  ;;  %v5583_v47 = vld [vmem:[#allocation25_spill] sm:$0xff] }
 0x1b1   :  { %v5132_v37 = vmul.f32 %v2403_v26, %v2107_v58 }
 0x1b3   :  { %2225 = vmatmul.bf16.gmra.mxu2 %v5575_v14  ;;  %2259 = vmatmul.bf16.gmra.mxu3 %v5576_v52  ;;  %v2442_v45 = vpack.c.bf16 %v5132_v37, %v5130_v27  ;;  %v5584_v14 = vld [vmem:[#allocation26_spill] sm:$0xff] }
 0x1b4   :  { %v2075_v38 = vpop.f32.mrf.mxu2 }
 0x1b5   :  { %v2076_v25 = vadd.f32 %v2075_v38, %v2042_v17  ;;  %v2017_v6 = vpop.f32.mrf.mxu0  ;;  %v2407_v17 = vld [vmem:[%s5517_s5 + $0x30] sm:$0xff] }
 0x1b6   :  { %v2109_v4 = vpop.f32.mrf.mxu3  ;;  %v2018_v58 = vadd.f32 %v2017_v6, %v5094_v51 }
 0x1b7   :  { %v2051_v40 = vpop.f32.mrf.mxu1  ;;  %v2110_v46 = vadd.f32 %v2109_v4, %v2076_v25 }
 0x1b8   :  { %2278 = vmatmul.bf16.gmra.mxu0 %v5577_v56 }
 0x1b9   :  { %v5147_v0 = vmul.f32 %v2405_v32, %v2110_v46  ;;  %v2052_v46 = vadd.f32 %v2051_v40, %v2018_v58 }
 0x1ba   :  { %2312 = vmatmul.bf16.gmra.mxu1 %v5578_v62 }
 0x1bc   :  { %v2077_v33 = vpop.f32.mrf.mxu2 }
 0x1bd   :  { %v2078_v3 = vadd.f32 %v2077_v33, %v2044_v59  ;;  %v2019_v34 = vpop.f32.mrf.mxu0  ;;  %v5585_v59 = vld [vmem:[#allocation28_spill] sm:$0xff] }
 0x1be   :  { %v2111_v9 = vpop.f32.mrf.mxu3  ;;  %v2020_v56 = vadd.f32 %v2019_v34, %v5102_v5  ;;  %v2415_v5 = vld [vmem:[%s5517_s5 + $0x70] sm:$0xff] }
 0x1bf   :  { %v2053_v15 = vpop.f32.mrf.mxu1  ;;  %v2112_v16 = vadd.f32 %v2111_v9, %v2078_v3  ;;  %v5586_v3 = vld [vmem:[#allocation27_spill] sm:$0xff] }
 0x1c0   :  { %v2054_v32 = vadd.f32 %v2053_v15, %v2020_v56 }
 0x1c1   :  { %v5149_v7 = vmul.f32 %v2407_v17, %v2112_v16  ;;  %v2413_v16 = vld [vmem:[%s5517_s5 + $0x60] sm:$0xff] }
 0x1c3   :  { %2341 = vmatmul.bf16.vlgmr.msra.gmra.mxu2 %v5579_v41  ;;  %2375 = vmatmul.bf16.vlgmr.msra.gmra.mxu3 %v5580_v54  ;;  %v2444_v23 = vpack.c.bf16 %v5149_v7, %v5147_v0 }
 0x1c5   :  { %v2022_v48 = vpop.f32.mrf.mxu0 }
 0x1c6   :  { %v2080_v36 = vpop.f32.mrf.mxu2  ;;  %v2114_v13 = vpop.f32.mrf.mxu3  ;;  %v2023_v15 = vadd.f32 %v2022_v48, %v5110_v30 }
 0x1c7   :  { %v2056_v44 = vpop.f32.mrf.mxu1  ;;  %v2081_v29 = vadd.f32 %v2080_v36, %v2047_v39 }
 0x1c8   :  { %2283 = vmatmul.bf16.gmra.mxu0 %v5581_v49 }
 0x1c9   :  { %v2115_v43 = vadd.f32 %v2114_v13, %v2081_v29 }
 0x1ca   :  { %2317 = vmatmul.bf16.gmra.mxu1 %v5582_v35  ;;  %v2057_v35 = vadd.f32 %v2056_v44, %v2023_v15 }
 0x1cb   :  { %v5165_v12 = vmul.f32 %v2409_v11, %v2115_v43 }
 0x1cd   :  { %v2024_v20 = vpop.f32.mrf.mxu0 }
 0x1ce   :  { %v2082_v55 = vpop.f32.mrf.mxu2  ;;  %v2116_v63 = vpop.f32.mrf.mxu3 }
 0x1cf   :  { %v2083_v60 = vadd.f32 %v2082_v55, %v2049_v19  ;;  %v2058_v22 = vpop.f32.mrf.mxu1  ;;  %v2025_v19 = vadd.f32 %v2024_v20, %v5116_v31  ;;  %v2419_v31 = vld [vmem:[%s5517_s5 + $0x90] sm:$0xff] }
 0x1d1   :  { %v2117_v42 = vadd.f32 %v2116_v63, %v2083_v60  ;;  %v2059_v60 = vadd.f32 %v2058_v22, %v2025_v19 }
 0x1d3   :  { %v5167_v26 = vmul.f32 %v2411_v28, %v2117_v42  ;;  %2346 = vmatmul.bf16.gmra.mxu2 %v5583_v47  ;;  %2380 = vmatmul.bf16.gmra.mxu3 %v5584_v14 }
 0x1d5   :  { %v2446_v52 = vpack.c.bf16 %v5167_v26, %v5165_v12  ;;  %v2138_v25 = vpop.f32.mrf.mxu0 }
 0x1d6   :  { %v2085_v38 = vpop.f32.mrf.mxu2  ;;  %v2119_v4 = vpop.f32.mrf.mxu3 }
 0x1d7   :  { %v2172_v53 = vpop.f32.mrf.mxu1  ;;  %v2086_v33 = vadd.f32 %v2085_v38, %v2052_v46 }
 0x1d8   :  { %v2173_v62 = vadd.f32 %v2172_v53, %v2138_v25  ;;  %2288 = vmatmul.bf16.gmra.mxu0 %v5585_v59 }
 0x1d9   :  { %v2120_v6 = vadd.f32 %v2119_v4, %v2086_v33 }
 0x1da   :  { %2322 = vmatmul.bf16.gmra.mxu1 %v5586_v3 }
 0x1db   :  { %v2433_v54 = vmul.f32 %v2413_v16, %v2120_v6 }
 0x1dd   :  { %v2140_v17 = vpop.f32.mrf.mxu0 }
 0x1de   :  { %v2087_v51 = vpop.f32.mrf.mxu2  ;;  %v2121_v41 = vpop.f32.mrf.mxu3 }
 0x1df   :  { %v2088_v9 = vadd.f32 %v2087_v51, %v2054_v32  ;;  %v2174_v40 = vpop.f32.mrf.mxu1 }
 0x1e0   :  { %v2175_v24 = vadd.f32 %v2174_v40, %v2140_v17 }
 0x1e1   :  { %v2122_v34 = vadd.f32 %v2121_v41, %v2088_v9 }
 0x1e3   :  { %v2435_v36 = vmul.f32 %v2415_v5, %v2122_v34  ;;  %2351 = vmatmul.bf16.gmra.mxu2 %v4976_v18  ;;  %2385 = vmatmul.bf16.gmra.mxu3 %v4986_v57  ;;  %v2417_v57 = vld [vmem:[%s5517_s5 + $0x80] sm:$0xff] }
 0x1e5   :  { %v2448_v13 = vpack.c.bf16 %v2435_v36, %v2433_v54  ;;  %v2143_v50 = vpop.f32.mrf.mxu0 }
 0x1e6   :  { %v2090_v39 = vpop.f32.mrf.mxu2  ;;  %v2124_v49 = vpop.f32.mrf.mxu3 }
 0x1e7   :  { %v2177_v29 = vpop.f32.mrf.mxu1  ;;  %v2091_v43 = vadd.f32 %v2090_v39, %v2057_v35 }
 0x1e8   :  { %v2178_v55 = vadd.f32 %v2177_v29, %v2143_v50  ;;  %2293 = vmatmul.bf16.gmra.mxu0 %v5002_v2 }
 0x1e9   :  { %v2125_v11 = vadd.f32 %v2124_v49, %v2091_v43 }
 0x1ea   :  { %2327 = vmatmul.bf16.gmra.mxu1 %v5004_v1 }
 0x1eb   :  { %v2437_v28 = vmul.f32 %v2417_v57, %v2125_v11 }
 0x1ed   :  { %v2145_v48 = vpop.f32.mrf.mxu0 }
 0x1ee   :  { %v2092_v18 = vpop.f32.mrf.mxu2  ;;  %v2126_v63 = vpop.f32.mrf.mxu3 }
 0x1ef   :  { %v2093_v30 = vadd.f32 %v2092_v18, %v2059_v60  ;;  %v2179_v44 = vpop.f32.mrf.mxu1 }
 0x1f0   :  { %v2180_v2 = vadd.f32 %v2179_v44, %v2145_v48 }
 0x1f1   :  { %v2127_v20 = vadd.f32 %v2126_v63, %v2093_v30 }
 0x1f3   :  { %v2439_v42 = vmul.f32 %v2419_v31, %v2127_v20  ;;  %2356 = vmatmul.bf16.gmra.mxu2 %v5038_v21  ;;  %2390 = vmatmul.bf16.gmra.mxu3 %v5042_v8 }
 0x1f5   :  { %v2450_v1 = vpack.c.bf16 %v2439_v42, %v2437_v28  ;;  %v2148_v58 = vpop.f32.mrf.mxu0 }
 0x1f6   :  { %v2206_v22 = vpop.f32.mrf.mxu2  ;;  %v2240_v14 = vpop.f32.mrf.mxu3 }
 0x1f7   :  { %v2207_v47 = vadd.f32 %v2206_v22, %v2173_v62  ;;  %2465 = vmatpush.bf16.msra.mxu0 %v2450_v1  ;;  %v2182_v38 = vpop.f32.mrf.mxu1 }
 0x1f8   :  { %v2183_v4 = vadd.f32 %v2182_v38, %v2148_v58 }
 0x1f9   :  { %v2241_v25 = vadd.f32 %v2240_v14, %v2207_v47 }
 0x1fb   :  { %2466 = vmatpush.bf16.msra.mxu0 %v2448_v13 }
 0x1fd   :  { %v2150_v56 = vpop.f32.mrf.mxu0 }
 0x1fe   :  { %v2208_v53 = vpop.f32.mrf.mxu2  ;;  %v2242_v21 = vpop.f32.mrf.mxu3 }
 0x1ff   :  { %v2209_v46 = vadd.f32 %v2208_v53, %v2175_v24  ;;  %2467 = vmatpush.bf16.msra.mxu0 %v2446_v52  ;;  %v2184_v59 = vpop.f32.mrf.mxu1 }
 0x200   :  { %v2185_v8 = vadd.f32 %v2184_v59, %v2150_v56 }
 0x201   :  { %v2243_v33 = vadd.f32 %v2242_v21, %v2209_v46 }
 0x203   :  { %2361 = vmatmul.bf16.gmra.mxu2 %v5060_v61  ;;  %2468 = vmatpush.bf16.msra.mxu0 %v2444_v23 }
 0x204   :  { %2395 = vmatmul.bf16.gmra.mxu3 %v5064_v10 }
 0x205   :  { %v2153_v12 = vpop.f32.mrf.mxu0 }
 0x206   :  { %v2211_v62 = vpop.f32.mrf.mxu2  ;;  %v2245_v26 = vpop.f32.mrf.mxu3 }
 0x207   :  { %v2212_v3 = vadd.f32 %v2211_v62, %v2178_v55  ;;  %2469 = vmatpush.bf16.msra.mxu0 %v2442_v45  ;;  %v2187_v52 = vpop.f32.mrf.mxu1  ;;  %v2402_v62 = vld [vmem:[%s5517_s5 + $0x8] sm:$0xff] }
 0x208   :  { %v2188_v51 = vadd.f32 %v2187_v52, %v2153_v12  ;;  %v2404_v12 = vld [vmem:[%s5517_s5 + $0x18] sm:$0xff] }
 0x209   :  { %v2246_v32 = vadd.f32 %v2245_v26, %v2212_v3 }
 0x20d   :  { %v2155_v61 = vpop.f32.mrf.mxu0 }
 0x20e   :  { %v2213_v6 = vpop.f32.mrf.mxu2  ;;  %v2247_v17 = vpop.f32.mrf.mxu3 }
 0x20f   :  { %v2214_v9 = vadd.f32 %v2213_v6, %v2180_v2  ;;  %v2189_v16 = vpop.f32.mrf.mxu1 }
 0x210   :  { %v2190_v7 = vadd.f32 %v2189_v16, %v2155_v61 }
 0x211   :  { %v5208_v0 = vadd.f32 %v2247_v17, %v2214_v9 }
 0x215   :  { %v2158_v41 = vpop.f32.mrf.mxu0 }
 0x216   :  { %v2216_v10 = vpop.f32.mrf.mxu2  ;;  %v2250_v5 = vpop.f32.mrf.mxu3 }
 0x217   :  { %v2217_v23 = vadd.f32 %v2216_v10, %v2183_v4  ;;  %v2192_v40 = vpop.f32.mrf.mxu1 }
 0x218   :  { %v2193_v37 = vadd.f32 %v2192_v40, %v2158_v41 }
 0x219   :  { %v5210_v27 = vadd.f32 %v2250_v5, %v2217_v23 }
 0x21d   :  { %v2160_v24 = vpop.f32.mrf.mxu0 }
 0x21e   :  { %v2218_v45 = vpop.f32.mrf.mxu2  ;;  %v2252_v54 = vpop.f32.mrf.mxu3 }
 0x21f   :  { %v2219_v34 = vadd.f32 %v2218_v45, %v2185_v8  ;;  %v2194_v36 = vpop.f32.mrf.mxu1 }
 0x220   :  { %v2195_v13 = vadd.f32 %v2194_v36, %v2160_v24 }
 0x221   :  { %v5212_v15 = vadd.f32 %v2252_v54, %v2219_v34  ;;  %v2408_v34 = vld [vmem:[%s5517_s5 + $0x38] sm:$0xff] }
 0x225   :  { %v2274_v49 = vpop.f32.mrf.mxu0 }
 0x226   :  { %v2221_v39 = vpop.f32.mrf.mxu2  ;;  %v2255_v29 = vpop.f32.mrf.mxu3  ;;  %v2275_v35 = vadd.f32 %v2274_v49, %v2241_v25 }
 0x227   :  { %v2222_v50 = vadd.f32 %v2221_v39, %v2188_v51  ;;  %v2308_v19 = vpop.f32.mrf.mxu1 }
 0x228   :  { %v2309_v43 = vadd.f32 %v2308_v19, %v2275_v35 }
 0x229   :  { %v5214_v55 = vadd.f32 %v2255_v29, %v2222_v50 }
 0x22d   :  { %v2276_v11 = vpop.f32.mrf.mxu0 }
 0x22e   :  { %v2223_v60 = vpop.f32.mrf.mxu2  ;;  %v2257_v30 = vpop.f32.mrf.mxu3  ;;  %v2277_v48 = vadd.f32 %v2276_v11, %v2243_v33 }
 0x22f   :  { %v2224_v18 = vadd.f32 %v2223_v60, %v2190_v7  ;;  %v2310_v57 = vpop.f32.mrf.mxu1 }
 0x230   :  { %v2311_v31 = vadd.f32 %v2310_v57, %v2277_v48  ;;  %v2410_v57 = vld [vmem:[%s5517_s5 + $0x48] sm:$0xff] }
 0x231   :  { %v5216_v63 = vadd.f32 %v2257_v30, %v2224_v18 }
 0x235   :  { %v2279_v2 = vpop.f32.mrf.mxu0 }
 0x236   :  { %v2226_v44 = vpop.f32.mrf.mxu2  ;;  %v2260_v28 = vpop.f32.mrf.mxu3  ;;  %v2280_v42 = vadd.f32 %v2279_v2, %v2246_v32 }
 0x237   :  { %v2227_v20 = vadd.f32 %v2226_v44, %v2193_v37  ;;  %v2313_v22 = vpop.f32.mrf.mxu1  ;;  %v2406_v37 = vld [vmem:[%s5517_s5 + $0x28] sm:$0xff] }
 0x238   :  { %v2314_v47 = vadd.f32 %v2313_v22, %v2280_v42 }
 0x239   :  { %v5218_v1 = vadd.f32 %v2260_v28, %v2227_v20 }
 0x23d   :  { %v2281_v21 = vpop.f32.mrf.mxu0 }
 0x23e   :  { %v2228_v58 = vpop.f32.mrf.mxu2  ;;  %v2262_v38 = vpop.f32.mrf.mxu3  ;;  %v2282_v16 = vadd.f32 %v2281_v21, %v5208_v0 }
 0x23f   :  { %v2229_v14 = vadd.f32 %v2228_v58, %v2195_v13  ;;  %v2315_v8 = vpop.f32.mrf.mxu1 }
 0x240   :  { %v2316_v23 = vadd.f32 %v2315_v8, %v2282_v16 }
 0x241   :  { %v5220_v25 = vadd.f32 %v2262_v38, %v2229_v14  ;;  %v5265_v14 = vld [vmem:[%s5518_s6] sm:$0x3] }
 0x242   :  { %3449 = vmatmul.msk.bf16.vlgmr.msra.gmra.mxu0 %vm2458_vm1, %v5265_v14 }
 0x245   :  { %v2284_v51 = vpop.f32.mrf.mxu0 }
 0x246   :  { %v2342_v4 = vpop.f32.mrf.mxu2  ;;  %v2376_v46 = vpop.f32.mrf.mxu3  ;;  %v2285_v13 = vadd.f32 %v2284_v51, %v5210_v27 }
 0x247   :  { %v2343_v53 = vadd.f32 %v2342_v4, %v2309_v43  ;;  %v2318_v10 = vpop.f32.mrf.mxu1 }
 0x248   :  { %v2319_v35 = vadd.f32 %v2318_v10, %v2285_v13  ;;  %v3738_v13 = vld [vmem:[%s5520_s8 + $0xe4] sm:$0xf0] }
 0x249   :  { %v2377_v56 = vadd.f32 %v2376_v46, %v2343_v53 }
 0x24b   :  { %v5228_v52 = vmul.f32 %v2402_v62, %v2377_v56  ;;  %v2416_v62 = vld [vmem:[%s5517_s5 + $0x78] sm:$0xff] }
 0x24d   :  { %v2286_v41 = vpop.f32.mrf.mxu0 }
 0x24e   :  { %v2344_v59 = vpop.f32.mrf.mxu2  ;;  %v2378_v3 = vpop.f32.mrf.mxu3  ;;  %v2287_v19 = vadd.f32 %v2286_v41, %v5212_v15  ;;  %v3724_v41 = vld [vmem:[%s5520_s8 + $0x74] sm:$0xf0] }
 0x24f   :  { %v2345_v33 = vadd.f32 %v2344_v59, %v2311_v31  ;;  %v2320_v0 = vpop.f32.mrf.mxu1  ;;  %v2412_v31 = vld [vmem:[%s5517_s5 + $0x58] sm:$0xff] }
 0x250   :  { %v2321_v60 = vadd.f32 %v2320_v0, %v2287_v19  ;;  %v3567_v0 = vld [vmem:[%s5520_s8 + $0xe0] sm:$0xf] }
 0x251   :  { %v2379_v26 = vadd.f32 %v2378_v3, %v2345_v33  ;;  %v2414_v33 = vld [vmem:[%s5517_s5 + $0x68] sm:$0xff]  ;;  %v3568_v19 = vor.u32 %v3738_v13, %v3567_v0 }
 0x252   :  { %v3473_v0 = vld [vmem:[%s5520_s8 + $0x28] sm:$0xf0] }
 0x253   :  { %v5230_v32 = vmul.f32 %v2404_v12, %v2379_v26 }
 0x255   :  { %v2443_v6 = vpack.c.bf16 %v5230_v32, %v5228_v52  ;;  %v2289_v49 = vpop.f32.mrf.mxu0  ;;  %v3479_v52 = vld [vmem:[%s5520_s8 + $0x30] sm:$0xf]  ;;  %v3716_v32 = vld [vmem:[%s5520_s8 + $0x34] sm:$0xf0] }
 0x256   :  { %v2347_v9 = vpop.f32.mrf.mxu2  ;;  %v2381_v17 = vpop.f32.mrf.mxu3  ;;  %v2290_v28 = vadd.f32 %v2289_v49, %v5214_v55 }
 0x257   :  { %v2348_v61 = vadd.f32 %v2347_v9, %v2314_v47  ;;  %v2323_v18 = vpop.f32.mrf.mxu1 }
 0x258   :  { %v2324_v38 = vadd.f32 %v2323_v18, %v2290_v28  ;;  %v3513_v18 = vld [vmem:[%s5520_s8 + $0x78] sm:$0xf0]  ;;  %v3721_v28 = vld [vmem:[%s5520_s8 + $0x64] sm:$0xf] }
 0x259   :  { %v2382_v7 = vadd.f32 %v2381_v17, %v2348_v61 }
 0x25b   :  { %v5241_v54 = vmul.f32 %v2406_v37, %v2382_v7  ;;  %v3740_v37 = vld [vmem:[%s5520_s8 + $0xf4] sm:$0xf0] }
 0x25d   :  { %v2291_v20 = vpop.f32.mrf.mxu0 }
 0x25e   :  { %v2349_v5 = vpop.f32.mrf.mxu2  ;;  %v2383_v45 = vpop.f32.mrf.mxu3  ;;  %v2292_v4 = vadd.f32 %v2291_v20, %v5216_v63  ;;  %v2420_v20 = vld [vmem:[%s5517_s5 + $0x98] sm:$0xff] }
 0x25f   :  { %v2350_v40 = vadd.f32 %v2349_v5, %v2316_v23  ;;  %v2325_v47 = vpop.f32.mrf.mxu1  ;;  %v3511_v23 = vld [vmem:[%s5520_s8 + $0x70] sm:$0xf] }
 0x260   :  { %v2326_v46 = vadd.f32 %v2325_v47, %v2292_v4 }
 0x261   :  { %v2384_v24 = vadd.f32 %v2383_v45, %v2350_v40  ;;  %v3512_v40 = vor.u32 %v3724_v41, %v3511_v23  ;;  %v3722_v45 = vld [vmem:[%s5520_s8 + $0x64] sm:$0xf0]  ;;  %v3715_v41 = vld [vmem:[%s5520_s8 + $0x34] sm:$0xf] }
 0x263   :  { %v5243_v36 = vmul.f32 %v2408_v34, %v2384_v24  ;;  %2700 = vmatpush.bf16.msrb.mxu2 %v3512_v40 }
 0x265   :  { %v2445_v39 = vpack.c.bf16 %v5243_v36, %v5241_v54  ;;  %v2294_v55 = vpop.f32.mrf.mxu0  ;;  %v3735_v54 = vld [vmem:[%s5520_s8 + $0xd4] sm:$0xf]  ;;  %v3561_v36 = vld [vmem:[%s5520_s8 + $0xd8] sm:$0xf0] }
 0x266   :  { %v2352_v50 = vpop.f32.mrf.mxu2  ;;  %v2386_v29 = vpop.f32.mrf.mxu3  ;;  %v2295_v51 = vadd.f32 %v2294_v55, %v5218_v1  ;;  %v3575_v1 = vld [vmem:[%s5520_s8 + $0xf0] sm:$0xf] }
 0x267   :  { %v2353_v43 = vadd.f32 %v2352_v50, %v2319_v35  ;;  %v2328_v63 = vpop.f32.mrf.mxu1  ;;  %v3576_v24 = vor.u32 %v3740_v37, %v3575_v1  ;;  %v3481_v1 = vld [vmem:[%s5520_s8 + $0x38] sm:$0xf0] }
 0x268   :  { %v2329_v7 = vadd.f32 %v2328_v63, %v2295_v51 }
 0x269   :  { %v2387_v30 = vadd.f32 %v2386_v29, %v2353_v43  ;;  %v3495_v29 = vld [vmem:[%s5520_s8 + $0x50] sm:$0xf]  ;;  %2713 = vmatpush.bf16.msrb.mxu3 %v3576_v24  ;;  %v3720_v43 = vld [vmem:[%s5520_s8 + $0x54] sm:$0xf0]  ;;  %v3713_v24 = vld [vmem:[%s5520_s8 + $0x24] sm:$0xf] }
 0x26a   :  { %v3496_v47 = vor.u32 %v3720_v43, %v3495_v29  ;;  %v3476_v13 = vor.u32 %v3713_v24, %v3473_v0  ;;  %v3712_v29 = vld [vmem:[%s5520_s8 + $0x14] sm:$0xf0]  ;;  %v3465_v43 = vld [vmem:[%s5520_s8 + $0x18] sm:$0xf0] }
 0x26b   :  { %v5255_v2 = vmul.f32 %v2410_v57, %v2387_v30  ;;  %v3736_v57 = vld [vmem:[%s5520_s8 + $0xd4] sm:$0xf0] }
 0x26d   :  { %v2296_v61 = vpop.f32.mrf.mxu0  ;;  %2714 = vmatpush.bf16.msrb.mxu3 %v3568_v19 }
 0x26e   :  { %v2354_v11 = vpop.f32.mrf.mxu2  ;;  %v2388_v27 = vpop.f32.mrf.mxu3  ;;  %v2297_v10 = vadd.f32 %v2296_v61, %v5220_v25  ;;  %v3503_v25 = vld [vmem:[%s5520_s8 + $0x60] sm:$0xf]  ;;  %v3739_v61 = vld [vmem:[%s5520_s8 + $0xf4] sm:$0xf] }
 0x26f   :  { %v2355_v48 = vadd.f32 %v2354_v11, %v2321_v60  ;;  %v2330_v34 = vpop.f32.mrf.mxu1  ;;  %v3504_v49 = vor.u32 %v3722_v45, %v3503_v25  ;;  %v3723_v60 = vld [vmem:[%s5520_s8 + $0x74] sm:$0xf]  ;;  %v3471_v25 = vld [vmem:[%s5520_s8 + $0x20] sm:$0xf]  ;;  %v3714_v45 = vld [vmem:[%s5520_s8 + $0x24] sm:$0xf0] }
 0x270   :  { %v2331_v50 = vadd.f32 %v2330_v34, %v2297_v10  ;;  %v3472_v34 = vor.u32 %v3714_v45, %v3471_v25 }
 0x271   :  { %v2389_v44 = vadd.f32 %v2388_v27, %v2355_v48  ;;  %v3559_v48 = vld [vmem:[%s5520_s8 + $0xd0] sm:$0xf]  ;;  %v3516_v27 = vor.u32 %v3723_v60, %v3513_v18  ;;  %2701 = vmatpush.bf16.msrb.mxu2 %v3504_v49 }
 0x272   :  { %v3560_v4 = vor.u32 %v3736_v57, %v3559_v48  ;;  %v3463_v49 = vld [vmem:[%s5520_s8 + $0x10] sm:$0xf]  ;;  %v3709_v48 = vld [vmem:[%s5520_s8 + $0x4] sm:$0xf] }
 0x273   :  { %v5257_v15 = vmul.f32 %v2412_v31, %v2389_v44  ;;  %v2418_v31 = vld [vmem:[%s5517_s5 + $0x88] sm:$0xff]  ;;  %2726 = vmatpush.bf16.msrb.mxu0 %v3516_v27  ;;  %v3464_v19 = vor.u32 %v3712_v29, %v3463_v49 }
 0x274   :  { %2715 = vmatpush.bf16.msrb.mxu3 %v3560_v4  ;;  %v3732_v4 = vld [vmem:[%s5520_s8 + $0xb4] sm:$0xf0] }
 0x275   :  { %v2447_v42 = vpack.c.bf16 %v5257_v15, %v5255_v2  ;;  %2702 = vmatpush.bf16.msrb.mxu2 %v3496_v47  ;;  %v3569_v2 = vld [vmem:[%s5520_s8 + $0xe8] sm:$0xf0] }
 0x276   :  { %v2357_v22 = vpop.f32.mrf.mxu2  ;;  %v2391_v58 = vpop.f32.mrf.mxu3  ;;  %v3553_v47 = vld [vmem:[%s5520_s8 + $0xc8] sm:$0xf0] }
 0x277   :  { %v2358_v53 = vadd.f32 %v2357_v22, %v2324_v38  ;;  %v3505_v38 = vld [vmem:[%s5520_s8 + $0x68] sm:$0xf0] }
 0x278   :  { %v3508_v55 = vor.u32 %v3721_v28, %v3505_v38  ;;  %v3543_v38 = vld [vmem:[%s5520_s8 + $0xb0] sm:$0xf] }
 0x279   :  { %v2392_v21 = vadd.f32 %v2391_v58, %v2358_v53  ;;  %v3487_v58 = vld [vmem:[%s5520_s8 + $0x40] sm:$0xf]  ;;  %v3718_v53 = vld [vmem:[%s5520_s8 + $0x44] sm:$0xf0] }
 0x27a   :  { %2727 = vmatpush.bf16.msrb.mxu0 %v3508_v55  ;;  %v3544_v55 = vor.u32 %v3732_v4, %v3543_v38 }
 0x27b   :  { %v5276_v12 = vmul.f32 %v2414_v33, %v2392_v21  ;;  %v3551_v33 = vld [vmem:[%s5520_s8 + $0xc0] sm:$0xf] }
 0x27e   :  { %v2359_v56 = vpop.f32.mrf.mxu2  ;;  %v2393_v8 = vpop.f32.mrf.mxu3 }
 0x27f   :  { %v2360_v59 = vadd.f32 %v2359_v56, %v2326_v46  ;;  %v3719_v46 = vld [vmem:[%s5520_s8 + $0x54] sm:$0xf]  ;;  %v3497_v56 = vld [vmem:[%s5520_s8 + $0x58] sm:$0xf0] }
 0x280   :  { %v3500_v63 = vor.u32 %v3719_v46, %v3497_v56  ;;  %v3545_v46 = vld [vmem:[%s5520_s8 + $0xb8] sm:$0xf0] }
 0x281   :  { %v2394_v3 = vadd.f32 %v2393_v8, %v2360_v59  ;;  %v3734_v8 = vld [vmem:[%s5520_s8 + $0xc4] sm:$0xf0] }
 0x282   :  { %v3552_v51 = vor.u32 %v3734_v8, %v3551_v33  ;;  %2728 = vmatpush.bf16.msrb.mxu0 %v3500_v63  ;;  %v3729_v33 = vld [vmem:[%s5520_s8 + $0xa4] sm:$0xf]  ;;  %v3527_v63 = vld [vmem:[%s5520_s8 + $0x90] sm:$0xf] }
 0x283   :  { %v5278_v26 = vmul.f32 %v2416_v62, %v2394_v3  ;;  %v3488_v3 = vor.u32 %v3718_v53, %v3487_v58  ;;  %v3731_v53 = vld [vmem:[%s5520_s8 + $0xb4] sm:$0xf] }
 0x284   :  { %2716 = vmatpush.bf16.msrb.mxu3 %v3552_v51  ;;  %v3548_v56 = vor.u32 %v3731_v53, %v3545_v46  ;;  %v3728_v51 = vld [vmem:[%s5520_s8 + $0x94] sm:$0xf0] }
 0x285   :  { %v2449_v9 = vpack.c.bf16 %v5278_v26, %v5276_v12  ;;  %2703 = vmatpush.bf16.msrb.mxu2 %v3488_v3  ;;  %v3737_v12 = vld [vmem:[%s5520_s8 + $0xe4] sm:$0xf] }
 0x286   :  { %v2362_v17 = vpop.f32.mrf.mxu2  ;;  %v3572_v15 = vor.u32 %v3737_v12, %v3569_v2  ;;  %v3519_v2 = vld [vmem:[%s5520_s8 + $0x80] sm:$0xf] }
 0x287   :  { %v2396_v16 = vpop.f32.mrf.mxu3  ;;  %v2363_v5 = vadd.f32 %v2362_v17, %v2329_v7  ;;  %v3577_v17 = vld [vmem:[%s5520_s8 + $0xf8] sm:$0xf0] }
 0x288   :  { %2717 = vmatpush.bf16.msrb.mxu3 %v3544_v55 }
 0x289   :  { %v2397_v11 = vadd.f32 %v2396_v16, %v2363_v5  ;;  %v3580_v16 = vor.u32 %v3739_v61, %v3577_v17  ;;  %v3484_v5 = vor.u32 %v3715_v41, %v3481_v1  ;;  %v3727_v61 = vld [vmem:[%s5520_s8 + $0x94] sm:$0xf]  ;;  %v3528_v17 = vor.u32 %v3728_v51, %v3527_v63 }
 0x28b   :  { %v2438_v21 = vmul.f32 %v2418_v31, %v2397_v11  ;;  %v3455_v11 = vld [vmem:[%s5520_s8] sm:$0xf]  ;;  %v3457_v31 = vld [vmem:[%s5520_s8 + $0x8] sm:$0xf0] }
 0x28e   :  { %v2364_v35 = vpop.f32.mrf.mxu2 }
 0x28f   :  { %v2365_v30 = vadd.f32 %v2364_v35, %v2331_v50  ;;  %v2398_v44 = vpop.f32.mrf.mxu3  ;;  %v3711_v35 = vld [vmem:[%s5520_s8 + $0x14] sm:$0xf] }
 0x290   :  { %v3468_v60 = vor.u32 %v3711_v35, %v3465_v43 }
 0x291   :  { %v2399_v22 = vadd.f32 %v2398_v44, %v2365_v30  ;;  %v3710_v30 = vld [vmem:[%s5520_s8 + $0x4] sm:$0xf0]  ;;  %v3460_v44 = vor.u32 %v3709_v48, %v3457_v31 }
 0x292   :  { %v3456_v27 = vor.u32 %v3710_v30, %v3455_v11 }
 0x293   :  { %v2440_v59 = vmul.f32 %v2420_v20, %v2399_v22  ;;  %v3733_v22 = vld [vmem:[%s5520_s8 + $0xc4] sm:$0xf] }
 0x294   :  { %v3556_v58 = vor.u32 %v3733_v22, %v3553_v47 }
 0x295   :  { %v2451_v62 = vpack.c.bf16 %v2440_v59, %v2438_v21  ;;  %v3535_v21 = vld [vmem:[%s5520_s8 + $0xa0] sm:$0xf]  ;;  %v3730_v59 = vld [vmem:[%s5520_s8 + $0xa4] sm:$0xf0] }
 0x296   :  { %v3536_v8 = vor.u32 %v3730_v59, %v3535_v21 }
 0x297   :  { %2478 = vmatpush.bf16.msra.mxu1 %v2451_v62  ;;  %v3537_v62 = vld [vmem:[%s5520_s8 + $0xa8] sm:$0xf0] }
 0x298   :  { %v3540_v3 = vor.u32 %v3729_v33, %v3537_v62  ;;  %2718 = vmatpush.bf16.msrb.mxu3 %v3536_v8 }
 0x29b   :  { %2479 = vmatpush.bf16.msra.mxu1 %v2449_v9  ;;  %v5403_v9 = vld [vmem:[%s5519_s7] sm:$0x3] }
 0x29c   :  { %v2454_v7 = vperm.slane %v5403_v9, 0  ;;  %2719 = vmatpush.bf16.msrb.mxu3 %v3528_v17 }
 0x29f   :  { %2480 = vmatpush.bf16.msra.mxu1 %v2447_v42  ;;  %v3480_v42 = vor.u32 %v3716_v32, %v3479_v52  ;;  %v2455_v32 = vperm.slane %v5403_v9, 1  ;;  %v2534_v9 = vld [vmem:[%s5521_s9] sm:$0x3] }
 0x2a0   :  { %v2537_v45 = vperm.slane %v2534_v9, 1 }
 0x2a1   :  { %2704 = vmatpush.bf16.msrb.mxu2 %v3480_v42 }
 0x2a3   :  { %2481 = vmatpush.bf16.msra.mxu1 %v2445_v39  ;;  %v3564_v39 = vor.u32 %v3735_v54, %v3561_v36  ;;  %v3725_v54 = vld [vmem:[%s5520_s8 + $0x84] sm:$0xf] }
 0x2a5   :  { %2705 = vmatpush.bf16.msrb.mxu2 %v3472_v34 }
 0x2a7   :  { %2482 = vmatpush.bf16.msra.mxu1 %v2443_v6  ;;  %v3717_v6 = vld [vmem:[%s5520_s8 + $0x44] sm:$0xf] }
 0x2a9   :  { %2706 = vmatpush.bf16.msrb.mxu2 %v3464_v19 }
 0x2aa   :  { %3450 = vmatmul.msk.bf16.vlgmr.msra.gmra.mxu1 %vm2458_vm1, %v5265_v14  ;;  %v3489_v14 = vld [vmem:[%s5520_s8 + $0x48] sm:$0xf0] }
 0x2ab   :  { %2739 = vmatpush.bf16.msrb.mxu1 %v3580_v16  ;;  %v3492_v26 = vor.u32 %v3717_v6, %v3489_v14  ;;  %v3529_v16 = vld [vmem:[%s5520_s8 + $0x98] sm:$0xf0] }
 0x2ac   :  { %v3532_v12 = vor.u32 %v3727_v61, %v3529_v16 }
 0x2ad   :  { %2729 = vmatpush.bf16.msrb.mxu0 %v3492_v26  ;;  %2707 = vmatpush.bf16.msrb.mxu2 %v3456_v27 }
 0x2af   :  { %2740 = vmatpush.bf16.msrb.mxu1 %v3572_v15  ;;  %v3726_v15 = vld [vmem:[%s5520_s8 + $0x84] sm:$0xf0] }
 0x2b0   :  { %v3520_v36 = vor.u32 %v3726_v15, %v3519_v2 }
 0x2b1   :  { %2730 = vmatpush.bf16.msrb.mxu0 %v3484_v5 }
 0x2b2   :  { %2720 = vmatpush.bf16.msrb.mxu3 %v3520_v36 }
 0x2b3   :  { %2741 = vmatpush.bf16.msrb.mxu1 %v3564_v39  ;;  %v3521_v39 = vld [vmem:[%s5520_s8 + $0x88] sm:$0xf0] }
 0x2b4   :  { %v3524_v52 = vor.u32 %v3725_v54, %v3521_v39 }
 0x2b5   :  { %2731 = vmatpush.bf16.msrb.mxu0 %v3476_v13  ;;  %v2536_v13 = vperm.slane %v2534_v9, 0 }
 0x2b7   :  { %2742 = vmatpush.bf16.msrb.mxu1 %v3556_v58 }
 0x2b9   :  { %2732 = vmatpush.bf16.msrb.mxu0 %v3468_v60 }
 0x2bb   :  { %2743 = vmatpush.bf16.msrb.mxu1 %v3548_v56 }
 0x2bd   :  { %2733 = vmatpush.bf16.msrb.mxu0 %v3460_v44 }
 0x2bf   :  { %v2471_v10 = vpop.f32.mrf.mxu0  ;;  %2744 = vmatpush.bf16.msrb.mxu1 %v3540_v3 }
 0x2c0   :  { %v2472_v23 = vadd.f32 %v2471_v10, %v2454_v7 }
 0x2c2   :  { %v2490_v40 = vmin.f32 %v2472_v23, 0.0  ;;  %vm2488_vm2 = vcmp.gt.f32.partialorder %v2472_v23, 0.0 }
 0x2c3   :  { %2745 = vmatpush.bf16.msrb.mxu1 %v3532_v12 }
 0x2c4   :  { %v2492_v37 = vmul.f32 1.442695, %v2490_v40 }
 0x2c6   :  { %3923 = vpow2.f32 %v2492_v37 }
 0x2c7   :  { %v2473_v50 = vpop.f32.mrf.mxu0  ;;  %2746 = vmatpush.bf16.msrb.mxu1 %v3524_v52 }
 0x2cc   :  { %v3924_v18 = vpop.eup %3923 }
 0x2cd   :  { %v3451_v57 = vadd.f32 -1.0, %v3924_v18 }
 0x2cf   :  { %v2498_v20 = vsel %vm2488_vm2, %v2472_v23, %v3451_v57 }
 0x2d0   :  { %v2500_v28 = vpack.c.bf16 %v2498_v20, %v2498_v20 }
 0x2d2   :  { %2708 = vmatmul.bf16.vlgmr.msrb.gmra.mxu2 %v2500_v28  ;;  %2734 = vmatmul.bf16.vlgmr.msrb.gmra.mxu0 %v2500_v28 }
 0x327   :  { %v2484_v6 = vpop.f32.mrf.mxu1 }
 0x328   :  { %v2485_v42 = vadd.f32 %v2484_v6, %v2455_v32 }
 0x32a   :  { %v2491_v14 = vmin.f32 %v2485_v42, 0.0  ;;  %vm2489_vm3 = vcmp.gt.f32.partialorder %v2485_v42, 0.0 }
 0x32c   :  { %v2494_v26 = vmul.f32 1.442695, %v2491_v14 }
 0x32e   :  { %3925 = vpow2.f32 %v2494_v26 }
 0x32f   :  { %v2486_v7 = vpop.f32.mrf.mxu1 }
 0x334   :  { %v3926_v10 = vpop.eup %3925 }
 0x335   :  { %v3452_v23 = vadd.f32 -1.0, %v3926_v10 }
 0x337   :  { %v2499_v41 = vsel %vm2489_vm3, %v2485_v42, %v3452_v23 }
 0x338   :  { %v2501_v1 = vpack.c.bf16 %v2499_v41, %v2499_v41 }
 0x33a   :  { %2721 = vmatmul.bf16.vlgmr.msrb.gmra.mxu3 %v2501_v1  ;;  %2747 = vmatmul.bf16.vlgmr.msrb.gmra.mxu1 %v2501_v1 }
 0x34f   :  { %v2735_v5 = vpop.f32.mrf.mxu0 }
 0x350   :  { %v2736_v34 = vadd.f32 %v2735_v5, %v2537_v45 }
 0x355   :  { %v2709_v40 = vpop.f32.mrf.mxu2 }
 0x356   :  { %v2710_v50 = vadd.f32 %v2709_v40, %v2536_v13 }
 0x357   :  { %v2737_v37 = vpop.f32.mrf.mxu0 }
 0x35d   :  { %v2711_v25 = vpop.f32.mrf.mxu2 }
 0x3b7   :  { %v2748_v24 = vpop.f32.mrf.mxu1 }
 0x3b8   :  { %v2749_v0 = vadd.f32 %v2748_v24, %v2736_v34 }
 0x3ba   :  { %2762 = vst.sshfl [vmem:[#allocation1 + $0x8] sm:$0xff pattern:$0x73625140] %v2749_v0  ;;  %v2754_v29 = vrot.slane %v2749_v0, 6 }
 0x3bd   :  { %v2722_v49 = vpop.f32.mrf.mxu3 }
 0x3be   :  { %v2723_v35 = vadd.f32 %v2722_v49, %v2710_v50 }
 0x3bf   :  { %v2750_v19 = vpop.f32.mrf.mxu1 }
 0x3c0   :  { %v2756_v43 = vsel %vm2755_vm4, %v2723_v35, %v2754_v29  ;;  %2761 = vst.sshfl [vmem:[#allocation1] sm:$0xff pattern:$0x73625140] %v2723_v35 }
 0x3c1   :  { %2760 = vst.msk [vmem:[%s5522_s10] sm:$0xf] %vm2759_vm6, %v2756_v43 }
 0x3c5   :  { %v2724_v60 = vpop.f32.mrf.mxu3 }
 0x3c7   :  { %v2764_v18 = vld [vmem:[#allocation1 + $0x1] ss:$4 sm:$0xff] }
 0x3c8   :  { %2766 = vst.msk [vmem:[%s5523_s11] sm:$0xf] %vm2759_vm6, %v2764_v18 }
 0x3c9   :  { %2775 = vsyncpa [#allocation3], 1 }
 0x3ca   :  { %2776 = vsyncpa [#allocation5], 1 }

</bundles_post_ra>
